<compile_context>
chip_gen: v7x
topology: tpu7x:2x2x1
jax: 0.10.0
libtpu: 0.0.40
codegen_flags: <defaults>
</compile_context>

<pallas_src>
import math
from functools import partial

import jax
import jax.numpy as jnp
from jax import lax
from jax.experimental import pallas as pl
from jax.experimental.pallas import tpu as pltpu


def _round_up(x, m):
    return (x + m - 1) // m * m


def _seq2seq_att_kernel(xp_e_ref, xp_d_ref, whh_e_ref, whh_d_ref, watt_ref,
                        w_dec_ref, w_att_ref, bout_ref, out_ref):
    """One batch tile of the full forward pass.

    xp_e_ref: (T_in,  BT, H)  encoder input projections emb_e[x_t] (biases folded in)
    xp_d_ref: (T_out, BT, H)  decoder input projections
    whh_*:    (H, H)          recurrent weights, pre-transposed (h @ W)
    watt:     (H, H)          'general' attention W, pre-transposed
    w_dec:    (H, V)          output Linear columns acting on the decoder hidden
    w_att:    (H, V)          output Linear columns acting on the attention context
    bout:     (1, V)          output bias; padded vocab lanes = -1e9
    out_ref:  (BT*T_out, V)   log-softmax predictions, row = b*T_out + o
    """
    T_in, BT, H = xp_e_ref.shape
    T_out = xp_d_ref.shape[0]

    whh_e = whh_e_ref[...]
    whh_d = whh_d_ref[...]

    # ---- Encoder RNN (tanh), h_0 = 0.  Hidden state lives in registers; T is
    # tiny and static, so the loops are fully unrolled Python loops and all
    # hiddens together are only ~T vregs — no VMEM scratch round trip.
    # NOTE: jnp.dot reuses the same RHS every step; explicit MXU weight staging
    # (pltpu.matmul_push_rhs / matmul_acc_lhs / matmul_pop) could shave the
    # per-step weight push on the serial chain, but is not required.
    h = jnp.zeros((BT, H), jnp.float32)
    enc_steps = []
    for t in range(T_in):
        h = jnp.tanh(xp_e_ref[t]
                     + jnp.dot(h, whh_e, preferred_element_type=jnp.float32))
        enc_steps.append(h)

    # ---- Decoder RNN, initial hidden = encoder final hidden.
    dec_steps = []
    for t in range(T_out):
        h = jnp.tanh(xp_d_ref[t]
                     + jnp.dot(h, whh_d, preferred_element_type=jnp.float32))
        dec_steps.append(h)

    enc_b = jnp.stack(enc_steps, axis=1)            # (BT, T_in,  H)
    dec_b = jnp.stack(dec_steps, axis=1)            # (BT, T_out, H)

    # ---- 'general' attention: batched MXU contractions (batch dim = BT).
    energy = jnp.dot(enc_b.reshape(BT * T_in, H), watt_ref[...],
                     preferred_element_type=jnp.float32).reshape(BT, T_in, H)
    # scores[b, o, t] = sum_h dec[b, o, h] * energy[b, t, h]
    scores = jnp.einsum('boh,bth->bot', dec_b, energy,
                        preferred_element_type=jnp.float32)    # (BT, T_out, T_in)
    # softmax over the encoder-time axis (lane-dense last axis).
    m = jnp.max(scores, axis=2, keepdims=True)
    e = jnp.exp(scores - m)
    w = e * pl.reciprocal(jnp.sum(e, axis=2, keepdims=True), approx=False)
    # contexts[b, o, h] = sum_t w[b, o, t] * enc[b, t, h]
    attn_b = jnp.einsum('bot,bth->boh', w, enc_b,
                        preferred_element_type=jnp.float32)    # (BT, T_out, H)

    # ---- Output projection (no concat: two matmuls accumulate in f32)
    #      + log-softmax + single lane-dense store.
    dec2 = dec_b.reshape(BT * T_out, H)
    attn2 = attn_b.reshape(BT * T_out, H)
    logits = (jnp.dot(dec2, w_dec_ref[...], preferred_element_type=jnp.float32)
              + jnp.dot(attn2, w_att_ref[...], preferred_element_type=jnp.float32)
              + bout_ref[...])                                 # (BT*T_out, V)
    lm = jnp.max(logits, axis=1, keepdims=True)
    shifted = logits - lm
    lse = jnp.log(jnp.sum(jnp.exp(shifted), axis=1, keepdims=True))
    out_ref[...] = shifted - lse


def prepare_weights(params):
    """One-time conversion of PyTorch-convention params into kernel layout:
    padded to native (8,128) tiles, pre-transposed for h @ W, RNN biases folded
    into the embedding rows, and the output Linear split into dec/attn halves.
    Call this ONCE; it keeps the padding/transpose work off the per-call path."""
    H, V = params['W_ih_e'].shape
    H_pad = _round_up(H, 128)
    V_pad = _round_up(V, 128)
    f32 = jnp.float32

    b_e = (params['b_ih_e'] + params['b_hh_e']).astype(f32)
    b_d = (params['b_ih_d'] + params['b_hh_d']).astype(f32)
    # one_hot(x) @ W_ih.T + (b_ih + b_hh) is exactly a row gather of (W_ih.T + b).
    emb_e = jnp.zeros((V, H_pad), f32).at[:, :H].set(
        params['W_ih_e'].T.astype(f32) + b_e[None, :])
    emb_d = jnp.zeros((V, H_pad), f32).at[:, :H].set(
        params['W_ih_d'].T.astype(f32) + b_d[None, :])

    pad_hh = lambda w: jnp.zeros((H_pad, H_pad), f32).at[:H, :H].set(w.T.astype(f32))

    wout_t = params['W_out'].T.astype(f32)                      # (2H, V)
    w_dec = jnp.zeros((H_pad, V_pad), f32).at[:H, :V].set(wout_t[:H])
    w_att = jnp.zeros((H_pad, V_pad), f32).at[:H, :V].set(wout_t[H:])
    # Padded vocab lanes get a huge negative bias -> exp() == 0 in log-softmax.
    bout = jnp.full((1, V_pad), -1e9, f32).at[0, :V].set(params['b_out'].astype(f32))

    return {
        'emb_e': emb_e, 'emb_d': emb_d,
        'whh_e': pad_hh(params['W_hh_e']),
        'whh_d': pad_hh(params['W_hh_d']),
        'watt': pad_hh(params['W_att']),
        'w_dec': w_dec, 'w_att': w_att, 'bout': bout,
    }


@partial(jax.jit, static_argnums=(3,))
def seq2seq_att_forward(x_tokens, y_tokens, kw, vocab_size):
    """x_tokens: [T_in, B] int32; y_tokens: [T_out, B] int32 (teacher forcing).
    kw: prepare_weights(params).  Returns log-probs [T_out, B, vocab_size]."""
    T_in, B = x_tokens.shape
    T_out = y_tokens.shape[0]
    H_pad = kw['whh_e'].shape[0]
    V_pad = kw['w_dec'].shape[1]
    f32 = jnp.float32

    # Batch tile: one sublane group at toy sizes; grows (<=256) to fill MXU rows
    # and give the v7x megacore >=2 parallel tiles at real batch sizes.
    BT = min(_round_up(B, 8), 256)
    B_pad = _round_up(B, BT)

    # Embedding gather replaces one_hot @ W_ih.T exactly (biases already folded).
    xp_e = jnp.take(kw['emb_e'], x_tokens, axis=0)        # (T_in,  B, H_pad)
    xp_d = jnp.take(kw['emb_d'], y_tokens, axis=0)        # (T_out, B, H_pad)
    xp_e_p = jnp.zeros((T_in, B_pad, H_pad), f32).at[:, :B, :].set(xp_e)
    xp_d_p = jnp.zeros((T_out, B_pad, H_pad), f32).at[:, :B, :].set(xp_d)

    full2d = lambda b: (0, 0)

    out_p = pl.pallas_call(
        _seq2seq_att_kernel,
        out_shape=jax.ShapeDtypeStruct((B_pad * T_out, V_pad), f32),
        grid_spec=pltpu.PrefetchScalarGridSpec(
            num_scalar_prefetch=0,
            grid=(B_pad // BT,),
            in_specs=[
                pl.BlockSpec((T_in, BT, H_pad), lambda b: (0, b, 0)),
                pl.BlockSpec((T_out, BT, H_pad), lambda b: (0, b, 0)),
                pl.BlockSpec((H_pad, H_pad), full2d),
                pl.BlockSpec((H_pad, H_pad), full2d),
                pl.BlockSpec((H_pad, H_pad), full2d),
                pl.BlockSpec((H_pad, V_pad), full2d),
                pl.BlockSpec((H_pad, V_pad), full2d),
                pl.BlockSpec((1, V_pad), full2d),
            ],
            out_specs=pl.BlockSpec((BT * T_out, V_pad), lambda b: (b, 0)),
        ),
        compiler_params=pltpu.CompilerParams(
            dimension_semantics=("parallel",),       # batch tiles -> 2 TCs on v7x
            vmem_limit_bytes=32 * 1024 * 1024,
        ),
    )(xp_e_p, xp_d_p, kw['whh_e'], kw['whh_d'], kw['watt'],
      kw['w_dec'], kw['w_att'], kw['bout'])

    # (B_pad*T_out, V_pad), row = b*T_out + o  ->  (T_out, B, V)  (layout plumbing
    # done in the wrapper so the kernel store stays lane-dense and transpose-free).
    out = out_p.reshape(B_pad, T_out, V_pad)
    return jnp.transpose(out, (1, 0, 2))[:, :B, :vocab_size]


def reference_forward(x_tokens, y_tokens, p):
    """Pure-JAX reference of Seq2seqAtt.forward (att_mode='general', core='RNN')."""
    H, V = p['W_ih_e'].shape
    B = x_tokens.shape[1]
    x = jax.nn.one_hot(x_tokens, V, dtype=jnp.float32)
    y = jax.nn.one_hot(y_tokens, V, dtype=jnp.float32)

    def rnn(seq, Wih, Whh, bih, bhh, h0):
        def step(h, xt):
            h = jnp.tanh(xt @ Wih.T + h @ Whh.T + bih + bhh)
            return h, h
        hT, hs = lax.scan(step, h0, seq)
        return hs, hT

    enc, h = rnn(x, p['W_ih_e'], p['W_hh_e'], p['b_ih_e'], p['b_hh_e'],
                 jnp.zeros((B, H), jnp.float32))
    dec, _ = rnn(y, p['W_ih_d'], p['W_hh_d'], p['b_ih_d'], p['b_hh_d'], h)
    energy = enc @ p['W_att'].T                                    # (T_in, B, H)
    scores = jnp.sum(energy[None, :, :, :] * dec[:, None, :, :], axis=3)
    w = jax.nn.softmax(scores, axis=1)                             # (T_out, T_in, B)
    attn = jnp.sum(enc[None, :, :, :] * w[:, :, :, None], axis=1)  # (T_out, B, H)
    feat = jnp.concatenate([dec, attn], axis=2)                    # (T_out, B, 2H)
    logits = feat @ p['W_out'].T + p['b_out']
    return jax.nn.log_softmax(logits, axis=2)


def init_params(key, vocab_size, hidden_size):
    ks = jax.random.split(key, 11)
    s = 1.0 / math.sqrt(hidden_size)
    n = lambda k, shape: jax.random.uniform(k, shape, jnp.float32, -s, s)
    return {
        'W_ih_e': n(ks[0], (hidden_size, vocab_size)),
        'W_hh_e': n(ks[1], (hidden_size, hidden_size)),
        'b_ih_e': n(ks[2], (hidden_size,)),
        'b_hh_e': n(ks[3], (hidden_size,)),
        'W_ih_d': n(ks[4], (hidden_size, vocab_size)),
        'W_hh_d': n(ks[5], (hidden_size, hidden_size)),
        'b_ih_d': n(ks[6], (hidden_size,)),
        'b_hh_d': n(ks[7], (hidden_size,)),
        'W_att':  n(ks[8], (hidden_size, hidden_size)),
        'W_out':  n(ks[9], (vocab_size, 2 * hidden_size)),
        'b_out':  n(ks[10], (vocab_size,)),
    }


if __name__ == "__main__":
    vocab_size = 16
    hidden_size = 32
    batch = 2
    max_length = 8           # encoder input length
    T_out = max_length + 1   # teacher-forced decoder input length

    key = jax.random.PRNGKey(0)
    k_p, k_x, k_y = jax.random.split(key, 3)
    params = init_params(k_p, vocab_size, hidden_size)
    x_tokens = jax.random.randint(k_x, (max_length, batch), 0, vocab_size, jnp.int32)
    y_tokens = jax.random.randint(k_y, (T_out, batch), 0, vocab_size, jnp.int32)

    # One-time kernel-layout weight preparation (off the per-call path).
    kw = jax.tree_util.tree_map(jax.block_until_ready, prepare_weights(params))

    out = jax.block_until_ready(seq2seq_att_forward(x_tokens, y_tokens, kw, vocab_size))
    ref = jax.block_until_ready(reference_forward(x_tokens, y_tokens, params))

    assert out.shape == (T_out, batch, vocab_size)
    err = float(jnp.max(jnp.abs(out - ref)))
    assert jnp.allclose(out, ref, atol=1e-4, rtol=1e-4), f"max abs err {err}"

    print("KERNEL_OK")
</pallas_src>

<mosaic_0001>
module attributes {stable_mosaic.version = 11 : i64} {
  func.func @_seq2seq_att_kernel(%arg0: i32, %arg1: memref<8x8x128xf32, #tpu.memory_space<vmem>>, %arg2: memref<9x8x128xf32, #tpu.memory_space<vmem>>, %arg3: memref<128x128xf32, #tpu.memory_space<vmem>>, %arg4: memref<128x128xf32, #tpu.memory_space<vmem>>, %arg5: memref<128x128xf32, #tpu.memory_space<vmem>>, %arg6: memref<128x128xf32, #tpu.memory_space<vmem>>, %arg7: memref<128x128xf32, #tpu.memory_space<vmem>>, %arg8: memref<1x128xf32, #tpu.memory_space<vmem>>, %arg9: memref<72x128xf32, #tpu.memory_space<vmem>>) attributes {dimension_semantics = [#tpu.dimension_semantics<parallel>], iteration_bounds = array<i64: 1>, scalar_prefetch = 0 : i64, scratch_operands = 0 : i64, tpu.core_type = #tpu.core_type<tc>, window_params = [{transform_indices = @transform_0, window_bounds = array<i64: 8, 8, 128>}, {transform_indices = @transform_1, window_bounds = array<i64: 9, 8, 128>}, {pipeline_mode = #tpu.pipeline_mode<synchronous>, transform_indices = @transform_2, window_bounds = array<i64: 128, 128>}, {pipeline_mode = #tpu.pipeline_mode<synchronous>, transform_indices = @transform_3, window_bounds = array<i64: 128, 128>}, {pipeline_mode = #tpu.pipeline_mode<synchronous>, transform_indices = @transform_4, window_bounds = array<i64: 128, 128>}, {pipeline_mode = #tpu.pipeline_mode<synchronous>, transform_indices = @transform_5, window_bounds = array<i64: 128, 128>}, {pipeline_mode = #tpu.pipeline_mode<synchronous>, transform_indices = @transform_6, window_bounds = array<i64: 128, 128>}, {pipeline_mode = #tpu.pipeline_mode<synchronous>, transform_indices = @transform_7, window_bounds = array<i64: 1, 128>}, {transform_indices = @transform_8, window_bounds = array<i64: 72, 128>}]} {
    %c0 = arith.constant 0 : index
    %c0_0 = arith.constant 0 : index
    %0 = vector.load %arg3[%c0, %c0_0] : memref<128x128xf32, #tpu.memory_space<vmem>>, vector<128x128xf32>
    %c0_1 = arith.constant 0 : index
    %c0_2 = arith.constant 0 : index
    %1 = vector.load %arg4[%c0_1, %c0_2] : memref<128x128xf32, #tpu.memory_space<vmem>>, vector<128x128xf32>
    %cst = arith.constant 0.000000e+00 : f32
    %2 = vector.broadcast %cst : f32 to vector<8x128xf32>
    %c0_3 = arith.constant 0 : index
    %c0_4 = arith.constant 0 : index
    %c0_5 = arith.constant 0 : index
    %3 = vector.load %arg1[%c0_3, %c0_4, %c0_5] : memref<8x8x128xf32, #tpu.memory_space<vmem>>, vector<1x8x128xf32>
    %4 = vector.shape_cast %3 : vector<1x8x128xf32> to vector<8x128xf32>
    %cst_6 = arith.constant dense<0.000000e+00> : vector<8x128xf32>
    %5 = tpu.matmul %2, %0, %cst_6 {dimension_numbers = #tpu.dot_dimension_numbers<[1], [0], [0], [1], [0, 0, 1, 1], [], []>} : vector<8x128xf32>, vector<128x128xf32>, vector<8x128xf32> -> vector<8x128xf32>
    %6 = arith.addf %4, %5 : vector<8x128xf32>
    %7 = math.tanh %6 : vector<8x128xf32>
    %c1 = arith.constant 1 : index
    %c0_7 = arith.constant 0 : index
    %c0_8 = arith.constant 0 : index
    %8 = vector.load %arg1[%c1, %c0_7, %c0_8] : memref<8x8x128xf32, #tpu.memory_space<vmem>>, vector<1x8x128xf32>
    %9 = vector.shape_cast %8 : vector<1x8x128xf32> to vector<8x128xf32>
    %cst_9 = arith.constant dense<0.000000e+00> : vector<8x128xf32>
    %10 = tpu.matmul %7, %0, %cst_9 {dimension_numbers = #tpu.dot_dimension_numbers<[1], [0], [0], [1], [0, 0, 1, 1], [], []>} : vector<8x128xf32>, vector<128x128xf32>, vector<8x128xf32> -> vector<8x128xf32>
    %11 = arith.addf %9, %10 : vector<8x128xf32>
    %12 = math.tanh %11 : vector<8x128xf32>
    %c2 = arith.constant 2 : index
    %c0_10 = arith.constant 0 : index
    %c0_11 = arith.constant 0 : index
    %13 = vector.load %arg1[%c2, %c0_10, %c0_11] : memref<8x8x128xf32, #tpu.memory_space<vmem>>, vector<1x8x128xf32>
    %14 = vector.shape_cast %13 : vector<1x8x128xf32> to vector<8x128xf32>
    %cst_12 = arith.constant dense<0.000000e+00> : vector<8x128xf32>
    %15 = tpu.matmul %12, %0, %cst_12 {dimension_numbers = #tpu.dot_dimension_numbers<[1], [0], [0], [1], [0, 0, 1, 1], [], []>} : vector<8x128xf32>, vector<128x128xf32>, vector<8x128xf32> -> vector<8x128xf32>
    %16 = arith.addf %14, %15 : vector<8x128xf32>
    %17 = math.tanh %16 : vector<8x128xf32>
    %c3 = arith.constant 3 : index
    %c0_13 = arith.constant 0 : index
    %c0_14 = arith.constant 0 : index
    %18 = vector.load %arg1[%c3, %c0_13, %c0_14] : memref<8x8x128xf32, #tpu.memory_space<vmem>>, vector<1x8x128xf32>
    %19 = vector.shape_cast %18 : vector<1x8x128xf32> to vector<8x128xf32>
    %cst_15 = arith.constant dense<0.000000e+00> : vector<8x128xf32>
    %20 = tpu.matmul %17, %0, %cst_15 {dimension_numbers = #tpu.dot_dimension_numbers<[1], [0], [0], [1], [0, 0, 1, 1], [], []>} : vector<8x128xf32>, vector<128x128xf32>, vector<8x128xf32> -> vector<8x128xf32>
    %21 = arith.addf %19, %20 : vector<8x128xf32>
    %22 = math.tanh %21 : vector<8x128xf32>
    %c4 = arith.constant 4 : index
    %c0_16 = arith.constant 0 : index
    %c0_17 = arith.constant 0 : index
    %23 = vector.load %arg1[%c4, %c0_16, %c0_17] : memref<8x8x128xf32, #tpu.memory_space<vmem>>, vector<1x8x128xf32>
    %24 = vector.shape_cast %23 : vector<1x8x128xf32> to vector<8x128xf32>
    %cst_18 = arith.constant dense<0.000000e+00> : vector<8x128xf32>
    %25 = tpu.matmul %22, %0, %cst_18 {dimension_numbers = #tpu.dot_dimension_numbers<[1], [0], [0], [1], [0, 0, 1, 1], [], []>} : vector<8x128xf32>, vector<128x128xf32>, vector<8x128xf32> -> vector<8x128xf32>
    %26 = arith.addf %24, %25 : vector<8x128xf32>
    %27 = math.tanh %26 : vector<8x128xf32>
    %c5 = arith.constant 5 : index
    %c0_19 = arith.constant 0 : index
    %c0_20 = arith.constant 0 : index
    %28 = vector.load %arg1[%c5, %c0_19, %c0_20] : memref<8x8x128xf32, #tpu.memory_space<vmem>>, vector<1x8x128xf32>
    %29 = vector.shape_cast %28 : vector<1x8x128xf32> to vector<8x128xf32>
    %cst_21 = arith.constant dense<0.000000e+00> : vector<8x128xf32>
    %30 = tpu.matmul %27, %0, %cst_21 {dimension_numbers = #tpu.dot_dimension_numbers<[1], [0], [0], [1], [0, 0, 1, 1], [], []>} : vector<8x128xf32>, vector<128x128xf32>, vector<8x128xf32> -> vector<8x128xf32>
    %31 = arith.addf %29, %30 : vector<8x128xf32>
    %32 = math.tanh %31 : vector<8x128xf32>
    %c6 = arith.constant 6 : index
    %c0_22 = arith.constant 0 : index
    %c0_23 = arith.constant 0 : index
    %33 = vector.load %arg1[%c6, %c0_22, %c0_23] : memref<8x8x128xf32, #tpu.memory_space<vmem>>, vector<1x8x128xf32>
    %34 = vector.shape_cast %33 : vector<1x8x128xf32> to vector<8x128xf32>
    %cst_24 = arith.constant dense<0.000000e+00> : vector<8x128xf32>
    %35 = tpu.matmul %32, %0, %cst_24 {dimension_numbers = #tpu.dot_dimension_numbers<[1], [0], [0], [1], [0, 0, 1, 1], [], []>} : vector<8x128xf32>, vector<128x128xf32>, vector<8x128xf32> -> vector<8x128xf32>
    %36 = arith.addf %34, %35 : vector<8x128xf32>
    %37 = math.tanh %36 : vector<8x128xf32>
    %c7 = arith.constant 7 : index
    %c0_25 = arith.constant 0 : index
    %c0_26 = arith.constant 0 : index
    %38 = vector.load %arg1[%c7, %c0_25, %c0_26] : memref<8x8x128xf32, #tpu.memory_space<vmem>>, vector<1x8x128xf32>
    %39 = vector.shape_cast %38 : vector<1x8x128xf32> to vector<8x128xf32>
    %cst_27 = arith.constant dense<0.000000e+00> : vector<8x128xf32>
    %40 = tpu.matmul %37, %0, %cst_27 {dimension_numbers = #tpu.dot_dimension_numbers<[1], [0], [0], [1], [0, 0, 1, 1], [], []>} : vector<8x128xf32>, vector<128x128xf32>, vector<8x128xf32> -> vector<8x128xf32>
    %41 = arith.addf %39, %40 : vector<8x128xf32>
    %42 = math.tanh %41 : vector<8x128xf32>
    %c0_28 = arith.constant 0 : index
    %c0_29 = arith.constant 0 : index
    %c0_30 = arith.constant 0 : index
    %43 = vector.load %arg2[%c0_28, %c0_29, %c0_30] : memref<9x8x128xf32, #tpu.memory_space<vmem>>, vector<1x8x128xf32>
    %44 = vector.shape_cast %43 : vector<1x8x128xf32> to vector<8x128xf32>
    %cst_31 = arith.constant dense<0.000000e+00> : vector<8x128xf32>
    %45 = tpu.matmul %42, %1, %cst_31 {dimension_numbers = #tpu.dot_dimension_numbers<[1], [0], [0], [1], [0, 0, 1, 1], [], []>} : vector<8x128xf32>, vector<128x128xf32>, vector<8x128xf32> -> vector<8x128xf32>
    %46 = arith.addf %44, %45 : vector<8x128xf32>
    %47 = math.tanh %46 : vector<8x128xf32>
    %c1_32 = arith.constant 1 : index
    %c0_33 = arith.constant 0 : index
    %c0_34 = arith.constant 0 : index
    %48 = vector.load %arg2[%c1_32, %c0_33, %c0_34] : memref<9x8x128xf32, #tpu.memory_space<vmem>>, vector<1x8x128xf32>
    %49 = vector.shape_cast %48 : vector<1x8x128xf32> to vector<8x128xf32>
    %cst_35 = arith.constant dense<0.000000e+00> : vector<8x128xf32>
    %50 = tpu.matmul %47, %1, %cst_35 {dimension_numbers = #tpu.dot_dimension_numbers<[1], [0], [0], [1], [0, 0, 1, 1], [], []>} : vector<8x128xf32>, vector<128x128xf32>, vector<8x128xf32> -> vector<8x128xf32>
    %51 = arith.addf %49, %50 : vector<8x128xf32>
    %52 = math.tanh %51 : vector<8x128xf32>
    %c2_36 = arith.constant 2 : index
    %c0_37 = arith.constant 0 : index
    %c0_38 = arith.constant 0 : index
    %53 = vector.load %arg2[%c2_36, %c0_37, %c0_38] : memref<9x8x128xf32, #tpu.memory_space<vmem>>, vector<1x8x128xf32>
    %54 = vector.shape_cast %53 : vector<1x8x128xf32> to vector<8x128xf32>
    %cst_39 = arith.constant dense<0.000000e+00> : vector<8x128xf32>
    %55 = tpu.matmul %52, %1, %cst_39 {dimension_numbers = #tpu.dot_dimension_numbers<[1], [0], [0], [1], [0, 0, 1, 1], [], []>} : vector<8x128xf32>, vector<128x128xf32>, vector<8x128xf32> -> vector<8x128xf32>
    %56 = arith.addf %54, %55 : vector<8x128xf32>
    %57 = math.tanh %56 : vector<8x128xf32>
    %c3_40 = arith.constant 3 : index
    %c0_41 = arith.constant 0 : index
    %c0_42 = arith.constant 0 : index
    %58 = vector.load %arg2[%c3_40, %c0_41, %c0_42] : memref<9x8x128xf32, #tpu.memory_space<vmem>>, vector<1x8x128xf32>
    %59 = vector.shape_cast %58 : vector<1x8x128xf32> to vector<8x128xf32>
    %cst_43 = arith.constant dense<0.000000e+00> : vector<8x128xf32>
    %60 = tpu.matmul %57, %1, %cst_43 {dimension_numbers = #tpu.dot_dimension_numbers<[1], [0], [0], [1], [0, 0, 1, 1], [], []>} : vector<8x128xf32>, vector<128x128xf32>, vector<8x128xf32> -> vector<8x128xf32>
    %61 = arith.addf %59, %60 : vector<8x128xf32>
    %62 = math.tanh %61 : vector<8x128xf32>
    %c4_44 = arith.constant 4 : index
    %c0_45 = arith.constant 0 : index
    %c0_46 = arith.constant 0 : index
    %63 = vector.load %arg2[%c4_44, %c0_45, %c0_46] : memref<9x8x128xf32, #tpu.memory_space<vmem>>, vector<1x8x128xf32>
    %64 = vector.shape_cast %63 : vector<1x8x128xf32> to vector<8x128xf32>
    %cst_47 = arith.constant dense<0.000000e+00> : vector<8x128xf32>
    %65 = tpu.matmul %62, %1, %cst_47 {dimension_numbers = #tpu.dot_dimension_numbers<[1], [0], [0], [1], [0, 0, 1, 1], [], []>} : vector<8x128xf32>, vector<128x128xf32>, vector<8x128xf32> -> vector<8x128xf32>
    %66 = arith.addf %64, %65 : vector<8x128xf32>
    %67 = math.tanh %66 : vector<8x128xf32>
    %c5_48 = arith.constant 5 : index
    %c0_49 = arith.constant 0 : index
    %c0_50 = arith.constant 0 : index
    %68 = vector.load %arg2[%c5_48, %c0_49, %c0_50] : memref<9x8x128xf32, #tpu.memory_space<vmem>>, vector<1x8x128xf32>
    %69 = vector.shape_cast %68 : vector<1x8x128xf32> to vector<8x128xf32>
    %cst_51 = arith.constant dense<0.000000e+00> : vector<8x128xf32>
    %70 = tpu.matmul %67, %1, %cst_51 {dimension_numbers = #tpu.dot_dimension_numbers<[1], [0], [0], [1], [0, 0, 1, 1], [], []>} : vector<8x128xf32>, vector<128x128xf32>, vector<8x128xf32> -> vector<8x128xf32>
    %71 = arith.addf %69, %70 : vector<8x128xf32>
    %72 = math.tanh %71 : vector<8x128xf32>
    %c6_52 = arith.constant 6 : index
    %c0_53 = arith.constant 0 : index
    %c0_54 = arith.constant 0 : index
    %73 = vector.load %arg2[%c6_52, %c0_53, %c0_54] : memref<9x8x128xf32, #tpu.memory_space<vmem>>, vector<1x8x128xf32>
    %74 = vector.shape_cast %73 : vector<1x8x128xf32> to vector<8x128xf32>
    %cst_55 = arith.constant dense<0.000000e+00> : vector<8x128xf32>
    %75 = tpu.matmul %72, %1, %cst_55 {dimension_numbers = #tpu.dot_dimension_numbers<[1], [0], [0], [1], [0, 0, 1, 1], [], []>} : vector<8x128xf32>, vector<128x128xf32>, vector<8x128xf32> -> vector<8x128xf32>
    %76 = arith.addf %74, %75 : vector<8x128xf32>
    %77 = math.tanh %76 : vector<8x128xf32>
    %c7_56 = arith.constant 7 : index
    %c0_57 = arith.constant 0 : index
    %c0_58 = arith.constant 0 : index
    %78 = vector.load %arg2[%c7_56, %c0_57, %c0_58] : memref<9x8x128xf32, #tpu.memory_space<vmem>>, vector<1x8x128xf32>
    %79 = vector.shape_cast %78 : vector<1x8x128xf32> to vector<8x128xf32>
    %cst_59 = arith.constant dense<0.000000e+00> : vector<8x128xf32>
    %80 = tpu.matmul %77, %1, %cst_59 {dimension_numbers = #tpu.dot_dimension_numbers<[1], [0], [0], [1], [0, 0, 1, 1], [], []>} : vector<8x128xf32>, vector<128x128xf32>, vector<8x128xf32> -> vector<8x128xf32>
    %81 = arith.addf %79, %80 : vector<8x128xf32>
    %82 = math.tanh %81 : vector<8x128xf32>
    %c8 = arith.constant 8 : index
    %c0_60 = arith.constant 0 : index
    %c0_61 = arith.constant 0 : index
    %83 = vector.load %arg2[%c8, %c0_60, %c0_61] : memref<9x8x128xf32, #tpu.memory_space<vmem>>, vector<1x8x128xf32>
    %84 = vector.shape_cast %83 : vector<1x8x128xf32> to vector<8x128xf32>
    %cst_62 = arith.constant dense<0.000000e+00> : vector<8x128xf32>
    %85 = tpu.matmul %82, %1, %cst_62 {dimension_numbers = #tpu.dot_dimension_numbers<[1], [0], [0], [1], [0, 0, 1, 1], [], []>} : vector<8x128xf32>, vector<128x128xf32>, vector<8x128xf32> -> vector<8x128xf32>
    %86 = arith.addf %84, %85 : vector<8x128xf32>
    %87 = math.tanh %86 : vector<8x128xf32>
    %88 = vector.shape_cast %7 : vector<8x128xf32> to vector<8x1x128xf32>
    %89 = vector.shape_cast %12 : vector<8x128xf32> to vector<8x1x128xf32>
    %90 = vector.shape_cast %17 : vector<8x128xf32> to vector<8x1x128xf32>
    %91 = vector.shape_cast %22 : vector<8x128xf32> to vector<8x1x128xf32>
    %92 = vector.shape_cast %27 : vector<8x128xf32> to vector<8x1x128xf32>
    %93 = vector.shape_cast %32 : vector<8x128xf32> to vector<8x1x128xf32>
    %94 = vector.shape_cast %37 : vector<8x128xf32> to vector<8x1x128xf32>
    %95 = vector.shape_cast %42 : vector<8x128xf32> to vector<8x1x128xf32>
    %96 = tpu.concatenate %88, %89, %90, %91, %92, %93, %94, %95 in 1 : vector<8x1x128xf32>, vector<8x1x128xf32>, vector<8x1x128xf32>, vector<8x1x128xf32>, vector<8x1x128xf32>, vector<8x1x128xf32>, vector<8x1x128xf32>, vector<8x1x128xf32> -> vector<8x8x128xf32>
    %97 = vector.shape_cast %47 : vector<8x128xf32> to vector<8x1x128xf32>
    %98 = vector.shape_cast %52 : vector<8x128xf32> to vector<8x1x128xf32>
    %99 = vector.shape_cast %57 : vector<8x128xf32> to vector<8x1x128xf32>
    %100 = vector.shape_cast %62 : vector<8x128xf32> to vector<8x1x128xf32>
    %101 = vector.shape_cast %67 : vector<8x128xf32> to vector<8x1x128xf32>
    %102 = vector.shape_cast %72 : vector<8x128xf32> to vector<8x1x128xf32>
    %103 = vector.shape_cast %77 : vector<8x128xf32> to vector<8x1x128xf32>
    %104 = vector.shape_cast %82 : vector<8x128xf32> to vector<8x1x128xf32>
    %105 = vector.shape_cast %87 : vector<8x128xf32> to vector<8x1x128xf32>
    %106 = tpu.concatenate %97, %98, %99, %100, %101, %102, %103, %104, %105 in 1 : vector<8x1x128xf32>, vector<8x1x128xf32>, vector<8x1x128xf32>, vector<8x1x128xf32>, vector<8x1x128xf32>, vector<8x1x128xf32>, vector<8x1x128xf32>, vector<8x1x128xf32>, vector<8x1x128xf32> -> vector<8x9x128xf32>
    %107 = vector.shape_cast %96 : vector<8x8x128xf32> to vector<64x128xf32>
    %c0_63 = arith.constant 0 : index
    %c0_64 = arith.constant 0 : index
    %108 = vector.load %arg5[%c0_63, %c0_64] : memref<128x128xf32, #tpu.memory_space<vmem>>, vector<128x128xf32>
    %cst_65 = arith.constant dense<0.000000e+00> : vector<64x128xf32>
    %109 = tpu.matmul %107, %108, %cst_65 {dimension_numbers = #tpu.dot_dimension_numbers<[1], [0], [0], [1], [0, 0, 1, 1], [], []>} : vector<64x128xf32>, vector<128x128xf32>, vector<64x128xf32> -> vector<64x128xf32>
    %110 = vector.shape_cast %109 : vector<64x128xf32> to vector<8x8x128xf32>
    "tpu.trace_start"() <{level = 10 : i32, message = "boh,bth->bot"}> : () -> ()
    %cst_66 = arith.constant dense<0.000000e+00> : vector<8x9x8xf32>
    %111 = tpu.matmul %106, %110, %cst_66 {dimension_numbers = #tpu.dot_dimension_numbers<[2], [2], [1], [1], [0, 0, 0, 1, 1, 1], [0], [0]>} : vector<8x9x128xf32>, vector<8x8x128xf32>, vector<8x9x8xf32> -> vector<8x9x8xf32>
    "tpu.trace_stop"() : () -> ()
    %cst_67 = arith.constant dense<0xFF800000> : vector<8x9xf32>
    %112 = vector.multi_reduction <maximumf>, %111, %cst_67 [2] : vector<8x9x8xf32> to vector<8x9xf32>
    %113 = vector.shape_cast %112 : vector<8x9xf32> to vector<8x9x1xf32>
    %114 = vector.broadcast %113 : vector<8x9x1xf32> to vector<8x9x8xf32>
    %115 = arith.subf %111, %114 : vector<8x9x8xf32>
    %116 = math.exp %115 : vector<8x9x8xf32>
    %cst_68 = arith.constant dense<0.000000e+00> : vector<8x9xf32>
    %117 = vector.multi_reduction <add>, %116, %cst_68 [2] : vector<8x9x8xf32> to vector<8x9xf32>
    %118 = vector.shape_cast %117 : vector<8x9xf32> to vector<8x9x1xf32>
    %119 = tpu.reciprocal %118 : vector<8x9x1xf32> -> vector<8x9x1xf32>
    %120 = vector.broadcast %119 : vector<8x9x1xf32> to vector<8x9x8xf32>
    %121 = arith.mulf %116, %120 : vector<8x9x8xf32>
    "tpu.trace_start"() <{level = 10 : i32, message = "bot,bth->boh"}> : () -> ()
    %cst_69 = arith.constant dense<0.000000e+00> : vector<8x9x128xf32>
    %122 = tpu.matmul %121, %96, %cst_69 {dimension_numbers = #tpu.dot_dimension_numbers<[2], [1], [1], [2], [0, 0, 0, 1, 1, 2], [0], [0]>} : vector<8x9x8xf32>, vector<8x8x128xf32>, vector<8x9x128xf32> -> vector<8x9x128xf32>
    "tpu.trace_stop"() : () -> ()
    %123 = vector.shape_cast %106 : vector<8x9x128xf32> to vector<72x128xf32>
    %124 = vector.shape_cast %122 : vector<8x9x128xf32> to vector<72x128xf32>
    %c0_70 = arith.constant 0 : index
    %c0_71 = arith.constant 0 : index
    %125 = vector.load %arg6[%c0_70, %c0_71] : memref<128x128xf32, #tpu.memory_space<vmem>>, vector<128x128xf32>
    %cst_72 = arith.constant dense<0.000000e+00> : vector<72x128xf32>
    %126 = tpu.matmul %123, %125, %cst_72 {dimension_numbers = #tpu.dot_dimension_numbers<[1], [0], [0], [1], [0, 0, 1, 1], [], []>} : vector<72x128xf32>, vector<128x128xf32>, vector<72x128xf32> -> vector<72x128xf32>
    %c0_73 = arith.constant 0 : index
    %c0_74 = arith.constant 0 : index
    %127 = vector.load %arg7[%c0_73, %c0_74] : memref<128x128xf32, #tpu.memory_space<vmem>>, vector<128x128xf32>
    %cst_75 = arith.constant dense<0.000000e+00> : vector<72x128xf32>
    %128 = tpu.matmul %124, %127, %cst_75 {dimension_numbers = #tpu.dot_dimension_numbers<[1], [0], [0], [1], [0, 0, 1, 1], [], []>} : vector<72x128xf32>, vector<128x128xf32>, vector<72x128xf32> -> vector<72x128xf32>
    %129 = arith.addf %126, %128 : vector<72x128xf32>
    %c0_76 = arith.constant 0 : index
    %c0_77 = arith.constant 0 : index
    %130 = vector.load %arg8[%c0_76, %c0_77] : memref<1x128xf32, #tpu.memory_space<vmem>>, vector<1x128xf32>
    %131 = vector.broadcast %130 : vector<1x128xf32> to vector<72x128xf32>
    %132 = arith.addf %129, %131 : vector<72x128xf32>
    %cst_78 = arith.constant dense<0xFF800000> : vector<72xf32>
    %133 = vector.multi_reduction <maximumf>, %132, %cst_78 [1] : vector<72x128xf32> to vector<72xf32>
    %134 = vector.shape_cast %133 : vector<72xf32> to vector<72x1xf32>
    %135 = vector.broadcast %134 : vector<72x1xf32> to vector<72x128xf32>
    %136 = arith.subf %132, %135 : vector<72x128xf32>
    %137 = math.exp %136 : vector<72x128xf32>
    %cst_79 = arith.constant dense<0.000000e+00> : vector<72xf32>
    %138 = vector.multi_reduction <add>, %137, %cst_79 [1] : vector<72x128xf32> to vector<72xf32>
    %139 = vector.shape_cast %138 : vector<72xf32> to vector<72x1xf32>
    %140 = math.log %139 : vector<72x1xf32>
    %141 = vector.broadcast %140 : vector<72x1xf32> to vector<72x128xf32>
    %142 = arith.subf %136, %141 : vector<72x128xf32>
    %c0_80 = arith.constant 0 : index
    %c0_81 = arith.constant 0 : index
    %143 = vector.load %arg9[%c0_80, %c0_81] : memref<72x128xf32, #tpu.memory_space<vmem>>, vector<72x128xf32>
    tpu.vector_store %arg9[%c0_80, %c0_81], %142 {strides = array<i32>} : memref<72x128xf32, #tpu.memory_space<vmem>>, vector<72x128xf32>,
    return
  }
  func.func @transform_0(%arg0: i32) -> (i32, i32, i32) {
    %c0_i32 = arith.constant 0 : i32
    %c0_i32_0 = arith.constant 0 : i32
    %c0_i32_1 = arith.constant 0 : i32
    return %c0_i32, %arg0, %c0_i32_0 : i32, i32, i32
  }
  func.func @transform_1(%arg0: i32) -> (i32, i32, i32) {
    %c0_i32 = arith.constant 0 : i32
    %c0_i32_0 = arith.constant 0 : i32
    %c0_i32_1 = arith.constant 0 : i32
    return %c0_i32, %arg0, %c0_i32_0 : i32, i32, i32
  }
  func.func @transform_2(%arg0: i32) -> (i32, i32) {
    %c0_i32 = arith.constant 0 : i32
    %c0_i32_0 = arith.constant 0 : i32
    %c0_i32_1 = arith.constant 0 : i32
    return %c0_i32, %c0_i32_0 : i32, i32
  }
  func.func @transform_3(%arg0: i32) -> (i32, i32) {
    %c0_i32 = arith.constant 0 : i32
    %c0_i32_0 = arith.constant 0 : i32
    %c0_i32_1 = arith.constant 0 : i32
    return %c0_i32, %c0_i32_0 : i32, i32
  }
  func.func @transform_4(%arg0: i32) -> (i32, i32) {
    %c0_i32 = arith.constant 0 : i32
    %c0_i32_0 = arith.constant 0 : i32
    %c0_i32_1 = arith.constant 0 : i32
    return %c0_i32, %c0_i32_0 : i32, i32
  }
  func.func @transform_5(%arg0: i32) -> (i32, i32) {
    %c0_i32 = arith.constant 0 : i32
    %c0_i32_0 = arith.constant 0 : i32
    %c0_i32_1 = arith.constant 0 : i32
    return %c0_i32, %c0_i32_0 : i32, i32
  }
  func.func @transform_6(%arg0: i32) -> (i32, i32) {
    %c0_i32 = arith.constant 0 : i32
    %c0_i32_0 = arith.constant 0 : i32
    %c0_i32_1 = arith.constant 0 : i32
    return %c0_i32, %c0_i32_0 : i32, i32
  }
  func.func @transform_7(%arg0: i32) -> (i32, i32) {
    %c0_i32 = arith.constant 0 : i32
    %c0_i32_0 = arith.constant 0 : i32
    %c0_i32_1 = arith.constant 0 : i32
    return %c0_i32, %c0_i32_0 : i32, i32
  }
  func.func @transform_8(%arg0: i32) -> (i32, i32) {
    %c0_i32 = arith.constant 0 : i32
    %c0_i32_0 = arith.constant 0 : i32
    return %arg0, %c0_i32 : i32, i32
  }
}

</mosaic_0001>

<bundles_post_ra>
// kernel: seq2seq_att_forward.1
= control target key start
LH: loop header
LB: loop body
LE: loop exit
PB: predicated region body
PF: predicated region fallthrough
CT: control target
= control target key end

     0   :  { %v8642_v0 = vmov 0.0|0.0   ;;  %vm8643_vm0 = vmmov 0   ;;  %v8644_v4 = vmov 0.0   ;;  %v8645_v31 = vmov 1966171168   ;;  %s10513_s2 = inlined_call_operand.vmem [shape: f32[128,128], index: 2, kind: input, shape index: {}]   ;;  %s10514_s0 = inlined_call_operand.vmem [shape: f32[8,8,128], index: 0, kind: input, shape index: {}]   ;;  %s10515_s3 = inlined_call_operand.vmem [shape: f32[128,128], index: 3, kind: input, shape index: {}]   ;;  %s10516_s1 = inlined_call_operand.vmem [shape: f32[9,8,128], index: 1, kind: input, shape index: {}]   ;;  %s10517_s4 = inlined_call_operand.vmem [shape: f32[128,128], index: 4, kind: input, shape index: {}]   ;;  %s10518_s6 = inlined_call_operand.vmem [shape: f32[128,128], index: 6, kind: input, shape index: {}]   ;;  %s10519_s5 = inlined_call_operand.vmem [shape: f32[128,128], index: 5, kind: input, shape index: {}]   ;;  %s10520_s7 = inlined_call_operand.vmem [shape: f32[1,128], index: 7, kind: input, shape index: {}]   ;;  %s10521_s8 = inlined_call_operand.vmem [shape: f32[72,128], index: 8, kind: output, shape index: {}]  }
   0x1   :  { %8016 = vmatprep.subr.bf16.mxu0 %v8642_v0  ;;  %v29_v1 = vld [vmem:[%s10513_s2] sm:$0xff]  ;;  %v30_v2 = vld [vmem:[%s10513_s2 + $0x8] sm:$0xff]  ;;  %v31_v3 = vld [vmem:[%s10513_s2 + $0x10] sm:$0xff]  ;;  %7211 = vmatprep.mubr.msk.f32.mxu0 %vm8643_vm0, %v8644_v4  ;;  %v1320_v32 = vunpack.c.l.s4 %v8645_v31  ;;  %v1322_v33 = vlaneseq  ;;  %vm2005_vm1 = vcmask 1040384   ;;  %vm2014_vm2 = vcmask 1041408  }
   0x2   :  { %v8703_v5 = vpack.c.bf16 %v30_v2, %v29_v1  ;;  %v32_v6 = vld [vmem:[%s10513_s2 + $0x18] sm:$0xff]  ;;  %8040 = vmatprep.subr.bf16.mxu1 %v8642_v0  ;;  %7246 = vmatprep.mubr.msk.f32.mxu1 %vm8643_vm0, %v8644_v4  ;;  %v33_v8 = vld [vmem:[%s10513_s2 + $0x20] sm:$0xff]  ;;  %v34_v9 = vld [vmem:[%s10513_s2 + $0x28] sm:$0xff]  ;;  %vm2023_vm3 = vcmask 1042432   ;;  %vm2032_vm4 = vcmask 1043456   ;;  %vm2041_vm5 = vcmask 1044480  }
   0x3   :  { %v8712_v7 = vpack.c.bf16 %v32_v6, %v31_v3  ;;  %v8724_v10 = vpack.c.bf16 %v34_v9, %v33_v8  ;;  %v35_v11 = vld [vmem:[%s10513_s2 + $0x30] sm:$0xff]  ;;  %v36_v12 = vld [vmem:[%s10513_s2 + $0x38] sm:$0xff]  ;;  %v37_v14 = vld [vmem:[%s10513_s2 + $0x40] sm:$0xff]  ;;  %v1321_v35 = vunpack.c.0.s8 %v1320_v32  ;;  %v1323_v36 = vshrl.u32 %v1322_v33, 7 }
   0x4   :  { %8018 = vmatpush3.bf16.msra.mxu0 %v8703_v5  ;;  %8042 = vmatpush3.bf16.msra.mxu1 %v8703_v5  ;;  %v8736_v13 = vpack.c.bf16 %v36_v12, %v35_v11  ;;  %v38_v15 = vld [vmem:[%s10513_s2 + $0x48] sm:$0xff]  ;;  %v39_v17 = vld [vmem:[%s10513_s2 + $0x50] sm:$0xff]  ;;  %v40_v18 = vld [vmem:[%s10513_s2 + $0x58] sm:$0xff]  ;;  %vm2050_vm6 = vcmask 1045504   ;;  %vm2059_vm7 = vcmask 1046528   ;;  %vm3591_vm8 = vcmask 64512  }
   0x5   :  { %8019 = vmatprep.subr.bf16.mxu0 %v8642_v0  ;;  %8043 = vmatprep.subr.bf16.mxu1 %v8642_v0  ;;  %v8748_v16 = vpack.c.bf16 %v38_v15, %v37_v14  ;;  %v8760_v19 = vpack.c.bf16 %v40_v18, %v39_v17  ;;  %v41_v20 = vld [vmem:[%s10513_s2 + $0x60] sm:$0xff]  ;;  %v42_v21 = vld [vmem:[%s10513_s2 + $0x68] sm:$0xff]  ;;  %v43_v23 = vld [vmem:[%s10513_s2 + $0x70] sm:$0xff]  ;;  %v8836_v40 = vsub.s32 %v1321_v35, %v1323_v36  ;;  %v8841_v47 = vsub.s32 0, %v1323_v36 }
   0x6   :  { %v8772_v22 = vpack.c.bf16 %v42_v21, %v41_v20  ;;  %v44_v24 = vld [vmem:[%s10513_s2 + $0x78] sm:$0xff]  ;;  %v61_v26 = vld [vmem:[%s10514_s0] sm:$0xff]  ;;  %v6720_v34 = vld [vmem:[%s10514_s0 + $0x8] sm:$0xff]  ;;  %vm3595_vm9 = vcmask 57344  }
   0x7   :  { %v8784_v25 = vpack.c.bf16 %v44_v24, %v43_v23  ;;  %v6721_v31 = vld [vmem:[%s10514_s0 + $0x10] sm:$0xff] }
   0x8   :  { %8021 = vmatpush3.bf16.msra.mxu0 %v8712_v7  ;;  %8045 = vmatpush3.bf16.msra.mxu1 %v8712_v7 }
   0x9   :  { %8022 = vmatprep.subr.bf16.mxu0 %v8642_v0  ;;  %8046 = vmatprep.subr.bf16.mxu1 %v8642_v0 }
   0xc   :  { %8024 = vmatpush3.bf16.msra.mxu0 %v8724_v10  ;;  %8048 = vmatpush3.bf16.msra.mxu1 %v8724_v10 }
   0xd   :  { %8025 = vmatprep.subr.bf16.mxu0 %v8642_v0  ;;  %8049 = vmatprep.subr.bf16.mxu1 %v8642_v0 }
  0x10   :  { %8027 = vmatpush3.bf16.msra.mxu0 %v8736_v13  ;;  %8051 = vmatpush3.bf16.msra.mxu1 %v8736_v13 }
  0x11   :  { %8028 = vmatprep.subr.bf16.mxu0 %v8642_v0  ;;  %8052 = vmatprep.subr.bf16.mxu1 %v8642_v0 }
  0x14   :  { %8030 = vmatpush3.bf16.msra.mxu0 %v8748_v16  ;;  %8054 = vmatpush3.bf16.msra.mxu1 %v8748_v16 }
  0x15   :  { %8031 = vmatprep.subr.bf16.mxu0 %v8642_v0  ;;  %8055 = vmatprep.subr.bf16.mxu1 %v8642_v0 }
  0x18   :  { %8033 = vmatpush3.bf16.msra.mxu0 %v8760_v19  ;;  %8057 = vmatpush3.bf16.msra.mxu1 %v8760_v19 }
  0x19   :  { %8034 = vmatprep.subr.bf16.mxu0 %v8642_v0  ;;  %8058 = vmatprep.subr.bf16.mxu1 %v8642_v0 }
  0x1c   :  { %8036 = vmatpush3.bf16.msra.mxu0 %v8772_v22  ;;  %8060 = vmatpush3.bf16.msra.mxu1 %v8772_v22 }
  0x1d   :  { %8037 = vmatprep.subr.bf16.mxu0 %v8642_v0  ;;  %8061 = vmatprep.subr.bf16.mxu1 %v8642_v0 }
  0x20   :  { %8039 = vmatpush3.bf16.msra.mxu0 %v8784_v25  ;;  %8063 = vmatpush3.bf16.msra.mxu1 %v8784_v25 }
  0x21   :  { %8064 = vmatprep.subr.bf16.mxu0 %v8642_v0  ;;  %8088 = vmatprep.subr.bf16.mxu1 %v8642_v0 }
  0x23   :  { %7212 = vmatmul.mubr.f32.vlgmr.msra.gmra.mrb[0].mxu0 %v8644_v4 }
  0x24   :  { %8066 = vmatpush3.bf16.msra.mxu0 %v8703_v5  ;;  %7281 = vmatprep.mubr.msk.f32.mxu0 %vm8643_vm0, %v8644_v4 }
  0x25   :  { %8067 = vmatprep.subr.bf16.mxu0 %v8642_v0 }
  0x28   :  { %8069 = vmatpush3.bf16.msra.mxu0 %v8712_v7 }
  0x29   :  { %8070 = vmatprep.subr.bf16.mxu0 %v8642_v0 }
  0x2c   :  { %8072 = vmatpush3.bf16.msra.mxu0 %v8724_v10 }
  0x2d   :  { %8073 = vmatprep.subr.bf16.mxu0 %v8642_v0 }
  0x30   :  { %8075 = vmatpush3.bf16.msra.mxu0 %v8736_v13 }
  0x31   :  { %8076 = vmatprep.subr.bf16.mxu0 %v8642_v0 }
  0x34   :  { %8078 = vmatpush3.bf16.msra.mxu0 %v8748_v16 }
  0x35   :  { %8079 = vmatprep.subr.bf16.mxu0 %v8642_v0 }
  0x38   :  { %8081 = vmatpush3.bf16.msra.mxu0 %v8760_v19 }
  0x39   :  { %8082 = vmatprep.subr.bf16.mxu0 %v8642_v0 }
  0x3c   :  { %8084 = vmatpush3.bf16.msra.mxu0 %v8772_v22 }
  0x3d   :  { %8085 = vmatprep.subr.bf16.mxu0 %v8642_v0 }
  0x40   :  { %8087 = vmatpush3.bf16.msra.mxu0 %v8784_v25 }
  0x41   :  { %8112 = vmatprep.subr.bf16.mxu0 %v8642_v0 }
  0xf6   :  { %v128_v27 = vpop.f32.mrb[0].mxu0 }
  0xf7   :  { %v132_v28 = vadd.f32 %v128_v27, %v61_v26  ;;  %v7213_v29 = vpop.f32.mrb[1].mxu0 }
  0xf9   :  { %8508 = vtanh.f32 %v132_v28 }
 0x103   :  { %v8509_v30 = vpop.eup %8508 }
 0x104   :  { %7247 = vmatmul.mubr.f32.vlgmr.msra.gmra.mrb[0].mxu1 %v8509_v30  ;;  %v1325_v41 = vrot.slane %v8509_v30, %v8836_v40  ;;  %v1318_v42 = vcombine.high %v8509_v30, %v8509_v30 }
 0x105   :  { %8090 = vmatpush3.bf16.msra.mxu1 %v8703_v5  ;;  %7316 = vmatprep.mubr.msk.f32.mxu1 %vm8643_vm0, %v8644_v4 }
 0x106   :  { %8091 = vmatprep.subr.bf16.mxu1 %v8642_v0  ;;  %v1333_v43 = vcombine.high %v1325_v41, %v1325_v41  ;;  %v1332_v45 = vrot.slane %v1318_v42, %v8836_v40  ;;  %v1341_v49 = vrot.slane %v1325_v41, %v8836_v40 }
 0x108   :  { %v1355_v50 = vrot.slane %v1333_v43, %v8836_v40  ;;  %v1348_v54 = vrot.slane %v1332_v45, %v8836_v40  ;;  %v1334_v55 = vcombine.high %v1332_v45, %v1332_v45  ;;  %v1363_v60 = vcombine.high %v1341_v49, %v1341_v49 }
 0x109   :  { %8093 = vmatpush3.bf16.msra.mxu1 %v8712_v7 }
 0x10a   :  { %8094 = vmatprep.subr.bf16.mxu1 %v8642_v0  ;;  %v1365_v61 = vcombine.high %v1355_v50, %v1355_v50  ;;  %v1362_v8 = vrot.slane %v1334_v55, %v8836_v40  ;;  %v1364_v17 = vcombine.high %v1348_v54, %v1348_v54 }
 0x10c   :  { %v1366_v28 = vcombine.high %v1362_v8, %v1362_v8 }
 0x10d   :  { %8096 = vmatpush3.bf16.msra.mxu1 %v8724_v10 }
 0x10e   :  { %8097 = vmatprep.subr.bf16.mxu1 %v8642_v0 }
 0x111   :  { %8099 = vmatpush3.bf16.msra.mxu1 %v8736_v13 }
 0x112   :  { %8100 = vmatprep.subr.bf16.mxu1 %v8642_v0 }
 0x115   :  { %8102 = vmatpush3.bf16.msra.mxu1 %v8748_v16 }
 0x116   :  { %8103 = vmatprep.subr.bf16.mxu1 %v8642_v0 }
 0x119   :  { %8105 = vmatpush3.bf16.msra.mxu1 %v8760_v19 }
 0x11a   :  { %8106 = vmatprep.subr.bf16.mxu1 %v8642_v0 }
 0x11d   :  { %8108 = vmatpush3.bf16.msra.mxu1 %v8772_v22 }
 0x11e   :  { %8109 = vmatprep.subr.bf16.mxu1 %v8642_v0 }
 0x121   :  { %8111 = vmatpush3.bf16.msra.mxu1 %v8784_v25 }
 0x122   :  { %8136 = vmatprep.subr.bf16.mxu1 %v8642_v0 }
 0x1d7   :  { %v202_v37 = vpop.f32.mrb[0].mxu1 }
 0x1d8   :  { %v206_v38 = vadd.f32 %v6720_v34, %v202_v37  ;;  %v7248_v39 = vpop.f32.mrb[1].mxu1 }
 0x1da   :  { %8510 = vtanh.f32 %v206_v38 }
 0x1e4   :  { %v8511_v44 = vpop.eup %8510 }
 0x1e5   :  { %7282 = vmatmul.mubr.f32.vlgmr.msra.gmra.mrb[2].mxu0 %v8511_v44  ;;  %v1383_v46 = vrot.slane %v8511_v44, %v8836_v40  ;;  %v1376_v48 = vcombine.high %v8511_v44, %v8511_v44 }
 0x1e6   :  { %8114 = vmatpush3.bf16.msra.mxu0 %v8703_v5  ;;  %7351 = vmatprep.mubr.msk.f32.mxu0 %vm8643_vm0, %v8644_v4 }
 0x1e7   :  { %8115 = vmatprep.subr.bf16.mxu0 %v8642_v0  ;;  %v1399_v51 = vrot.slane %v1383_v46, %v8836_v40  ;;  %v1391_v52 = vcombine.high %v1383_v46, %v1383_v46  ;;  %v1390_v53 = vrot.slane %v1376_v48, %v8836_v40 }
 0x1e9   :  { %v1728_v56 = vrot.slane %v1399_v51, %v8841_v47  ;;  %v1413_v57 = vrot.slane %v1391_v52, %v8836_v40  ;;  %v1421_v58 = vcombine.high %v1399_v51, %v1399_v51  ;;  %v1406_v59 = vrot.slane %v1390_v53, %v8836_v40 }
 0x1ea   :  { %8117 = vmatpush3.bf16.msra.mxu0 %v8712_v7  ;;  %v1392_v62 = vcombine.high %v1390_v53, %v1390_v53 }
 0x1eb   :  { %8118 = vmatprep.subr.bf16.mxu0 %v8642_v0  ;;  %v2006_v63 = vsel %vm2005_vm1, %v1341_v49, %v1728_v56  ;;  %v1732_v1 = vrot.slane %v1413_v57, %v8841_v47  ;;  %v1736_v2 = vrot.slane %v1421_v58, %v8841_v47  ;;  %v1423_v3 = vcombine.high %v1413_v57, %v1413_v57 }
 0x1ec   :  { %v1744_v6 = vrot.slane %v1406_v59, %v8841_v47  ;;  %v1420_v9 = vrot.slane %v1392_v62, %v8836_v40  ;;  %v1422_v11 = vcombine.high %v1406_v59, %v1406_v59 }
 0x1ed   :  { %v2007_v12 = vsel %vm2005_vm1, %v1355_v50, %v1732_v1  ;;  %v2008_v14 = vsel %vm2005_vm1, %v1363_v60, %v1736_v2  ;;  %v1740_v15 = vrot.slane %v1423_v3, %v8841_v47 }
 0x1ee   :  { %8120 = vmatpush3.bf16.msra.mxu0 %v8724_v10  ;;  %v2010_v18 = vsel %vm2005_vm1, %v1348_v54, %v1744_v6  ;;  %v1748_v20 = vrot.slane %v1420_v9, %v8841_v47  ;;  %v1752_v21 = vrot.slane %v1422_v11, %v8841_v47  ;;  %v1424_v23 = vcombine.high %v1420_v9, %v1420_v9  ;;  %v6722_v6 = vld [vmem:[%s10514_s0 + $0x18] sm:$0xff] }
 0x1ef   :  { %8121 = vmatprep.subr.bf16.mxu0 %v8642_v0  ;;  %v2009_v24 = vsel %vm2005_vm1, %v1365_v61, %v1740_v15 }
 0x1f0   :  { %v2011_v26 = vsel %vm2005_vm1, %v1362_v8, %v1748_v20  ;;  %v2012_v27 = vsel %vm2005_vm1, %v1364_v17, %v1752_v21  ;;  %v1756_v29 = vrot.slane %v1424_v23, %v8841_v47 }
 0x1f2   :  { %8123 = vmatpush3.bf16.msra.mxu0 %v8736_v13  ;;  %v2013_v30 = vsel %vm2005_vm1, %v1366_v28, %v1756_v29 }
 0x1f3   :  { %8124 = vmatprep.subr.bf16.mxu0 %v8642_v0 }
 0x1f6   :  { %8126 = vmatpush3.bf16.msra.mxu0 %v8748_v16 }
 0x1f7   :  { %8127 = vmatprep.subr.bf16.mxu0 %v8642_v0 }
 0x1fa   :  { %8129 = vmatpush3.bf16.msra.mxu0 %v8760_v19 }
 0x1fb   :  { %8130 = vmatprep.subr.bf16.mxu0 %v8642_v0 }
 0x1fe   :  { %8132 = vmatpush3.bf16.msra.mxu0 %v8772_v22 }
 0x1ff   :  { %8133 = vmatprep.subr.bf16.mxu0 %v8642_v0 }
 0x202   :  { %8135 = vmatpush3.bf16.msra.mxu0 %v8784_v25 }
 0x203   :  { %8160 = vmatprep.subr.bf16.mxu0 %v8642_v0 }
 0x2b8   :  { %v276_v32 = vpop.f32.mrb[2].mxu0 }
 0x2b9   :  { %v280_v33 = vadd.f32 %v6721_v31, %v276_v32  ;;  %v7283_v34 = vpop.f32.mrb[3].mxu0 }
 0x2bb   :  { %8512 = vtanh.f32 %v280_v33 }
 0x2c5   :  { %v8513_v35 = vpop.eup %8512 }
 0x2c6   :  { %7317 = vmatmul.mubr.f32.vlgmr.msra.gmra.mrb[2].mxu1 %v8513_v35  ;;  %v1433_v36 = vrot.slane %v8513_v35, %v8836_v40  ;;  %v1426_v37 = vcombine.high %v8513_v35, %v8513_v35 }
 0x2c7   :  { %8138 = vmatpush3.bf16.msra.mxu1 %v8703_v5  ;;  %7386 = vmatprep.mubr.msk.f32.mxu1 %vm8643_vm0, %v8644_v4 }
 0x2c8   :  { %8139 = vmatprep.subr.bf16.mxu1 %v8642_v0  ;;  %v1449_v38 = vrot.slane %v1433_v36, %v8836_v40  ;;  %v1441_v39 = vcombine.high %v1433_v36, %v1433_v36  ;;  %v1440_v41 = vrot.slane %v1426_v37, %v8836_v40 }
 0x2ca   :  { %v1768_v42 = vrot.slane %v1449_v38, %v8841_v47  ;;  %v1463_v43 = vrot.slane %v1441_v39, %v8836_v40  ;;  %v1471_v44 = vcombine.high %v1449_v38, %v1449_v38  ;;  %v1456_v45 = vrot.slane %v1440_v41, %v8836_v40 }
 0x2cb   :  { %8141 = vmatpush3.bf16.msra.mxu1 %v8712_v7  ;;  %v1442_v46 = vcombine.high %v1440_v41, %v1440_v41 }
 0x2cc   :  { %8142 = vmatprep.subr.bf16.mxu1 %v8642_v0  ;;  %v2015_v48 = vsel %vm2014_vm2, %v2006_v63, %v1768_v42  ;;  %v1772_v49 = vrot.slane %v1463_v43, %v8841_v47  ;;  %v1776_v50 = vrot.slane %v1471_v44, %v8841_v47  ;;  %v1473_v51 = vcombine.high %v1463_v43, %v1463_v43 }
 0x2cd   :  { %v1784_v52 = vrot.slane %v1456_v45, %v8841_v47  ;;  %v1470_v53 = vrot.slane %v1442_v46, %v8836_v40  ;;  %v1472_v54 = vcombine.high %v1456_v45, %v1456_v45 }
 0x2ce   :  { %v2016_v55 = vsel %vm2014_vm2, %v2007_v12, %v1772_v49  ;;  %v2017_v56 = vsel %vm2014_vm2, %v2008_v14, %v1776_v50  ;;  %v1780_v57 = vrot.slane %v1473_v51, %v8841_v47  ;;  %v6723_v49 = vld [vmem:[%s10514_s0 + $0x20] sm:$0xff] }
 0x2cf   :  { %8144 = vmatpush3.bf16.msra.mxu1 %v8724_v10  ;;  %v2019_v58 = vsel %vm2014_vm2, %v2010_v18, %v1784_v52  ;;  %v1788_v59 = vrot.slane %v1470_v53, %v8841_v47  ;;  %v1792_v60 = vrot.slane %v1472_v54, %v8841_v47  ;;  %v1474_v61 = vcombine.high %v1470_v53, %v1470_v53 }
 0x2d0   :  { %8145 = vmatprep.subr.bf16.mxu1 %v8642_v0  ;;  %v2018_v62 = vsel %vm2014_vm2, %v2009_v24, %v1780_v57 }
 0x2d1   :  { %v2020_v63 = vsel %vm2014_vm2, %v2011_v26, %v1788_v59  ;;  %v2021_v1 = vsel %vm2014_vm2, %v2012_v27, %v1792_v60  ;;  %v1796_v2 = vrot.slane %v1474_v61, %v8841_v47 }
 0x2d3   :  { %8147 = vmatpush3.bf16.msra.mxu1 %v8736_v13  ;;  %v2022_v3 = vsel %vm2014_vm2, %v2013_v30, %v1796_v2 }
 0x2d4   :  { %8148 = vmatprep.subr.bf16.mxu1 %v8642_v0 }
 0x2d7   :  { %8150 = vmatpush3.bf16.msra.mxu1 %v8748_v16 }
 0x2d8   :  { %8151 = vmatprep.subr.bf16.mxu1 %v8642_v0 }
 0x2db   :  { %8153 = vmatpush3.bf16.msra.mxu1 %v8760_v19 }
 0x2dc   :  { %8154 = vmatprep.subr.bf16.mxu1 %v8642_v0 }
 0x2df   :  { %8156 = vmatpush3.bf16.msra.mxu1 %v8772_v22 }
 0x2e0   :  { %8157 = vmatprep.subr.bf16.mxu1 %v8642_v0 }
 0x2e3   :  { %8159 = vmatpush3.bf16.msra.mxu1 %v8784_v25 }
 0x2e4   :  { %8184 = vmatprep.subr.bf16.mxu1 %v8642_v0 }
 0x399   :  { %v350_v8 = vpop.f32.mrb[2].mxu1 }
 0x39a   :  { %v354_v9 = vadd.f32 %v6722_v6, %v350_v8  ;;  %v7318_v11 = vpop.f32.mrb[3].mxu1 }
 0x39c   :  { %8514 = vtanh.f32 %v354_v9 }
 0x3a6   :  { %v8515_v12 = vpop.eup %8514 }
 0x3a7   :  { %7352 = vmatmul.mubr.f32.vlgmr.msra.gmra.mrb[4].mxu0 %v8515_v12  ;;  %v1483_v14 = vrot.slane %v8515_v12, %v8836_v40  ;;  %v1476_v15 = vcombine.high %v8515_v12, %v8515_v12 }
 0x3a8   :  { %8162 = vmatpush3.bf16.msra.mxu0 %v8703_v5  ;;  %7421 = vmatprep.mubr.msk.f32.mxu0 %vm8643_vm0, %v8644_v4 }
 0x3a9   :  { %8163 = vmatprep.subr.bf16.mxu0 %v8642_v0  ;;  %v1499_v17 = vrot.slane %v1483_v14, %v8836_v40  ;;  %v1491_v18 = vcombine.high %v1483_v14, %v1483_v14  ;;  %v1490_v20 = vrot.slane %v1476_v15, %v8836_v40 }
 0x3ab   :  { %v1808_v21 = vrot.slane %v1499_v17, %v8841_v47  ;;  %v1513_v23 = vrot.slane %v1491_v18, %v8836_v40  ;;  %v1521_v24 = vcombine.high %v1499_v17, %v1499_v17  ;;  %v1506_v26 = vrot.slane %v1490_v20, %v8836_v40 }
 0x3ac   :  { %8165 = vmatpush3.bf16.msra.mxu0 %v8712_v7  ;;  %v1492_v27 = vcombine.high %v1490_v20, %v1490_v20 }
 0x3ad   :  { %8166 = vmatprep.subr.bf16.mxu0 %v8642_v0  ;;  %v2024_v28 = vsel %vm2023_vm3, %v2015_v48, %v1808_v21  ;;  %v1812_v29 = vrot.slane %v1513_v23, %v8841_v47  ;;  %v1816_v30 = vrot.slane %v1521_v24, %v8841_v47  ;;  %v1523_v31 = vcombine.high %v1513_v23, %v1513_v23 }
 0x3ae   :  { %v1824_v32 = vrot.slane %v1506_v26, %v8841_v47  ;;  %v1520_v33 = vrot.slane %v1492_v27, %v8836_v40  ;;  %v1522_v34 = vcombine.high %v1506_v26, %v1506_v26 }
 0x3af   :  { %v2025_v35 = vsel %vm2023_vm3, %v2016_v55, %v1812_v29  ;;  %v2026_v36 = vsel %vm2023_vm3, %v2017_v56, %v1816_v30  ;;  %v1820_v37 = vrot.slane %v1523_v31, %v8841_v47 }
 0x3b0   :  { %8168 = vmatpush3.bf16.msra.mxu0 %v8724_v10  ;;  %v2028_v38 = vsel %vm2023_vm3, %v2019_v58, %v1824_v32  ;;  %v1828_v39 = vrot.slane %v1520_v33, %v8841_v47  ;;  %v1832_v41 = vrot.slane %v1522_v34, %v8841_v47  ;;  %v1524_v42 = vcombine.high %v1520_v33, %v1520_v33 }
 0x3b1   :  { %8169 = vmatprep.subr.bf16.mxu0 %v8642_v0  ;;  %v2027_v43 = vsel %vm2023_vm3, %v2018_v62, %v1820_v37 }
 0x3b2   :  { %v2029_v44 = vsel %vm2023_vm3, %v2020_v63, %v1828_v39  ;;  %v2030_v45 = vsel %vm2023_vm3, %v2021_v1, %v1832_v41  ;;  %v1836_v46 = vrot.slane %v1524_v42, %v8841_v47 }
 0x3b4   :  { %8171 = vmatpush3.bf16.msra.mxu0 %v8736_v13  ;;  %v2031_v48 = vsel %vm2023_vm3, %v2022_v3, %v1836_v46 }
 0x3b5   :  { %8172 = vmatprep.subr.bf16.mxu0 %v8642_v0 }
 0x3b8   :  { %8174 = vmatpush3.bf16.msra.mxu0 %v8748_v16 }
 0x3b9   :  { %8175 = vmatprep.subr.bf16.mxu0 %v8642_v0 }
 0x3bc   :  { %8177 = vmatpush3.bf16.msra.mxu0 %v8760_v19 }
 0x3bd   :  { %8178 = vmatprep.subr.bf16.mxu0 %v8642_v0 }
 0x3c0   :  { %8180 = vmatpush3.bf16.msra.mxu0 %v8772_v22 }
 0x3c1   :  { %8181 = vmatprep.subr.bf16.mxu0 %v8642_v0 }
 0x3c4   :  { %8183 = vmatpush3.bf16.msra.mxu0 %v8784_v25 }
 0x3c5   :  { %8208 = vmatprep.subr.bf16.mxu0 %v8642_v0 }
 0x47a   :  { %v424_v50 = vpop.f32.mrb[4].mxu0 }
 0x47b   :  { %v428_v51 = vadd.f32 %v6723_v49, %v424_v50  ;;  %v7353_v52 = vpop.f32.mrb[5].mxu0 }
 0x47d   :  { %8516 = vtanh.f32 %v428_v51 }
 0x487   :  { %v8517_v53 = vpop.eup %8516 }
 0x488   :  { %7387 = vmatmul.mubr.f32.vlgmr.msra.gmra.mrb[4].mxu1 %v8517_v53  ;;  %v1533_v54 = vrot.slane %v8517_v53, %v8836_v40  ;;  %v1526_v55 = vcombine.high %v8517_v53, %v8517_v53 }
 0x489   :  { %8186 = vmatpush3.bf16.msra.mxu1 %v8703_v5  ;;  %7456 = vmatprep.mubr.msk.f32.mxu1 %vm8643_vm0, %v8644_v4 }
 0x48a   :  { %8187 = vmatprep.subr.bf16.mxu1 %v8642_v0  ;;  %v1549_v56 = vrot.slane %v1533_v54, %v8836_v40  ;;  %v1541_v57 = vcombine.high %v1533_v54, %v1533_v54  ;;  %v1540_v58 = vrot.slane %v1526_v55, %v8836_v40 }
 0x48c   :  { %v1848_v59 = vrot.slane %v1549_v56, %v8841_v47  ;;  %v1563_v60 = vrot.slane %v1541_v57, %v8836_v40  ;;  %v1571_v61 = vcombine.high %v1549_v56, %v1549_v56  ;;  %v1556_v62 = vrot.slane %v1540_v58, %v8836_v40  ;;  %v45_v57 = vld [vmem:[%s10515_s3] sm:$0xff] }
 0x48d   :  { %8189 = vmatpush3.bf16.msra.mxu1 %v8712_v7  ;;  %v1542_v5 = vcombine.high %v1540_v58, %v1540_v58  ;;  %v46_v58 = vld [vmem:[%s10515_s3 + $0x8] sm:$0xff] }
 0x48e   :  { %8190 = vmatprep.subr.bf16.mxu1 %v8642_v0  ;;  %v2033_v63 = vsel %vm2032_vm4, %v2024_v28, %v1848_v59  ;;  %v1852_v1 = vrot.slane %v1563_v60, %v8841_v47  ;;  %v1856_v2 = vrot.slane %v1571_v61, %v8841_v47  ;;  %v1573_v3 = vcombine.high %v1563_v60, %v1563_v60  ;;  %v47_v59 = vld [vmem:[%s10515_s3 + $0x10] sm:$0xff]  ;;  %v48_v61 = vld [vmem:[%s10515_s3 + $0x18] sm:$0xff] }
 0x48f   :  { %v1864_v6 = vrot.slane %v1556_v62, %v8841_v47  ;;  %v1570_v8 = vrot.slane %v1542_v5, %v8836_v40  ;;  %v1572_v9 = vcombine.high %v1556_v62, %v1556_v62  ;;  %v9067_v60 = vpack.c.bf16 %v46_v58, %v45_v57  ;;  %v49_v5 = vld [vmem:[%s10515_s3 + $0x20] sm:$0xff] }
 0x490   :  { %v2034_v11 = vsel %vm2032_vm4, %v2025_v35, %v1852_v1  ;;  %v2035_v12 = vsel %vm2032_vm4, %v2026_v36, %v1856_v2  ;;  %v1860_v7 = vrot.slane %v1573_v3, %v8841_v47  ;;  %v9073_v62 = vpack.c.bf16 %v48_v61, %v47_v59  ;;  %v51_v2 = vld [vmem:[%s10515_s3 + $0x30] sm:$0xff]  ;;  %v52_v3 = vld [vmem:[%s10515_s3 + $0x38] sm:$0xff] }
 0x491   :  { %8192 = vmatpush3.bf16.msra.mxu1 %v8724_v10  ;;  %v2037_v14 = vsel %vm2032_vm4, %v2028_v38, %v1864_v6  ;;  %v1868_v15 = vrot.slane %v1570_v8, %v8841_v47  ;;  %v1872_v17 = vrot.slane %v1572_v9, %v8841_v47  ;;  %v1574_v18 = vcombine.high %v1570_v8, %v1570_v8  ;;  %v53_v8 = vld [vmem:[%s10515_s3 + $0x40] sm:$0xff]  ;;  %v54_v9 = vld [vmem:[%s10515_s3 + $0x48] sm:$0xff] }
 0x492   :  { %8193 = vmatprep.subr.bf16.mxu1 %v8642_v0  ;;  %v2036_v20 = vsel %vm2032_vm4, %v2027_v43, %v1860_v7  ;;  %v9093_v6 = vpack.c.bf16 %v52_v3, %v51_v2 }
 0x493   :  { %v2038_v21 = vsel %vm2032_vm4, %v2029_v44, %v1868_v15  ;;  %v2039_v23 = vsel %vm2032_vm4, %v2030_v45, %v1872_v17  ;;  %v1876_v24 = vrot.slane %v1574_v18, %v8841_v47 }
 0x495   :  { %8195 = vmatpush3.bf16.msra.mxu1 %v8736_v13  ;;  %v2040_v10 = vsel %vm2032_vm4, %v2031_v48, %v1876_v24  ;;  %v6724_v13 = vld [vmem:[%s10514_s0 + $0x28] sm:$0xff] }
 0x496   :  { %8196 = vmatprep.subr.bf16.mxu1 %v8642_v0 }
 0x499   :  { %8198 = vmatpush3.bf16.msra.mxu1 %v8748_v16 }
 0x49a   :  { %8199 = vmatprep.subr.bf16.mxu1 %v8642_v0 }
 0x49d   :  { %8201 = vmatpush3.bf16.msra.mxu1 %v8760_v19 }
 0x49e   :  { %8202 = vmatprep.subr.bf16.mxu1 %v8642_v0 }
 0x4a1   :  { %8204 = vmatpush3.bf16.msra.mxu1 %v8772_v22 }
 0x4a2   :  { %8205 = vmatprep.subr.bf16.mxu1 %v8642_v0 }
 0x4a5   :  { %8207 = vmatpush3.bf16.msra.mxu1 %v8784_v25 }
 0x4a6   :  { %8232 = vmatprep.subr.bf16.mxu1 %v8642_v0 }
 0x55b   :  { %v498_v26 = vpop.f32.mrb[4].mxu1 }
 0x55c   :  { %v502_v16 = vadd.f32 %v6724_v13, %v498_v26  ;;  %v7388_v27 = vpop.f32.mrb[5].mxu1 }
 0x55e   :  { %8518 = vtanh.f32 %v502_v16 }
 0x568   :  { %v8519_v28 = vpop.eup %8518 }
 0x569   :  { %7422 = vmatmul.mubr.f32.vlgmr.msra.gmra.mrb[6].mxu0 %v8519_v28  ;;  %v1583_v19 = vrot.slane %v8519_v28, %v8836_v40  ;;  %v1576_v29 = vcombine.high %v8519_v28, %v8519_v28 }
 0x56a   :  { %7491 = vmatprep.mubr.msk.f32.mxu0 %vm8643_vm0, %v8644_v4  ;;  %8210 = vmatpush3.bf16.msra.mxu0 %v9067_v60 }
 0x56b   :  { %v1599_v22 = vrot.slane %v1583_v19, %v8836_v40  ;;  %v1591_v25 = vcombine.high %v1583_v19, %v1583_v19  ;;  %v1590_v30 = vrot.slane %v1576_v29, %v8836_v40  ;;  %8211 = vmatprep.subr.bf16.mxu0 %v8642_v0 }
 0x56d   :  { %v1888_v31 = vrot.slane %v1599_v22, %v8841_v47  ;;  %v1613_v32 = vrot.slane %v1591_v25, %v8836_v40  ;;  %v1621_v33 = vcombine.high %v1599_v22, %v1599_v22  ;;  %v1606_v34 = vrot.slane %v1590_v30, %v8836_v40 }
 0x56e   :  { %v1592_v35 = vcombine.high %v1590_v30, %v1590_v30  ;;  %8213 = vmatpush3.bf16.msra.mxu0 %v9073_v62 }
 0x56f   :  { %v9027_v36 = vsel %vm2041_vm5, %v2033_v63, %v1888_v31  ;;  %v1892_v37 = vrot.slane %v1613_v32, %v8841_v47  ;;  %v1896_v38 = vrot.slane %v1621_v33, %v8841_v47  ;;  %v1623_v39 = vcombine.high %v1613_v32, %v1613_v32  ;;  %v50_v63 = vld [vmem:[%s10515_s3 + $0x28] sm:$0xff]  ;;  %8214 = vmatprep.subr.bf16.mxu0 %v8642_v0 }
 0x570   :  { %v1904_v41 = vrot.slane %v1606_v34, %v8841_v47  ;;  %v1620_v42 = vrot.slane %v1592_v35, %v8836_v40  ;;  %v1622_v43 = vcombine.high %v1606_v34, %v1606_v34  ;;  %v9083_v1 = vpack.c.bf16 %v50_v63, %v49_v5 }
 0x571   :  { %v9034_v44 = vsel %vm2041_vm5, %v2034_v11, %v1892_v37  ;;  %v9037_v45 = vsel %vm2041_vm5, %v2035_v12, %v1896_v38  ;;  %v1900_v46 = vrot.slane %v1623_v39, %v8841_v47  ;;  %v9103_v11 = vpack.c.bf16 %v54_v9, %v53_v8  ;;  %v6725_v12 = vld [vmem:[%s10514_s0 + $0x30] sm:$0xff] }
 0x572   :  { %v9041_v48 = vsel %vm2041_vm5, %v2037_v14, %v1904_v41  ;;  %v1908_v49 = vrot.slane %v1620_v42, %v8841_v47  ;;  %v1912_v50 = vrot.slane %v1622_v43, %v8841_v47  ;;  %v1624_v51 = vcombine.high %v1620_v42, %v1620_v42  ;;  %8216 = vmatpush3.bf16.msra.mxu0 %v9083_v1 }
 0x573   :  { %v9046_v52 = vsel %vm2041_vm5, %v2036_v20, %v1900_v46  ;;  %8217 = vmatprep.subr.bf16.mxu0 %v8642_v0  ;;  %v56_v46 = vld [vmem:[%s10515_s3 + $0x58] sm:$0xff] }
 0x574   :  { %v9049_v53 = vsel %vm2041_vm5, %v2038_v21, %v1908_v49  ;;  %v9052_v54 = vsel %vm2041_vm5, %v2039_v23, %v1912_v50  ;;  %v1916_v55 = vrot.slane %v1624_v51, %v8841_v47  ;;  %v57_v49 = vld [vmem:[%s10515_s3 + $0x60] sm:$0xff]  ;;  %v58_v50 = vld [vmem:[%s10515_s3 + $0x68] sm:$0xff] }
 0x575   :  { %v9186_v51 = vpack.c.bf16 %v58_v50, %v57_v49 }
 0x576   :  { %v9056_v56 = vsel %vm2041_vm5, %v2040_v10, %v1916_v55  ;;  %8219 = vmatpush3.bf16.msra.mxu0 %v9093_v6  ;;  %v6726_v55 = vld [vmem:[%s10514_s0 + $0x38] sm:$0xff] }
 0x577   :  { %8220 = vmatprep.subr.bf16.mxu0 %v8642_v0 }
 0x57a   :  { %8222 = vmatpush3.bf16.msra.mxu0 %v9103_v11 }
 0x57b   :  { %8223 = vmatprep.subr.bf16.mxu0 %v8642_v0 }
 0x63c   :  { %v572_v7 = vpop.f32.mrb[6].mxu0 }
 0x63d   :  { %v576_v14 = vadd.f32 %v6725_v12, %v572_v7  ;;  %v7423_v15 = vpop.f32.mrb[7].mxu0 }
 0x63f   :  { %8520 = vtanh.f32 %v576_v14 }
 0x649   :  { %v8521_v17 = vpop.eup %8520 }
 0x64a   :  { %7457 = vmatmul.mubr.f32.vlgmr.msra.gmra.mrb[6].mxu1 %v8521_v17  ;;  %v1633_v18 = vrot.slane %v8521_v17, %v8836_v40  ;;  %v1626_v20 = vcombine.high %v8521_v17, %v8521_v17 }
 0x64b   :  { %8234 = vmatpush3.bf16.msra.mxu1 %v9067_v60  ;;  %7526 = vmatprep.mubr.msk.f32.mxu1 %vm8643_vm0, %v8644_v4 }
 0x64c   :  { %8235 = vmatprep.subr.bf16.mxu1 %v8642_v0  ;;  %v1649_v21 = vrot.slane %v1633_v18, %v8836_v40  ;;  %v1641_v23 = vcombine.high %v1633_v18, %v1633_v18  ;;  %v1640_v24 = vrot.slane %v1626_v20, %v8836_v40 }
 0x64e   :  { %v1928_v10 = vrot.slane %v1649_v21, %v8841_v47  ;;  %v1663_v13 = vrot.slane %v1641_v23, %v8836_v40  ;;  %v1671_v26 = vcombine.high %v1649_v21, %v1649_v21  ;;  %v1656_v16 = vrot.slane %v1640_v24, %v8836_v40 }
 0x64f   :  { %8237 = vmatpush3.bf16.msra.mxu1 %v9073_v62  ;;  %v1642_v27 = vcombine.high %v1640_v24, %v1640_v24 }
 0x650   :  { %8238 = vmatprep.subr.bf16.mxu1 %v8642_v0  ;;  %v9125_v28 = vsel %vm2050_vm6, %v9027_v36, %v1928_v10  ;;  %v1932_v19 = vrot.slane %v1663_v13, %v8841_v47  ;;  %v1936_v29 = vrot.slane %v1671_v26, %v8841_v47  ;;  %v1673_v22 = vcombine.high %v1663_v13, %v1663_v13 }
 0x651   :  { %v1944_v25 = vrot.slane %v1656_v16, %v8841_v47  ;;  %v1670_v30 = vrot.slane %v1642_v27, %v8836_v40  ;;  %v1672_v31 = vcombine.high %v1656_v16, %v1656_v16 }
 0x652   :  { %v9133_v32 = vsel %vm2050_vm6, %v9034_v44, %v1932_v19  ;;  %v9137_v33 = vsel %vm2050_vm6, %v9037_v45, %v1936_v29  ;;  %v1940_v34 = vrot.slane %v1673_v22, %v8841_v47  ;;  %v55_v45 = vld [vmem:[%s10515_s3 + $0x50] sm:$0xff] }
 0x653   :  { %8240 = vmatpush3.bf16.msra.mxu1 %v9083_v1  ;;  %v9143_v35 = vsel %vm2050_vm6, %v9041_v48, %v1944_v25  ;;  %v1948_v36 = vrot.slane %v1670_v30, %v8841_v47  ;;  %v1952_v37 = vrot.slane %v1672_v31, %v8841_v47  ;;  %v1674_v38 = vcombine.high %v1670_v30, %v1670_v30 }
 0x654   :  { %8241 = vmatprep.subr.bf16.mxu1 %v8642_v0  ;;  %v9150_v39 = vsel %vm2050_vm6, %v9046_v52, %v1940_v34  ;;  %v9175_v48 = vpack.c.bf16 %v56_v46, %v55_v45  ;;  %v59_v52 = vld [vmem:[%s10515_s3 + $0x70] sm:$0xff] }
 0x655   :  { %v9154_v41 = vsel %vm2050_vm6, %v9049_v53, %v1948_v36  ;;  %v9158_v42 = vsel %vm2050_vm6, %v9052_v54, %v1952_v37  ;;  %v1956_v43 = vrot.slane %v1674_v38, %v8841_v47  ;;  %v60_v53 = vld [vmem:[%s10515_s3 + $0x78] sm:$0xff]  ;;  %v6727_v37 = vld [vmem:[%s10516_s1 + $0x8] sm:$0xff] }
 0x656   :  { %8225 = vmatpush3.bf16.msra.mxu0 %v9175_v48  ;;  %v9196_v54 = vpack.c.bf16 %v60_v53, %v59_v52 }
 0x657   :  { %8243 = vmatpush3.bf16.msra.mxu1 %v9093_v6  ;;  %v9164_v44 = vsel %vm2050_vm6, %v9056_v56, %v1956_v43  ;;  %8226 = vmatprep.subr.bf16.mxu0 %v8642_v0 }
 0x658   :  { %8244 = vmatprep.subr.bf16.mxu1 %v8642_v0 }
 0x65a   :  { %8228 = vmatpush3.bf16.msra.mxu0 %v9186_v51 }
 0x65b   :  { %8246 = vmatpush3.bf16.msra.mxu1 %v9103_v11  ;;  %8229 = vmatprep.subr.bf16.mxu0 %v8642_v0 }
 0x65c   :  { %8247 = vmatprep.subr.bf16.mxu1 %v8642_v0 }
 0x65e   :  { %8231 = vmatpush3.bf16.msra.mxu0 %v9196_v54 }
 0x65f   :  { %8249 = vmatpush3.bf16.msra.mxu1 %v9175_v48  ;;  %8256 = vmatprep.subr.bf16.mxu0 %v8642_v0 }
 0x660   :  { %8250 = vmatprep.subr.bf16.mxu1 %v8642_v0 }
 0x663   :  { %8252 = vmatpush3.bf16.msra.mxu1 %v9186_v51 }
 0x664   :  { %8253 = vmatprep.subr.bf16.mxu1 %v8642_v0 }
 0x667   :  { %8255 = vmatpush3.bf16.msra.mxu1 %v9196_v54 }
 0x668   :  { %8280 = vmatprep.subr.bf16.mxu1 %v8642_v0 }
 0x71d   :  { %v646_v56 = vpop.f32.mrb[6].mxu1 }
 0x71e   :  { %v650_v57 = vadd.f32 %v6726_v55, %v646_v56  ;;  %v7458_v58 = vpop.f32.mrb[7].mxu1 }
 0x720   :  { %8522 = vtanh.f32 %v650_v57 }
 0x72a   :  { %v8523_v59 = vpop.eup %8522 }
 0x72b   :  { %7492 = vmatmul.mubr.f32.vlgmr.msra.gmra.mrb[8].mxu0 %v8523_v59  ;;  %v1683_v61 = vrot.slane %v8523_v59, %v8836_v40  ;;  %v1676_v5 = vcombine.high %v8523_v59, %v8523_v59 }
 0x72c   :  { %8258 = vmatpush3.bf16.msra.mxu0 %v9067_v60  ;;  %7561 = vmatprep.mubr.msk.f32.mxu0 %vm8643_vm0, %v8644_v4 }
 0x72d   :  { %8259 = vmatprep.subr.bf16.mxu0 %v8642_v0  ;;  %v1699_v63 = vrot.slane %v1683_v61, %v8836_v40  ;;  %v1691_v2 = vcombine.high %v1683_v61, %v1683_v61  ;;  %v1690_v3 = vrot.slane %v1676_v5, %v8836_v40 }
 0x72f   :  { %v1968_v8 = vrot.slane %v1699_v63, %v8841_v47  ;;  %v1713_v9 = vrot.slane %v1691_v2, %v8836_v40  ;;  %v1721_v12 = vcombine.high %v1699_v63, %v1699_v63  ;;  %v1706_v7 = vrot.slane %v1690_v3, %v8836_v40 }
 0x730   :  { %8261 = vmatpush3.bf16.msra.mxu0 %v9073_v62  ;;  %v1692_v14 = vcombine.high %v1690_v3, %v1690_v3 }
 0x731   :  { %8262 = vmatprep.subr.bf16.mxu0 %v8642_v0  ;;  %v9222_v15 = vsel %vm2059_vm7, %v9125_v28, %v1968_v8  ;;  %v1972_v17 = vrot.slane %v1713_v9, %v8841_v47  ;;  %v1976_v18 = vrot.slane %v1721_v12, %v8841_v47  ;;  %v1723_v20 = vcombine.high %v1713_v9, %v1713_v9 }
 0x732   :  { %v1984_v21 = vrot.slane %v1706_v7, %v8841_v47  ;;  %v1720_v23 = vrot.slane %v1692_v14, %v8836_v40  ;;  %v1722_v24 = vcombine.high %v1706_v7, %v1706_v7 }
 0x733   :  { %v9230_v10 = vsel %vm2059_vm7, %v9133_v32, %v1972_v17  ;;  %v9234_v13 = vsel %vm2059_vm7, %v9137_v33, %v1976_v18  ;;  %v1980_v26 = vrot.slane %v1723_v20, %v8841_v47  ;;  %v652_v32 = vld [vmem:[%s10516_s1] sm:$0xff] }
 0x734   :  { %8264 = vmatpush3.bf16.msra.mxu0 %v9083_v1  ;;  %v9240_v16 = vsel %vm2059_vm7, %v9143_v35, %v1984_v21  ;;  %v1988_v27 = vrot.slane %v1720_v23, %v8841_v47  ;;  %v1992_v28 = vrot.slane %v1722_v24, %v8841_v47  ;;  %v1724_v19 = vcombine.high %v1720_v23, %v1720_v23  ;;  %v6728_v21 = vld [vmem:[%s10516_s1 + $0x10] sm:$0xff] }
 0x735   :  { %8265 = vmatprep.subr.bf16.mxu0 %v8642_v0  ;;  %v9247_v29 = vsel %vm2059_vm7, %v9150_v39, %v1980_v26 }
 0x736   :  { %v9251_v22 = vsel %vm2059_vm7, %v9154_v41, %v1988_v27  ;;  %v9255_v25 = vsel %vm2059_vm7, %v9158_v42, %v1992_v28  ;;  %v1996_v30 = vrot.slane %v1724_v19, %v8841_v47 }
 0x738   :  { %8267 = vmatpush3.bf16.msra.mxu0 %v9093_v6  ;;  %v9261_v31 = vsel %vm2059_vm7, %v9164_v44, %v1996_v30 }
 0x739   :  { %8268 = vmatprep.subr.bf16.mxu0 %v8642_v0 }
 0x73c   :  { %8270 = vmatpush3.bf16.msra.mxu0 %v9103_v11 }
 0x73d   :  { %8271 = vmatprep.subr.bf16.mxu0 %v8642_v0 }
 0x740   :  { %8273 = vmatpush3.bf16.msra.mxu0 %v9175_v48 }
 0x741   :  { %8274 = vmatprep.subr.bf16.mxu0 %v8642_v0 }
 0x744   :  { %8276 = vmatpush3.bf16.msra.mxu0 %v9186_v51 }
 0x745   :  { %8277 = vmatprep.subr.bf16.mxu0 %v8642_v0 }
 0x748   :  { %8279 = vmatpush3.bf16.msra.mxu0 %v9196_v54 }
 0x749   :  { %8304 = vmatprep.subr.bf16.mxu0 %v8642_v0 }
 0x7fe   :  { %v719_v33 = vpop.f32.mrb[8].mxu0 }
 0x7ff   :  { %v723_v34 = vadd.f32 %v719_v33, %v652_v32  ;;  %v7493_v35 = vpop.f32.mrb[9].mxu0 }
 0x801   :  { %8524 = vtanh.f32 %v723_v34 }
 0x80b   :  { %v8525_v36 = vpop.eup %8524 }
 0x80c   :  { %7527 = vmatmul.mubr.f32.vlgmr.msra.gmra.mrb[8].mxu1 %v8525_v36  ;;  %v2069_v42 = vcombine.high %v8525_v36, %v8525_v36  ;;  %v2076_v43 = vrot.slane %v8525_v36, %v8836_v40 }
 0x80d   :  { %8282 = vmatpush3.bf16.msra.mxu1 %v9067_v60  ;;  %7596 = vmatprep.mubr.msk.f32.mxu1 %vm8643_vm0, %v8644_v4 }
 0x80e   :  { %8283 = vmatprep.subr.bf16.mxu1 %v8642_v0  ;;  %v2083_v45 = vrot.slane %v2069_v42, %v8836_v40  ;;  %v2084_v50 = vcombine.high %v2076_v43, %v2076_v43  ;;  %v2092_v30 = vrot.slane %v2076_v43, %v8836_v40 }
 0x810   :  { %v2085_v55 = vcombine.high %v2083_v45, %v2083_v45  ;;  %v2106_v57 = vrot.slane %v2084_v50, %v8836_v40 }
 0x811   :  { %8285 = vmatpush3.bf16.msra.mxu1 %v9073_v62 }
 0x812   :  { %8286 = vmatprep.subr.bf16.mxu1 %v8642_v0  ;;  %v2113_v5 = vrot.slane %v2085_v55, %v8836_v40  ;;  %v2116_v3 = vcombine.high %v2106_v57, %v2106_v57 }
 0x814   :  { %v2117_v17 = vcombine.high %v2113_v5, %v2113_v5 }
 0x815   :  { %8288 = vmatpush3.bf16.msra.mxu1 %v9083_v1 }
 0x816   :  { %8289 = vmatprep.subr.bf16.mxu1 %v8642_v0 }
 0x819   :  { %8291 = vmatpush3.bf16.msra.mxu1 %v9093_v6 }
 0x81a   :  { %8292 = vmatprep.subr.bf16.mxu1 %v8642_v0 }
 0x81d   :  { %8294 = vmatpush3.bf16.msra.mxu1 %v9103_v11 }
 0x81e   :  { %8295 = vmatprep.subr.bf16.mxu1 %v8642_v0 }
 0x821   :  { %8297 = vmatpush3.bf16.msra.mxu1 %v9175_v48 }
 0x822   :  { %8298 = vmatprep.subr.bf16.mxu1 %v8642_v0 }
 0x825   :  { %8300 = vmatpush3.bf16.msra.mxu1 %v9186_v51 }
 0x826   :  { %8301 = vmatprep.subr.bf16.mxu1 %v8642_v0 }
 0x829   :  { %8303 = vmatpush3.bf16.msra.mxu1 %v9196_v54 }
 0x82a   :  { %8328 = vmatprep.subr.bf16.mxu1 %v8642_v0 }
 0x8df   :  { %v793_v38 = vpop.f32.mrb[8].mxu1 }
 0x8e0   :  { %v797_v39 = vadd.f32 %v6727_v37, %v793_v38  ;;  %v7528_v41 = vpop.f32.mrb[9].mxu1  ;;  %v2099_v37 = vrot.slane %v2083_v45, %v8836_v40 }
 0x8e2   :  { %8526 = vtanh.f32 %v797_v39 }
 0x8ec   :  { %v8527_v44 = vpop.eup %8526 }
 0x8ed   :  { %7562 = vmatmul.mubr.f32.vlgmr.msra.gmra.mrb[10].mxu0 %v8527_v44  ;;  %v2134_v46 = vrot.slane %v8527_v44, %v8836_v40  ;;  %v2127_v49 = vcombine.high %v8527_v44, %v8527_v44  ;;  %v2114_v44 = vcombine.high %v2092_v30, %v2092_v30 }
 0x8ee   :  { %8306 = vmatpush3.bf16.msra.mxu0 %v9067_v60  ;;  %7631 = vmatprep.mubr.msk.f32.mxu0 %vm8643_vm0, %v8644_v4 }
 0x8ef   :  { %8307 = vmatprep.subr.bf16.mxu0 %v8642_v0  ;;  %v2141_v52 = vrot.slane %v2127_v49, %v8836_v40  ;;  %v2142_v53 = vcombine.high %v2134_v46, %v2134_v46  ;;  %v2150_v27 = vrot.slane %v2134_v46, %v8836_v40 }
 0x8f1   :  { %v2164_v56 = vrot.slane %v2142_v53, %v8836_v40  ;;  %v2143_v58 = vcombine.high %v2141_v52, %v2141_v52  ;;  %v2157_v28 = vrot.slane %v2141_v52, %v8836_v40  ;;  %v2172_v33 = vcombine.high %v2150_v27, %v2150_v27 }
 0x8f2   :  { %8309 = vmatpush3.bf16.msra.mxu0 %v9073_v62  ;;  %v2537_v36 = vrot.slane %v2150_v27, %v8841_v47 }
 0x8f3   :  { %8310 = vmatprep.subr.bf16.mxu0 %v8642_v0  ;;  %v2541_v59 = vrot.slane %v2164_v56, %v8841_v47  ;;  %v2174_v61 = vcombine.high %v2164_v56, %v2164_v56  ;;  %v2171_v63 = vrot.slane %v2143_v58, %v8836_v40  ;;  %v2173_v32 = vcombine.high %v2157_v28, %v2157_v28 }
 0x8f4   :  { %v2553_v38 = vrot.slane %v2157_v28, %v8841_v47  ;;  %v2545_v46 = vrot.slane %v2172_v33, %v8841_v47  ;;  %v2814_v53 = vsel %vm2005_vm1, %v2092_v30, %v2537_v36  ;;  %v2115_v56 = vcombine.high %v2099_v37, %v2099_v37 }
 0x8f5   :  { %v9312_v2 = vsel %vm2005_vm1, %v2106_v57, %v2541_v59  ;;  %v2549_v8 = vrot.slane %v2174_v61, %v8841_v47  ;;  %v2557_v9 = vrot.slane %v2171_v63, %v8841_v47  ;;  %v2175_v12 = vcombine.high %v2171_v63, %v2171_v63 }
 0x8f6   :  { %8312 = vmatpush3.bf16.msra.mxu0 %v9083_v1  ;;  %v2561_v43 = vrot.slane %v2173_v32, %v8841_v47  ;;  %v2818_v55 = vsel %vm2005_vm1, %v2099_v37, %v2553_v38 }
 0x8f7   :  { %8313 = vmatprep.subr.bf16.mxu0 %v8642_v0  ;;  %v9319_v7 = vsel %vm2005_vm1, %v2116_v3, %v2549_v8  ;;  %v9322_v14 = vsel %vm2005_vm1, %v2113_v5, %v2557_v9  ;;  %v2565_v18 = vrot.slane %v2175_v12, %v8841_v47  ;;  %v2816_v3 = vsel %vm2005_vm1, %v2114_v44, %v2545_v46 }
 0x8f9   :  { %v9327_v20 = vsel %vm2005_vm1, %v2117_v17, %v2565_v18 }
 0x8fa   :  { %8315 = vmatpush3.bf16.msra.mxu0 %v9093_v6 }
 0x8fb   :  { %8316 = vmatprep.subr.bf16.mxu0 %v8642_v0 }
 0x8fe   :  { %8318 = vmatpush3.bf16.msra.mxu0 %v9103_v11 }
 0x8ff   :  { %8319 = vmatprep.subr.bf16.mxu0 %v8642_v0 }
 0x902   :  { %8321 = vmatpush3.bf16.msra.mxu0 %v9175_v48 }
 0x903   :  { %8322 = vmatprep.subr.bf16.mxu0 %v8642_v0 }
 0x906   :  { %8324 = vmatpush3.bf16.msra.mxu0 %v9186_v51 }
 0x907   :  { %8325 = vmatprep.subr.bf16.mxu0 %v8642_v0 }
 0x90a   :  { %8327 = vmatpush3.bf16.msra.mxu0 %v9196_v54 }
 0x90b   :  { %8352 = vmatprep.subr.bf16.mxu0 %v8642_v0 }
 0x9c0   :  { %v867_v23 = vpop.f32.mrb[10].mxu0 }
 0x9c1   :  { %v871_v24 = vadd.f32 %v6728_v21, %v867_v23  ;;  %v7563_v26 = vpop.f32.mrb[11].mxu0  ;;  %v2820_v21 = vsel %vm2005_vm1, %v2115_v56, %v2561_v43 }
 0x9c3   :  { %8528 = vtanh.f32 %v871_v24 }
 0x9cd   :  { %v8529_v19 = vpop.eup %8528 }
 0x9ce   :  { %7597 = vmatmul.mubr.f32.vlgmr.msra.gmra.mrb[10].mxu1 %v8529_v19  ;;  %v2184_v34 = vrot.slane %v8529_v19, %v8836_v40  ;;  %v2177_v35 = vcombine.high %v8529_v19, %v8529_v19 }
 0x9cf   :  { %8330 = vmatpush3.bf16.msra.mxu1 %v9067_v60  ;;  %7666 = vmatprep.mubr.msk.f32.mxu1 %vm8643_vm0, %v8644_v4 }
 0x9d0   :  { %8331 = vmatprep.subr.bf16.mxu1 %v8642_v0  ;;  %v2200_v39 = vrot.slane %v2184_v34, %v8836_v40  ;;  %v2191_v41 = vrot.slane %v2177_v35, %v8836_v40  ;;  %v2192_v42 = vcombine.high %v2184_v34, %v2184_v34 }
 0x9d2   :  { %v2577_v49 = vrot.slane %v2200_v39, %v8841_v47  ;;  %v2207_v50 = vrot.slane %v2191_v41, %v8836_v40  ;;  %v2214_v45 = vrot.slane %v2192_v42, %v8836_v40  ;;  %v2222_v52 = vcombine.high %v2200_v39, %v2200_v39 }
 0x9d3   :  { %8333 = vmatpush3.bf16.msra.mxu1 %v9073_v62  ;;  %v2193_v57 = vcombine.high %v2191_v41, %v2191_v41 }
 0x9d4   :  { %8334 = vmatprep.subr.bf16.mxu1 %v8642_v0  ;;  %v2822_v58 = vsel %vm2014_vm2, %v2814_v53, %v2577_v49  ;;  %v2593_v59 = vrot.slane %v2207_v50, %v8841_v47  ;;  %v2581_v61 = vrot.slane %v2214_v45, %v8841_v47  ;;  %v2223_v5 = vcombine.high %v2207_v50, %v2207_v50 }
 0x9d5   :  { %v2585_v63 = vrot.slane %v2222_v52, %v8841_v47  ;;  %v2224_v8 = vcombine.high %v2214_v45, %v2214_v45  ;;  %v2221_v9 = vrot.slane %v2193_v57, %v8836_v40 }
 0x9d6   :  { %v2826_v12 = vsel %vm2014_vm2, %v2818_v55, %v2593_v59  ;;  %v2823_v17 = vsel %vm2014_vm2, %v9312_v2, %v2581_v61  ;;  %v2601_v18 = vrot.slane %v2223_v5, %v8841_v47 }
 0x9d7   :  { %8336 = vmatpush3.bf16.msra.mxu1 %v9083_v1  ;;  %v2824_v23 = vsel %vm2014_vm2, %v2816_v3, %v2585_v63  ;;  %v2589_v24 = vrot.slane %v2224_v8, %v8841_v47  ;;  %v2597_v26 = vrot.slane %v2221_v9, %v8841_v47  ;;  %v2225_v27 = vcombine.high %v2221_v9, %v2221_v9 }
 0x9d8   :  { %8337 = vmatprep.subr.bf16.mxu1 %v8642_v0  ;;  %v2828_v28 = vsel %vm2014_vm2, %v2820_v21, %v2601_v18  ;;  %v6730_v21 = vld [vmem:[%s10516_s1 + $0x20] sm:$0xff] }
 0x9d9   :  { %v2825_v2 = vsel %vm2014_vm2, %v9319_v7, %v2589_v24  ;;  %v2827_v19 = vsel %vm2014_vm2, %v9322_v14, %v2597_v26  ;;  %v2605_v30 = vrot.slane %v2225_v27, %v8841_v47  ;;  %v6729_v7 = vld [vmem:[%s10516_s1 + $0x18] sm:$0xff] }
 0x9db   :  { %8339 = vmatpush3.bf16.msra.mxu1 %v9093_v6  ;;  %v2829_v32 = vsel %vm2014_vm2, %v9327_v20, %v2605_v30 }
 0x9dc   :  { %8340 = vmatprep.subr.bf16.mxu1 %v8642_v0 }
 0x9df   :  { %8342 = vmatpush3.bf16.msra.mxu1 %v9103_v11 }
 0x9e0   :  { %8343 = vmatprep.subr.bf16.mxu1 %v8642_v0 }
 0x9e3   :  { %8345 = vmatpush3.bf16.msra.mxu1 %v9175_v48 }
 0x9e4   :  { %8346 = vmatprep.subr.bf16.mxu1 %v8642_v0 }
 0x9e7   :  { %8348 = vmatpush3.bf16.msra.mxu1 %v9186_v51 }
 0x9e8   :  { %8349 = vmatprep.subr.bf16.mxu1 %v8642_v0 }
 0x9eb   :  { %8351 = vmatpush3.bf16.msra.mxu1 %v9196_v54 }
 0x9ec   :  { %8376 = vmatprep.subr.bf16.mxu1 %v8642_v0 }
 0xaa1   :  { %v941_v14 = vpop.f32.mrb[10].mxu1 }
 0xaa2   :  { %v945_v20 = vadd.f32 %v6729_v7, %v941_v14  ;;  %v7598_v33 = vpop.f32.mrb[11].mxu1 }
 0xaa4   :  { %8530 = vtanh.f32 %v945_v20 }
 0xaae   :  { %v8531_v34 = vpop.eup %8530 }
 0xaaf   :  { %7632 = vmatmul.mubr.f32.vlgmr.msra.gmra.mrb[12].mxu0 %v8531_v34  ;;  %v2234_v35 = vrot.slane %v8531_v34, %v8836_v40  ;;  %v2227_v36 = vcombine.high %v8531_v34, %v8531_v34 }
 0xab0   :  { %8354 = vmatpush3.bf16.msra.mxu0 %v9067_v60  ;;  %7701 = vmatprep.mubr.msk.f32.mxu0 %vm8643_vm0, %v8644_v4 }
 0xab1   :  { %8355 = vmatprep.subr.bf16.mxu0 %v8642_v0  ;;  %v2250_v37 = vrot.slane %v2234_v35, %v8836_v40  ;;  %v2241_v38 = vrot.slane %v2227_v36, %v8836_v40  ;;  %v2242_v39 = vcombine.high %v2234_v35, %v2234_v35 }
 0xab3   :  { %v2617_v41 = vrot.slane %v2250_v37, %v8841_v47  ;;  %v2257_v42 = vrot.slane %v2241_v38, %v8836_v40  ;;  %v2264_v43 = vrot.slane %v2242_v39, %v8836_v40  ;;  %v2272_v44 = vcombine.high %v2250_v37, %v2250_v37 }
 0xab4   :  { %8357 = vmatpush3.bf16.msra.mxu0 %v9073_v62  ;;  %v2243_v46 = vcombine.high %v2241_v38, %v2241_v38 }
 0xab5   :  { %8358 = vmatprep.subr.bf16.mxu0 %v8642_v0  ;;  %v2830_v49 = vsel %vm2023_vm3, %v2822_v58, %v2617_v41  ;;  %v2633_v50 = vrot.slane %v2257_v42, %v8841_v47  ;;  %v2621_v45 = vrot.slane %v2264_v43, %v8841_v47  ;;  %v2273_v52 = vcombine.high %v2257_v42, %v2257_v42 }
 0xab6   :  { %v2625_v53 = vrot.slane %v2272_v44, %v8841_v47  ;;  %v2274_v55 = vcombine.high %v2264_v43, %v2264_v43  ;;  %v2271_v56 = vrot.slane %v2243_v46, %v8836_v40 }
 0xab7   :  { %v2834_v57 = vsel %vm2023_vm3, %v2826_v12, %v2633_v50  ;;  %v2831_v59 = vsel %vm2023_vm3, %v2823_v17, %v2621_v45  ;;  %v2641_v61 = vrot.slane %v2273_v52, %v8841_v47 }
 0xab8   :  { %8360 = vmatpush3.bf16.msra.mxu0 %v9083_v1  ;;  %v2832_v58 = vsel %vm2023_vm3, %v2824_v23, %v2625_v53  ;;  %v2629_v5 = vrot.slane %v2274_v55, %v8841_v47  ;;  %v2637_v63 = vrot.slane %v2271_v56, %v8841_v47  ;;  %v2275_v3 = vcombine.high %v2271_v56, %v2271_v56 }
 0xab9   :  { %8361 = vmatprep.subr.bf16.mxu0 %v8642_v0  ;;  %v2836_v8 = vsel %vm2023_vm3, %v2828_v28, %v2641_v61  ;;  %v6731_v61 = vld [vmem:[%s10516_s1 + $0x28] sm:$0xff] }
 0xaba   :  { %v2833_v9 = vsel %vm2023_vm3, %v2825_v2, %v2629_v5  ;;  %v2835_v12 = vsel %vm2023_vm3, %v2827_v19, %v2637_v63  ;;  %v2645_v17 = vrot.slane %v2275_v3, %v8841_v47 }
 0xabc   :  { %8363 = vmatpush3.bf16.msra.mxu0 %v9093_v6  ;;  %v2837_v18 = vsel %vm2023_vm3, %v2829_v32, %v2645_v17 }
 0xabd   :  { %8364 = vmatprep.subr.bf16.mxu0 %v8642_v0 }
 0xac0   :  { %8366 = vmatpush3.bf16.msra.mxu0 %v9103_v11 }
 0xac1   :  { %8367 = vmatprep.subr.bf16.mxu0 %v8642_v0 }
 0xac4   :  { %8369 = vmatpush3.bf16.msra.mxu0 %v9175_v48 }
 0xac5   :  { %8370 = vmatprep.subr.bf16.mxu0 %v8642_v0 }
 0xac8   :  { %8372 = vmatpush3.bf16.msra.mxu0 %v9186_v51 }
 0xac9   :  { %8373 = vmatprep.subr.bf16.mxu0 %v8642_v0 }
 0xacc   :  { %8375 = vmatpush3.bf16.msra.mxu0 %v9196_v54 }
 0xacd   :  { %8400 = vmatprep.subr.bf16.mxu0 %v8642_v0 }
 0xb82   :  { %v1015_v23 = vpop.f32.mrb[12].mxu0 }
 0xb83   :  { %v1019_v24 = vadd.f32 %v6730_v21, %v1015_v23  ;;  %v7633_v26 = vpop.f32.mrb[13].mxu0 }
 0xb85   :  { %8532 = vtanh.f32 %v1019_v24 }
 0xb8f   :  { %v8533_v27 = vpop.eup %8532 }
 0xb90   :  { %7667 = vmatmul.mubr.f32.vlgmr.msra.gmra.mrb[12].mxu1 %v8533_v27  ;;  %v2284_v28 = vrot.slane %v8533_v27, %v8836_v40  ;;  %v2277_v2 = vcombine.high %v8533_v27, %v8533_v27 }
 0xb91   :  { %8378 = vmatpush3.bf16.msra.mxu1 %v9067_v60  ;;  %7736 = vmatprep.mubr.msk.f32.mxu1 %vm8643_vm0, %v8644_v4 }
 0xb92   :  { %8379 = vmatprep.subr.bf16.mxu1 %v8642_v0  ;;  %v2300_v19 = vrot.slane %v2284_v28, %v8836_v40  ;;  %v2291_v30 = vrot.slane %v2277_v2, %v8836_v40  ;;  %v2292_v32 = vcombine.high %v2284_v28, %v2284_v28 }
 0xb94   :  { %v2657_v7 = vrot.slane %v2300_v19, %v8841_v47  ;;  %v2307_v14 = vrot.slane %v2291_v30, %v8836_v40  ;;  %v2314_v20 = vrot.slane %v2292_v32, %v8836_v40  ;;  %v2322_v33 = vcombine.high %v2300_v19, %v2300_v19 }
 0xb95   :  { %8381 = vmatpush3.bf16.msra.mxu1 %v9073_v62  ;;  %v2293_v34 = vcombine.high %v2291_v30, %v2291_v30 }
 0xb96   :  { %8382 = vmatprep.subr.bf16.mxu1 %v8642_v0  ;;  %v2838_v35 = vsel %vm2032_vm4, %v2830_v49, %v2657_v7  ;;  %v2673_v36 = vrot.slane %v2307_v14, %v8841_v47  ;;  %v2661_v37 = vrot.slane %v2314_v20, %v8841_v47  ;;  %v2323_v38 = vcombine.high %v2307_v14, %v2307_v14 }
 0xb97   :  { %v2665_v39 = vrot.slane %v2322_v33, %v8841_v47  ;;  %v2324_v41 = vcombine.high %v2314_v20, %v2314_v20  ;;  %v2321_v42 = vrot.slane %v2293_v34, %v8836_v40 }
 0xb98   :  { %v2842_v43 = vsel %vm2032_vm4, %v2834_v57, %v2673_v36  ;;  %v2839_v44 = vsel %vm2032_vm4, %v2831_v59, %v2661_v37  ;;  %v2681_v46 = vrot.slane %v2323_v38, %v8841_v47 }
 0xb99   :  { %8384 = vmatpush3.bf16.msra.mxu1 %v9083_v1  ;;  %v2840_v49 = vsel %vm2032_vm4, %v2832_v58, %v2665_v39  ;;  %v2669_v50 = vrot.slane %v2324_v41, %v8841_v47  ;;  %v2677_v45 = vrot.slane %v2321_v42, %v8841_v47  ;;  %v2325_v52 = vcombine.high %v2321_v42, %v2321_v42 }
 0xb9a   :  { %8385 = vmatprep.subr.bf16.mxu1 %v8642_v0  ;;  %v2844_v53 = vsel %vm2032_vm4, %v2836_v8, %v2681_v46  ;;  %v2873_v46 = vld [vmem:[%s10517_s4 + $0x18] sm:$0xff] }
 0xb9b   :  { %v2841_v55 = vsel %vm2032_vm4, %v2833_v9, %v2669_v50  ;;  %v2843_v56 = vsel %vm2032_vm4, %v2835_v12, %v2677_v45  ;;  %v2685_v57 = vrot.slane %v2325_v52, %v8841_v47  ;;  %v2874_v45 = vld [vmem:[%s10517_s4 + $0x20] sm:$0xff]  ;;  %v2875_v52 = vld [vmem:[%s10517_s4 + $0x28] sm:$0xff] }
 0xb9d   :  { %8387 = vmatpush3.bf16.msra.mxu1 %v9093_v6  ;;  %v2845_v59 = vsel %vm2032_vm4, %v2837_v18, %v2685_v57  ;;  %v2876_v57 = vld [vmem:[%s10517_s4 + $0x30] sm:$0xff] }
 0xb9e   :  { %8388 = vmatprep.subr.bf16.mxu1 %v8642_v0 }
 0xba1   :  { %8390 = vmatpush3.bf16.msra.mxu1 %v9103_v11 }
 0xba2   :  { %8391 = vmatprep.subr.bf16.mxu1 %v8642_v0 }
 0xba5   :  { %8393 = vmatpush3.bf16.msra.mxu1 %v9175_v48 }
 0xba6   :  { %8394 = vmatprep.subr.bf16.mxu1 %v8642_v0 }
 0xba9   :  { %8396 = vmatpush3.bf16.msra.mxu1 %v9186_v51 }
 0xbaa   :  { %8397 = vmatprep.subr.bf16.mxu1 %v8642_v0 }
 0xbad   :  { %8399 = vmatpush3.bf16.msra.mxu1 %v9196_v54 }
 0xc63   :  { %v1089_v58 = vpop.f32.mrb[12].mxu1 }
 0xc64   :  { %v1093_v5 = vadd.f32 %v6731_v61, %v1089_v58  ;;  %v7668_v63 = vpop.f32.mrb[13].mxu1 }
 0xc66   :  { %8534 = vtanh.f32 %v1093_v5 }
 0xc70   :  { %v8535_v3 = vpop.eup %8534 }
 0xc71   :  { %7702 = vmatmul.mubr.f32.vlgmr.msra.gmra.mrb[14].mxu0 %v8535_v3  ;;  %v2334_v8 = vrot.slane %v8535_v3, %v8836_v40  ;;  %v2327_v9 = vcombine.high %v8535_v3, %v8535_v3 }
 0xc72   :  { %8402 = vmatpush3.bf16.msra.mxu0 %v9067_v60  ;;  %7771 = vmatprep.mubr.msk.f32.mxu0 %vm8643_vm0, %v8644_v4 }
 0xc73   :  { %8403 = vmatprep.subr.bf16.mxu0 %v8642_v0  ;;  %v2350_v12 = vrot.slane %v2334_v8, %v8836_v40  ;;  %v2341_v17 = vrot.slane %v2327_v9, %v8836_v40  ;;  %v2342_v18 = vcombine.high %v2334_v8, %v2334_v8 }
 0xc75   :  { %v2697_v21 = vrot.slane %v2350_v12, %v8841_v47  ;;  %v2357_v23 = vrot.slane %v2341_v17, %v8836_v40  ;;  %v2364_v24 = vrot.slane %v2342_v18, %v8836_v40  ;;  %v2372_v26 = vcombine.high %v2350_v12, %v2350_v12 }
 0xc76   :  { %8405 = vmatpush3.bf16.msra.mxu0 %v9073_v62  ;;  %v2343_v60 = vcombine.high %v2341_v17, %v2341_v17 }
 0xc77   :  { %8406 = vmatprep.subr.bf16.mxu0 %v8642_v0  ;;  %v9498_v27 = vsel %vm2041_vm5, %v2838_v35, %v2697_v21  ;;  %v2713_v28 = vrot.slane %v2357_v23, %v8841_v47  ;;  %v2701_v2 = vrot.slane %v2364_v24, %v8841_v47  ;;  %v2373_v19 = vcombine.high %v2357_v23, %v2357_v23 }
 0xc78   :  { %v2705_v30 = vrot.slane %v2372_v26, %v8841_v47  ;;  %v2374_v32 = vcombine.high %v2364_v24, %v2364_v24  ;;  %v2371_v7 = vrot.slane %v2343_v60, %v8836_v40  ;;  %v2878_v26 = vld [vmem:[%s10517_s4 + $0x40] sm:$0xff]  ;;  %v2879_v60 = vld [vmem:[%s10517_s4 + $0x48] sm:$0xff] }
 0xc79   :  { %v9505_v14 = vsel %vm2041_vm5, %v2842_v43, %v2713_v28  ;;  %v9508_v62 = vsel %vm2041_vm5, %v2839_v44, %v2701_v2  ;;  %v2721_v20 = vrot.slane %v2373_v19, %v8841_v47 }
 0xc7a   :  { %8408 = vmatpush3.bf16.msra.mxu0 %v9083_v1  ;;  %v9513_v33 = vsel %vm2041_vm5, %v2840_v49, %v2705_v30  ;;  %v2709_v34 = vrot.slane %v2374_v32, %v8841_v47  ;;  %v2717_v35 = vrot.slane %v2371_v7, %v8841_v47  ;;  %v2375_v36 = vcombine.high %v2371_v7, %v2371_v7 }
 0xc7b   :  { %8409 = vmatprep.subr.bf16.mxu0 %v8642_v0  ;;  %v9519_v37 = vsel %vm2041_vm5, %v2844_v53, %v2721_v20 }
 0xc7c   :  { %v9522_v38 = vsel %vm2041_vm5, %v2841_v55, %v2709_v34  ;;  %v9525_v39 = vsel %vm2041_vm5, %v2843_v56, %v2717_v35  ;;  %v2725_v1 = vrot.slane %v2375_v36, %v8841_v47  ;;  %v8432_v56 = vpack.c.bf16 %v2875_v52, %v2874_v45 }
 0xc7d   :  { %v8440_v36 = vpack.c.bf16 %v2879_v60, %v2878_v26 }
 0xc7e   :  { %8411 = vmatpush3.bf16.msra.mxu0 %v9093_v6  ;;  %v9530_v41 = vsel %vm2041_vm5, %v2845_v59, %v2725_v1  ;;  %v2870_v6 = vld [vmem:[%s10517_s4] sm:$0xff]  ;;  %v2877_v59 = vld [vmem:[%s10517_s4 + $0x38] sm:$0xff] }
 0xc7f   :  { %8412 = vmatprep.subr.bf16.mxu0 %v8642_v0  ;;  %v8436_v12 = vpack.c.bf16 %v2877_v59, %v2876_v57  ;;  %v2881_v1 = vld [vmem:[%s10517_s4 + $0x58] sm:$0xff] }
 0xc82   :  { %8414 = vmatpush3.bf16.msra.mxu0 %v9103_v11  ;;  %v2871_v11 = vld [vmem:[%s10517_s4 + $0x8] sm:$0xff] }
 0xc83   :  { %8415 = vmatprep.subr.bf16.mxu0 %v8642_v0  ;;  %v8424_v42 = vpack.c.bf16 %v2871_v11, %v2870_v6 }
 0xc85   :  { %8425 = vmatprep.subr.bf16.mxu1 %v8424_v42 }
 0xc86   :  { %8417 = vmatpush3.bf16.msra.mxu0 %v9175_v48  ;;  %v6732_v48 = vld [vmem:[%s10516_s1 + $0x30] sm:$0xff] }
 0xc87   :  { %8418 = vmatprep.subr.bf16.mxu0 %v8642_v0 }
 0xc8a   :  { %8420 = vmatpush3.bf16.msra.mxu0 %v9186_v51 }
 0xc8b   :  { %8421 = vmatprep.subr.bf16.mxu0 %v8642_v0 }
 0xc8e   :  { %8423 = vmatpush3.bf16.msra.mxu0 %v9196_v54  ;;  %v2872_v54 = vld [vmem:[%s10517_s4 + $0x10] sm:$0xff] }
 0xc8f   :  { %v8428_v49 = vpack.c.bf16 %v2873_v46, %v2872_v54 }
 0xd44   :  { %v1163_v43 = vpop.f32.mrb[14].mxu0 }
 0xd45   :  { %v1167_v51 = vadd.f32 %v6732_v48, %v1163_v43  ;;  %v7703_v44 = vpop.f32.mrb[15].mxu0  ;;  %v2882_v48 = vld [vmem:[%s10517_s4 + $0x60] sm:$0xff]  ;;  %v2884_v43 = vld [vmem:[%s10517_s4 + $0x70] sm:$0xff] }
 0xd46   :  { %v6733_v44 = vld [vmem:[%s10516_s1 + $0x38] sm:$0xff] }
 0xd47   :  { %8536 = vtanh.f32 %v1167_v51 }
 0xd51   :  { %v8537_v50 = vpop.eup %8536 }
 0xd52   :  { %7737 = vmatmul.mubr.f32.vlgmr.msra.gmra.mrb[14].mxu1 %v8537_v50  ;;  %v2384_v53 = vrot.slane %v8537_v50, %v8836_v40  ;;  %v2377_v55 = vcombine.high %v8537_v50, %v8537_v50 }
 0xd53   :  { %8427 = vmatpush3.bf16.msra.mxu1 %v8424_v42  ;;  %7806 = vmatprep.mubr.f32.mxu1 %v9222_v15 }
 0xd54   :  { %8429 = vmatprep.subr.bf16.mxu1 %v8428_v49  ;;  %v2400_v61 = vrot.slane %v2384_v53, %v8836_v40  ;;  %v2391_v58 = vrot.slane %v2377_v55, %v8836_v40  ;;  %v2392_v5 = vcombine.high %v2384_v53, %v2384_v53 }
 0xd56   :  { %v2737_v63 = vrot.slane %v2400_v61, %v8841_v47  ;;  %v2407_v3 = vrot.slane %v2391_v58, %v8836_v40  ;;  %v2414_v8 = vrot.slane %v2392_v5, %v8836_v40  ;;  %v2422_v9 = vcombine.high %v2400_v61, %v2400_v61 }
 0xd57   :  { %8431 = vmatpush3.bf16.msra.mxu1 %v8428_v49  ;;  %v2393_v17 = vcombine.high %v2391_v58, %v2391_v58 }
 0xd58   :  { %8433 = vmatprep.subr.bf16.mxu1 %v8432_v56  ;;  %v9576_v18 = vsel %vm2050_vm6, %v9498_v27, %v2737_v63  ;;  %v2753_v21 = vrot.slane %v2407_v3, %v8841_v47  ;;  %v2741_v23 = vrot.slane %v2414_v8, %v8841_v47  ;;  %v2423_v24 = vcombine.high %v2407_v3, %v2407_v3 }
 0xd59   :  { %v2745_v28 = vrot.slane %v2422_v9, %v8841_v47  ;;  %v2424_v2 = vcombine.high %v2414_v8, %v2414_v8  ;;  %v2421_v19 = vrot.slane %v2393_v17, %v8836_v40 }
 0xd5a   :  { %v2858_v27 = vsel %vm2050_vm6, %v9505_v14, %v2753_v21  ;;  %v2855_v30 = vsel %vm2050_vm6, %v9508_v62, %v2741_v23  ;;  %v2761_v32 = vrot.slane %v2423_v24, %v8841_v47  ;;  %v2880_v62 = vld [vmem:[%s10517_s4 + $0x50] sm:$0xff] }
 0xd5b   :  { %8435 = vmatpush3.bf16.msra.mxu1 %v8432_v56  ;;  %v9595_v7 = vsel %vm2050_vm6, %v9513_v33, %v2745_v28  ;;  %v2749_v20 = vrot.slane %v2424_v2, %v8841_v47  ;;  %v2757_v34 = vrot.slane %v2421_v19, %v8841_v47  ;;  %v2425_v35 = vcombine.high %v2421_v19, %v2421_v19 }
 0xd5c   :  { %8437 = vmatprep.subr.bf16.mxu1 %v8436_v12  ;;  %v2860_v14 = vsel %vm2050_vm6, %v9519_v37, %v2761_v32  ;;  %v8444_v42 = vpack.c.bf16 %v2881_v1, %v2880_v62 }
 0xd5d   :  { %v9609_v33 = vsel %vm2050_vm6, %v9522_v38, %v2749_v20  ;;  %v9613_v6 = vsel %vm2050_vm6, %v9525_v39, %v2757_v34  ;;  %v2765_v11 = vrot.slane %v2425_v35, %v8841_v47  ;;  %v2883_v38 = vld [vmem:[%s10517_s4 + $0x68] sm:$0xff] }
 0xd5e   :  { %v8448_v39 = vpack.c.bf16 %v2883_v38, %v2882_v48 }
 0xd5f   :  { %8439 = vmatpush3.bf16.msra.mxu1 %v8436_v12  ;;  %v9618_v37 = vsel %vm2050_vm6, %v9530_v41, %v2765_v11  ;;  %v2885_v41 = vld [vmem:[%s10517_s4 + $0x78] sm:$0xff] }
 0xd60   :  { %8441 = vmatprep.subr.bf16.mxu1 %v8440_v36  ;;  %v8452_v51 = vpack.c.bf16 %v2885_v41, %v2884_v43 }
 0xd63   :  { %8443 = vmatpush3.bf16.msra.mxu1 %v8440_v36 }
 0xd64   :  { %8445 = vmatprep.subr.bf16.mxu1 %v8444_v42 }
 0xd67   :  { %8447 = vmatpush3.bf16.msra.mxu1 %v8444_v42 }
 0xd68   :  { %8449 = vmatprep.subr.bf16.mxu1 %v8448_v39 }
 0xd6b   :  { %8451 = vmatpush3.bf16.msra.mxu1 %v8448_v39 }
 0xd6c   :  { %8453 = vmatprep.subr.bf16.mxu1 %v8452_v51 }
 0xd6f   :  { %8455 = vmatpush3.bf16.msra.mxu1 %v8452_v51 }
 0xd72   :  { %7807 = vmatmul.mubr.f32.vlgmr.msra.gmra.mrb[16].mxu1 %v9230_v10 }
 0xd73   :  { %7809 = vmatprep.mubr.f32.mxu1 %v9234_v13 }
 0xd76   :  { %7810 = vmatmul.mubr.f32.gmra.mrb[18].mxu1 %v9247_v29 }
 0xd77   :  { %7812 = vmatprep.mubr.f32.mxu1 %v9240_v16 }
 0xd7a   :  { %7813 = vmatmul.mubr.f32.gmra.mrb[20].mxu1 %v9251_v22 }
 0xd7b   :  { %7815 = vmatprep.mubr.f32.mxu1 %v9255_v25 }
 0xd7e   :  { %7816 = vmatmul.mubr.f32.gmra.mrb[22].mxu1 %v9261_v31 }
 0xe25   :  { %v1237_v54 = vpop.f32.mrb[14].mxu1 }
 0xe26   :  { %v1241_v46 = vadd.f32 %v6733_v44, %v1237_v54  ;;  %v7738_v49 = vpop.f32.mrb[15].mxu1 }
 0xe28   :  { %8538 = vtanh.f32 %v1241_v46 }
 0xe32   :  { %v8539_v50 = vpop.eup %8538 }
 0xe33   :  { %7772 = vmatmul.mubr.f32.vlgmr.msra.gmra.mrb[16].mxu0 %v8539_v50  ;;  %v2434_v45 = vrot.slane %v8539_v50, %v8836_v40  ;;  %v2427_v52 = vcombine.high %v8539_v50, %v8539_v50 }
 0xe35   :  { %v2450_v53 = vrot.slane %v2434_v45, %v8836_v40  ;;  %v2441_v55 = vrot.slane %v2427_v52, %v8836_v40  ;;  %v2442_v56 = vcombine.high %v2434_v45, %v2434_v45 }
 0xe37   :  { %v2777_v57 = vrot.slane %v2450_v53, %v8841_v47  ;;  %v2457_v59 = vrot.slane %v2441_v55, %v8836_v40  ;;  %v2464_v61 = vrot.slane %v2442_v56, %v8836_v40  ;;  %v2443_v21 = vcombine.high %v2441_v55, %v2441_v55 }
 0xe39   :  { %v9650_v58 = vsel %vm2059_vm7, %v9576_v18, %v2777_v57  ;;  %v2793_v5 = vrot.slane %v2457_v59, %v8841_v47  ;;  %v2781_v63 = vrot.slane %v2464_v61, %v8841_v47  ;;  %v2473_v3 = vcombine.high %v2457_v59, %v2457_v59 }
 0xe3a   :  { %7820 = vmatprep.mubr.f32.mxu0 %v9650_v58  ;;  %v2472_v18 = vcombine.high %v2450_v53, %v2450_v53  ;;  %v2474_v24 = vcombine.high %v2464_v61, %v2464_v61  ;;  %v2471_v26 = vrot.slane %v2443_v21, %v8836_v40 }
 0xe3b   :  { %v2866_v8 = vsel %vm2059_vm7, %v2858_v27, %v2793_v5  ;;  %v9657_v9 = vsel %vm2059_vm7, %v2855_v30, %v2781_v63  ;;  %v2801_v12 = vrot.slane %v2473_v3, %v8841_v47 }
 0xe3c   :  { %7840 = vmatprep.mubr.f32.mxu1 %v2866_v8  ;;  %v2785_v23 = vrot.slane %v2472_v18, %v8841_v47  ;;  %v2789_v19 = vrot.slane %v2474_v24, %v8841_v47  ;;  %v2797_v27 = vrot.slane %v2471_v26, %v8841_v47  ;;  %v2475_v62 = vcombine.high %v2471_v26, %v2471_v26 }
 0xe3d   :  { %v9661_v17 = vsel %vm2059_vm7, %v2860_v14, %v2801_v12  ;;  %v4677_v38 = vcombine.high %v2866_v8, %v2866_v8  ;;  %v4684_v43 = vrot.slane %v2866_v8, %v8836_v40 }
 0xe3e   :  { %v9667_v2 = vsel %vm2059_vm7, %v9595_v7, %v2785_v23  ;;  %v9675_v32 = vsel %vm2059_vm7, %v9609_v33, %v2789_v19  ;;  %v9679_v20 = vsel %vm2059_vm7, %v9613_v6, %v2797_v27  ;;  %v2805_v1 = vrot.slane %v2475_v62, %v8841_v47  ;;  %v6734_v6 = vld [vmem:[%s10516_s1 + $0x40] sm:$0xff] }
 0xe3f   :  { %v4614_v39 = vcombine.high %v9675_v32, %v9675_v32  ;;  %v4691_v47 = vrot.slane %v4677_v38, %v8836_v40  ;;  %v4692_v51 = vcombine.high %v4684_v43, %v4684_v43  ;;  %v4700_v5 = vrot.slane %v4684_v43, %v8836_v40 }
 0xe40   :  { %v9688_v33 = vsel %vm2059_vm7, %v9618_v37, %v2805_v1  ;;  %v4747_v37 = vrot.slane %v9679_v20, %v8836_v40 }
 0xe41   :  { %v4628_v41 = vrot.slane %v4614_v39, %v8836_v40  ;;  %v4693_v44 = vcombine.high %v4691_v47, %v4691_v47  ;;  %v4714_v53 = vrot.slane %v4692_v51, %v8836_v40  ;;  %v4707_v63 = vrot.slane %v4691_v47, %v8836_v40 }
 0xe42   :  { %v4755_v45 = vcombine.high %v4747_v37, %v4747_v37  ;;  %v4763_v52 = vrot.slane %v4747_v37, %v8836_v40 }
 0xe43   :  { %v4630_v46 = vcombine.high %v4628_v41, %v4628_v41  ;;  %v9704_v55 = vrot.slane %v4628_v41, %v8836_v40  ;;  %v4721_v56 = vrot.slane %v4693_v44, %v8836_v40  ;;  %v6239_v24 = vcombine.low %v4700_v5, %v4714_v53 }
 0xe44   :  { %v9723_v18 = vrot.slane %v4755_v45, %v8836_v40  ;;  %v4785_v21 = vcombine.high %v4763_v52, %v4763_v52  ;;  %v6763_v19 = vcombine.high %v4700_v5, %v4714_v53 }
 0xe45   :  { %v7808_v60 = vpop.f32.mrb[16].mxu1  ;;  %v4658_v3 = vrot.slane %v4630_v46, %v8836_v40  ;;  %v4660_v23 = vcombine.high %v9704_v55, %v9704_v55  ;;  %v6286_v26 = vcombine.low %v4707_v63, %v4721_v56  ;;  %v6261_v43 = vrot.slane %v6239_v24, %v8836_v40 }
 0xe46   :  { %v2952_v28 = vpop.f32.mrb[17].mxu1  ;;  %v6289_v1 = vcombine.low %v9723_v18, %v4785_v21  ;;  %v6268_v47 = vrot.slane %v6763_v19, %v8836_v40 }
 0xe47   :  { %7818 = vmatprep.subr.mxu0 %v2952_v28  ;;  %v4662_v62 = vcombine.high %v4658_v3, %v4658_v3 }
 0xe48   :  { %7819 = vmatpush3.xpose.msra.mxu0 %v2952_v28  ;;  %v6764_v28 = vcombine.high %v4707_v63, %v4721_v56  ;;  %v6317_v51 = vrot.slane %v6289_v1, %v8836_v40 }
 0xe49   :  { %v9671_v30 = vpop.f32.mrb[18].mxu1  ;;  %7823 = vmatprep.subr.mxu0 %v7808_v60 }
 0xe4a   :  { %v2962_v34 = vpop.f32.mrb[19].mxu1  ;;  %v6303_v38 = vrot.slane %v6764_v28, %v8836_v40 }
 0xe4d   :  { %v9681_v35 = vpop.f32.mrb[20].mxu1 }
 0xe4e   :  { %v2972_v7 = vpop.f32.mrb[21].mxu1 }
 0xe4f   :  { %7838 = vmatprep.subr.mxu1 %v2972_v7 }
 0xe50   :  { %7839 = vmatpush3.xpose.msra.mxu1 %v2972_v7 }
 0xe51   :  { %v9683_v36 = vpop.f32.mrb[22].mxu1 }
 0xe52   :  { %v2982_v14 = vpop.f32.mrb[23].mxu1 }
 0xe53   :  { %7848 = vmatprep.subr.mxu1 %v2982_v14 }
 0xf06   :  { %v1311_v11 = vpop.f32.mrb[16].mxu0 }
 0xf07   :  { %v1315_v42 = vadd.f32 %v6734_v6, %v1311_v11  ;;  %v7773_v48 = vpop.f32.mrb[17].mxu0  ;;  %v6237_v11 = vcombine.low %v4658_v3, %v4660_v23 }
 0xf08   :  { %v6296_v48 = vrot.slane %v6286_v26, %v8836_v40 }
 0xf09   :  { %8540 = vtanh.f32 %v1315_v42 }
 0xf0a   :  { %v6318_v44 = vcombine.low %v6296_v48, %v6303_v38 }
 0xf13   :  { %v8541_v54 = vpop.eup %8540 }
 0xf14   :  { %v2477_v49 = vcombine.high %v8541_v54, %v8541_v54  ;;  %v2484_v50 = vrot.slane %v8541_v54, %v8836_v40  ;;  %v6247_v54 = vrot.slane %v6237_v11, %v8836_v40 }
 0xf16   :  { %v9708_v57 = vrot.slane %v2484_v50, %v8836_v40  ;;  %v9711_v59 = vrot.slane %v2477_v49, %v8836_v40  ;;  %v2492_v61 = vcombine.high %v2484_v50, %v2484_v50  ;;  %v6270_v49 = vcombine.low %v6261_v43, %v6268_v47 }
 0xf18   :  { %7821 = vmatmul.mubr.f32.vlgmr.msra.gmra.mrb[18].mxu0 %v9708_v57  ;;  %v2507_v8 = vrot.slane %v9711_v59, %v8836_v40  ;;  %v9720_v12 = vrot.slane %v2492_v61, %v8836_v40  ;;  %v9744_v42 = vcombine.high %v9708_v57, %v9708_v57 }
 0xf19   :  { %7824 = vmatpush3.xpose.msra.mxu0 %v7808_v60  ;;  %7825 = vmatprep.mubr.f32.mxu0 %v9657_v9 }
 0xf1a   :  { %7828 = vmatprep.subr.mxu0 %v2962_v34  ;;  %7841 = vmatmul.mubr.f32.vlgmr.msra.gmra.mrb[24].mxu1 %v2507_v8  ;;  %v2524_v27 = vcombine.high %v9720_v12, %v9720_v12  ;;  %v4732_v7 = vrot.slane %v2507_v8, %v8836_v40  ;;  %v9734_v60 = vcombine.high %v2507_v8, %v2507_v8 }
 0xf1b   :  { %7849 = vmatpush3.xpose.msra.mxu1 %v2982_v14  ;;  %7850 = vmatprep.mubr.f32.mxu1 %v9661_v17 }
 0xf1c   :  { %7858 = vmatprep.subr.mxu1 %v9222_v15  ;;  %7826 = vmatmul.mubr.f32.vlgmr.msra.gmra.mrb[20].mxu0 %v9720_v12  ;;  %v4669_v14 = vrot.slane %v2524_v27, %v8836_v40  ;;  %v4739_v6 = vrot.slane %v4732_v7, %v8836_v40 }
 0xf1d   :  { %7829 = vmatpush3.xpose.msra.mxu0 %v2962_v34  ;;  %7830 = vmatprep.mubr.f32.mxu0 %v9667_v2 }
 0xf1e   :  { %7833 = vmatprep.subr.mxu0 %v9671_v30  ;;  %7851 = vmatmul.mubr.f32.vlgmr.msra.gmra.mrb[26].mxu1 %v9734_v60  ;;  %v4676_v34 = vrot.slane %v4669_v14, %v8836_v40  ;;  %v6288_v39 = vcombine.low %v4739_v6, %v4763_v52  ;;  %v6326_v52 = vrot.slane %v6318_v44, %v8836_v40 }
 0xf1f   :  { %7859 = vmatpush3.msra.mxu1 %v9222_v15  ;;  %v2493_v15 = vcombine.high %v9711_v59, %v9711_v59  ;;  %v6284_v59 = vrot.slane %v6270_v49, %v8836_v40 }
 0xf20   :  { %7868 = vmatprep.subr.mxu1 %v9234_v13  ;;  %7831 = vmatmul.mubr.f32.vlgmr.msra.gmra.mrb[22].mxu0 %v9744_v42  ;;  %v6238_v41 = vcombine.low %v4662_v62, %v4676_v34  ;;  %v6310_v37 = vrot.slane %v6288_v39, %v8836_v40 }
 0xf21   :  { %7834 = vmatpush3.xpose.msra.mxu0 %v9671_v30  ;;  %7835 = vmatprep.mubr.f32.mxu0 %v9675_v32  ;;  %v9767_v45 = vrot.slane %v2493_v15, %v8836_v40 }
 0xf22   :  { %7843 = vmatprep.subr.mxu0 %v9681_v35  ;;  %v6254_v46 = vrot.slane %v6238_v41, %v8836_v40  ;;  %v6319_v30 = vcombine.low %v6310_v37, %v6317_v51 }
 0xf23   :  { %v9783_v5 = vcombine.high %v9767_v45, %v9767_v45 }
 0xf24   :  { %7836 = vmatmul.mubr.f32.vlgmr.msra.gmra.mrb[24].mxu0 %v2524_v27  ;;  %v6269_v50 = vcombine.low %v6247_v54, %v6254_v46  ;;  %v6333_v53 = vrot.slane %v6319_v30, %v8836_v40 }
 0xf25   :  { %7844 = vmatpush3.xpose.msra.mxu0 %v9681_v35  ;;  %7845 = vmatprep.mubr.f32.mxu0 %v9679_v20 }
 0xf26   :  { %7853 = vmatprep.subr.mxu0 %v9683_v36  ;;  %v6277_v56 = vrot.slane %v6269_v50, %v8836_v40  ;;  %v9774_v61 = vcombine.low %v6326_v52, %v6333_v53 }
 0xf28   :  { %7846 = vmatmul.mubr.f32.vlgmr.msra.gmra.mrb[26].mxu0 %v9767_v45  ;;  %v9778_v35 = vcombine.low %v6277_v56, %v6284_v59 }
 0xf29   :  { %7854 = vmatpush3.xpose.msra.mxu0 %v9683_v36  ;;  %7855 = vmatprep.mubr.f32.mxu0 %v9688_v33 }
 0xf2a   :  { %7863 = vmatprep.subr.mxu0 %v9230_v10 }
 0xf2c   :  { %7856 = vmatmul.mubr.f32.vlgmr.msra.gmra.mrb[28].mxu0 %v9783_v5 }
 0xf2d   :  { %7864 = vmatpush3.msra.mxu0 %v9230_v10 }
 0xf2e   :  { %7873 = vmatprep.subr.mxu0 %v9247_v29 }
 0xfeb   :  { %v7822_v63 = vpop.f32.mrb[18].mxu0 }
 0xfec   :  { %v3057_v3 = vpop.f32.mrb[19].mxu0  ;;  %v3596_v28 = vsel %vm3595_vm9, %v7822_v63, -inf }
 0xfed   :  { %v9788_v36 = vpop.f32.mrb[24].mxu1  ;;  %v3592_v8 = vsel %vm3591_vm8, %v3057_v3, -inf }
 0xfee   :  { %3593 = vmax.xlane.f32.xlu0 %v3592_v8  ;;  %v9791_v21 = vpop.f32.mrb[25].mxu1  ;;  %v3620_v15 = vsel %vm3595_vm9, %v9788_v36, -inf }
 0xfef   :  { %v7827_v23 = vpop.f32.mrb[20].mxu0  ;;  %v3617_v43 = vsel %vm3591_vm8, %v9791_v21, -inf }
 0xff0   :  { %v3132_v24 = vpop.f32.mrb[21].mxu0  ;;  %v3602_v62 = vsel %vm3595_vm9, %v7827_v23, -inf }
 0xff1   :  { %v9793_v26 = vpop.f32.mrb[26].mxu1  ;;  %v3599_v10 = vsel %vm3591_vm8, %v3132_v24, -inf }
 0xff2   :  { %3597 = vmax.xlane.f32.xlu0 %v3596_v28  ;;  %3600 = vmax.xlane.f32.xlu1 %v3599_v10  ;;  %v9797_v19 = vpop.f32.mrb[27].mxu1  ;;  %v3632_v54 = vsel %vm3595_vm9, %v9793_v26, -inf }
 0xff3   :  { %v7832_v27 = vpop.f32.mrb[22].mxu0  ;;  %v3629_v44 = vsel %vm3591_vm8, %v9797_v19, -inf }
 0xff4   :  { %v3207_v7 = vpop.f32.mrb[23].mxu0  ;;  %v3608_v11 = vsel %vm3595_vm9, %v7832_v27, -inf }
 0xff5   :  { %v3605_v1 = vsel %vm3591_vm8, %v3207_v7, -inf }
 0xff6   :  { %3603 = vmax.xlane.f32.xlu1 %v3602_v62  ;;  %3606 = vmax.xlane.f32.xlu0 %v3605_v1 }
 0xff7   :  { %v9801_v14 = vpop.f32.mrb[24].mxu0 }
 0xff8   :  { %v3282_v6 = vpop.f32.mrb[25].mxu0  ;;  %v3614_v39 = vsel %vm3595_vm9, %v9801_v14, -inf }
 0xff9   :  { %v3611_v48 = vsel %vm3591_vm8, %v3282_v6, -inf }
 0xffa   :  { %3609 = vmax.xlane.f32.xlu1 %v3608_v11  ;;  %3612 = vmax.xlane.f32.xlu0 %v3611_v48 }
 0xffb   :  { %v9805_v38 = vpop.f32.mrb[26].mxu0 }
 0xffc   :  { %v9807_v34 = vpop.f32.mrb[27].mxu0  ;;  %v3626_v51 = vsel %vm3595_vm9, %v9805_v38, -inf }
 0xffd   :  { %v3623_v37 = vsel %vm3591_vm8, %v9807_v34, -inf }
 0xffe   :  { %3615 = vmax.xlane.f32.xlu1 %v3614_v39  ;;  %3618 = vmax.xlane.f32.xlu0 %v3617_v43 }
 0xfff   :  { %v9813_v47 = vpop.f32.mrb[28].mxu0 }
0x1000   :  { %v9815_v41 = vpop.f32.mrb[29].mxu0  ;;  %v3638_v49 = vsel %vm3595_vm9, %v9813_v47, -inf }
0x1001   :  { %v3635_v46 = vsel %vm3591_vm8, %v9815_v41, -inf }
0x1002   :  { %3621 = vmax.xlane.f32.xlu1 %v3620_v15  ;;  %3624 = vmax.xlane.f32.xlu0 %v3623_v37 }
0x1006   :  { %3627 = vmax.xlane.f32.xlu1 %v3626_v51  ;;  %3630 = vmax.xlane.f32.xlu0 %v3629_v44 }
0x100a   :  { %3633 = vmax.xlane.f32.xlu1 %v3632_v54  ;;  %3636 = vmax.xlane.f32.xlu0 %v3635_v46 }
0x100e   :  { %3639 = vmax.xlane.f32.xlu1 %v3638_v49 }
0x107b   :  { %v3594_v30 = vpop.xlane.xlu0 %3593 }
0x107c   :  { %v3641_v50 = vsub.f32 %v3057_v3, %v3594_v30 }
0x107e   :  { %v3657_v52 = vmul.f32 1.442695, %v3641_v50 }
0x107f   :  { %v3598_v53 = vpop.xlane.xlu0 %3597  ;;  %v3601_v56 = vpop.xlane.xlu1 %3600 }
0x1080   :  { %8542 = vpow2.f32 %v3657_v52  ;;  %v3642_v59 = vsub.f32 %v7822_v63, %v3598_v53  ;;  %v3643_v8 = vsub.f32 %v3132_v24, %v3601_v56 }
0x1082   :  { %v3659_v28 = vmul.f32 1.442695, %v3642_v59  ;;  %v3661_v10 = vmul.f32 1.442695, %v3643_v8 }
0x1083   :  { %v3604_v62 = vpop.xlane.xlu1 %3603  ;;  %v3607_v1 = vpop.xlane.xlu0 %3606 }
0x1084   :  { %8544 = vpow2.f32 %v3659_v28  ;;  %v3644_v11 = vsub.f32 %v7827_v23, %v3604_v62  ;;  %v3645_v48 = vsub.f32 %v3207_v7, %v3607_v1 }
0x1085   :  { %8546 = vpow2.f32 %v3661_v10 }
0x1086   :  { %v3663_v39 = vmul.f32 1.442695, %v3644_v11  ;;  %v3665_v43 = vmul.f32 1.442695, %v3645_v48 }
0x1087   :  { %v3610_v15 = vpop.xlane.xlu1 %3609  ;;  %v3613_v37 = vpop.xlane.xlu0 %3612 }
0x1088   :  { %8548 = vpow2.f32 %v3663_v39  ;;  %v3646_v3 = vsub.f32 %v7832_v27, %v3610_v15  ;;  %v3647_v51 = vsub.f32 %v3282_v6, %v3613_v37 }
0x1089   :  { %8550 = vpow2.f32 %v3665_v43 }
0x108a   :  { %v9831_v44 = vpop.eup %8542  ;;  %v3667_v63 = vmul.f32 1.442695, %v3646_v3  ;;  %v3669_v24 = vmul.f32 1.442695, %v3647_v51 }
0x108b   :  { %v3616_v54 = vpop.xlane.xlu1 %3615  ;;  %v3619_v46 = vpop.xlane.xlu0 %3618  ;;  %v3689_v49 = vsel %vm3591_vm8, %v9831_v44, 0.0 }
0x108c   :  { %8552 = vpow2.f32 %v3667_v63  ;;  %v3648_v23 = vsub.f32 %v9801_v14, %v3616_v54  ;;  %v3649_v7 = vsub.f32 %v9791_v21, %v3619_v46  ;;  %3690 = vadd.xlane.f32.xlu0 %v3689_v49 }
0x108d   :  { %8554 = vpow2.f32 %v3669_v24 }
0x108e   :  { %v9837_v30 = vpop.eup %8544  ;;  %v3671_v27 = vmul.f32 1.442695, %v3648_v23  ;;  %v3673_v6 = vmul.f32 1.442695, %v3649_v7 }
0x108f   :  { %v9839_v50 = vpop.eup %8546  ;;  %v3622_v52 = vpop.xlane.xlu1 %3621  ;;  %v3692_v56 = vsel %vm3595_vm9, %v9837_v30, 0.0 }
0x1090   :  { %v3625_v53 = vpop.xlane.xlu0 %3624  ;;  %8556 = vpow2.f32 %v3671_v27  ;;  %v3650_v59 = vsub.f32 %v9788_v36, %v3622_v52  ;;  %3693 = vadd.xlane.f32.xlu1 %v3692_v56  ;;  %v3695_v21 = vsel %vm3591_vm8, %v9839_v50, 0.0 }
0x1091   :  { %v3651_v14 = vsub.f32 %v9807_v34, %v3625_v53  ;;  %8558 = vpow2.f32 %v3673_v6  ;;  %3696 = vadd.xlane.f32.xlu0 %v3695_v21 }
0x1092   :  { %v9847_v8 = vpop.eup %8548  ;;  %v3675_v28 = vmul.f32 1.442695, %v3650_v59 }
0x1093   :  { %v3677_v10 = vmul.f32 1.442695, %v3651_v14  ;;  %v9849_v62 = vpop.eup %8550  ;;  %v3628_v1 = vpop.xlane.xlu1 %3627  ;;  %v3698_v48 = vsel %vm3595_vm9, %v9847_v8, 0.0 }
0x1094   :  { %v3631_v11 = vpop.xlane.xlu0 %3630  ;;  %8560 = vpow2.f32 %v3675_v28  ;;  %v3652_v36 = vsub.f32 %v9805_v38, %v3628_v1  ;;  %3699 = vadd.xlane.f32.xlu1 %v3698_v48  ;;  %v3701_v39 = vsel %vm3591_vm8, %v9849_v62, 0.0 }
0x1095   :  { %v3653_v34 = vsub.f32 %v9797_v19, %v3631_v11  ;;  %8562 = vpow2.f32 %v3677_v10  ;;  %3702 = vadd.xlane.f32.xlu0 %v3701_v39 }
0x1096   :  { %v9857_v43 = vpop.eup %8552  ;;  %v3679_v15 = vmul.f32 1.442695, %v3652_v36 }
0x1097   :  { %v3681_v37 = vmul.f32 1.442695, %v3653_v34  ;;  %v9859_v3 = vpop.eup %8554  ;;  %v3634_v51 = vpop.xlane.xlu1 %3633  ;;  %v3704_v24 = vsel %vm3595_vm9, %v9857_v43, 0.0 }
0x1098   :  { %v3637_v63 = vpop.xlane.xlu0 %3636  ;;  %8564 = vpow2.f32 %v3679_v15  ;;  %v3654_v19 = vsub.f32 %v9793_v26, %v3634_v51  ;;  %3705 = vadd.xlane.f32.xlu1 %v3704_v24  ;;  %v3707_v54 = vsel %vm3591_vm8, %v9859_v3, 0.0 }
0x1099   :  { %v3655_v38 = vsub.f32 %v9815_v41, %v3637_v63  ;;  %8566 = vpow2.f32 %v3681_v37  ;;  %3708 = vadd.xlane.f32.xlu0 %v3707_v54 }
0x109a   :  { %v9867_v46 = vpop.eup %8556  ;;  %v3683_v49 = vmul.f32 1.442695, %v3654_v19 }
0x109b   :  { %v3685_v23 = vmul.f32 1.442695, %v3655_v38  ;;  %v9869_v7 = vpop.eup %8558  ;;  %v3640_v27 = vpop.xlane.xlu1 %3639  ;;  %v3710_v6 = vsel %vm3595_vm9, %v9867_v46, 0.0 }
0x109c   :  { %8568 = vpow2.f32 %v3683_v49  ;;  %v3656_v26 = vsub.f32 %v9813_v47, %v3640_v27  ;;  %3711 = vadd.xlane.f32.xlu1 %v3710_v6  ;;  %v3713_v41 = vsel %vm3591_vm8, %v9869_v7, 0.0 }
0x109d   :  { %8570 = vpow2.f32 %v3685_v23  ;;  %3714 = vadd.xlane.f32.xlu0 %v3713_v41 }
0x109e   :  { %v9876_v52 = vpop.eup %8560  ;;  %v3687_v53 = vmul.f32 1.442695, %v3656_v26 }
0x109f   :  { %v9878_v56 = vpop.eup %8562  ;;  %v3716_v59 = vsel %vm3595_vm9, %v9876_v52, 0.0 }
0x10a0   :  { %8572 = vpow2.f32 %v3687_v53  ;;  %3717 = vadd.xlane.f32.xlu1 %v3716_v59  ;;  %v3719_v14 = vsel %vm3591_vm8, %v9878_v56, 0.0 }
0x10a1   :  { %3720 = vadd.xlane.f32.xlu0 %v3719_v14 }
0x10a2   :  { %v9884_v47 = vpop.eup %8564 }
0x10a3   :  { %v9886_v21 = vpop.eup %8566  ;;  %v3722_v28 = vsel %vm3595_vm9, %v9884_v47, 0.0 }
0x10a4   :  { %3723 = vadd.xlane.f32.xlu1 %v3722_v28  ;;  %v3725_v10 = vsel %vm3591_vm8, %v9886_v21, 0.0 }
0x10a5   :  { %3726 = vadd.xlane.f32.xlu0 %v3725_v10 }
0x10a6   :  { %v9892_v1 = vpop.eup %8568 }
0x10a7   :  { %v9894_v11 = vpop.eup %8570  ;;  %v3728_v48 = vsel %vm3595_vm9, %v9892_v1, 0.0 }
0x10a8   :  { %3729 = vadd.xlane.f32.xlu1 %v3728_v48  ;;  %v3731_v36 = vsel %vm3591_vm8, %v9894_v11, 0.0 }
0x10a9   :  { %3732 = vadd.xlane.f32.xlu0 %v3731_v36 }
0x10aa   :  { %v9900_v34 = vpop.eup %8572 }
0x10ab   :  { %v3734_v39 = vsel %vm3595_vm9, %v9900_v34, 0.0 }
0x10ac   :  { %3735 = vadd.xlane.f32.xlu1 %v3734_v39 }
0x1119   :  { %v3691_v15 = vpop.xlane.xlu0 %3690 }
0x111a   :  { %8574 = vrcp.f32 %v3691_v15 }
0x111d   :  { %v3694_v37 = vpop.xlane.xlu1 %3693 }
0x111e   :  { %8576 = vrcp.f32 %v3694_v37  ;;  %v3697_v51 = vpop.xlane.xlu0 %3696 }
0x111f   :  { %8578 = vrcp.f32 %v3697_v51 }
0x1121   :  { %v3700_v63 = vpop.xlane.xlu1 %3699 }
0x1122   :  { %8580 = vrcp.f32 %v3700_v63  ;;  %v3703_v24 = vpop.xlane.xlu0 %3702 }
0x1123   :  { %8582 = vrcp.f32 %v3703_v24 }
0x1124   :  { %v8575_v19 = vpop.eup %8574 }
0x1125   :  { %v3706_v38 = vpop.xlane.xlu1 %3705  ;;  %v3753_v54 = vmul.f32 %v8575_v19, %v9831_v44 }
0x1126   :  { %8584 = vrcp.f32 %v3706_v38  ;;  %v3709_v49 = vpop.xlane.xlu0 %3708 }
0x1127   :  { %8586 = vrcp.f32 %v3709_v49  ;;  %7860 = vmatprep.mubr.msk.f32.mxu1 %vm3591_vm8, %v3753_v54 }
0x1128   :  { %v8577_v23 = vpop.eup %8576 }
0x1129   :  { %v8579_v27 = vpop.eup %8578  ;;  %v3754_v6 = vmul.f32 %v8577_v23, %v9837_v30  ;;  %v3712_v26 = vpop.xlane.xlu1 %3711  ;;  %v5449_v23 = vld [vmem:[%s10519_s5] sm:$0xff] }
0x112a   :  { %8588 = vrcp.f32 %v3712_v26  ;;  %v3715_v41 = vpop.xlane.xlu0 %3714  ;;  %v3755_v53 = vmul.f32 %v8579_v27, %v9839_v50  ;;  %v4425_v26 = vcombine.high %v9650_v58, %v9650_v58 }
0x112b   :  { %8590 = vrcp.f32 %v3715_v41  ;;  %7861 = vmatmul.mubr.msk.f32.vlgmr.msra.gmra.mrb[28].mxu1 %vm3591_vm8, %v3754_v6 }
0x112c   :  { %v8581_v59 = vpop.eup %8580  ;;  %7865 = vmatprep.mubr.msk.f32.mxu0 %vm3591_vm8, %v3755_v53  ;;  %7869 = vmatpush3.msra.mxu1 %v9234_v13  ;;  %v5451_v53 = vld [vmem:[%s10519_s5 + $0x10] sm:$0xff] }
0x112d   :  { %v8583_v44 = vpop.eup %8582  ;;  %v3756_v14 = vmul.f32 %v8581_v59, %v9847_v8  ;;  %7878 = vmatprep.subr.mxu1 %v9240_v16  ;;  %v3718_v28 = vpop.xlane.xlu1 %3717  ;;  %v5452_v59 = vld [vmem:[%s10519_s5 + $0x18] sm:$0xff] }
0x112e   :  { %8592 = vrcp.f32 %v3718_v28  ;;  %v3721_v30 = vpop.xlane.xlu0 %3720  ;;  %v3757_v10 = vmul.f32 %v8583_v44, %v9849_v62  ;;  %v5470_v28 = vld [vmem:[%s10518_s6 + $0x28] sm:$0xff] }
0x112f   :  { %8594 = vrcp.f32 %v3721_v30  ;;  %7866 = vmatmul.mubr.msk.f32.vlgmr.msra.gmra.mrb[30].mxu0 %vm3591_vm8, %v3756_v14  ;;  %v4432_v14 = vrot.slane %v9650_v58, %v8836_v40  ;;  %v4439_v30 = vrot.slane %v4425_v26, %v8836_v40  ;;  %v5453_v58 = vld [vmem:[%s10519_s5 + $0x20] sm:$0xff] }
0x1130   :  { %v8585_v50 = vpop.eup %8584  ;;  %7870 = vmatprep.mubr.msk.f32.mxu1 %vm3591_vm8, %v3757_v10  ;;  %7874 = vmatpush3.msra.mxu0 %v9247_v29  ;;  %v4488_v10 = vcombine.high %v9657_v9, %v9657_v9 }
0x1131   :  { %v8587_v48 = vpop.eup %8586  ;;  %v3758_v13 = vmul.f32 %v8585_v50, %v9857_v43  ;;  %7883 = vmatprep.subr.mxu0 %v9251_v22  ;;  %v3724_v8 = vpop.xlane.xlu1 %3723  ;;  %v8484_v50 = vpack.c.bf16 %v5452_v59, %v5451_v53 }
0x1132   :  { %8596 = vrcp.f32 %v3724_v8  ;;  %v3727_v36 = vpop.xlane.xlu0 %3726  ;;  %v3759_v39 = vmul.f32 %v8587_v48, %v9859_v3  ;;  %v5454_v48 = vld [vmem:[%s10519_s5 + $0x28] sm:$0xff]  ;;  %v4440_v8 = vcombine.high %v4432_v14, %v4432_v14 }
0x1133   :  { %8598 = vrcp.f32 %v3727_v36  ;;  %7871 = vmatmul.mubr.msk.f32.vlgmr.msra.gmra.mrb[30].mxu1 %vm3591_vm8, %v3758_v13  ;;  %v4495_v36 = vrot.slane %v9657_v9, %v8836_v40  ;;  %v4551_v9 = vcombine.high %v9667_v2, %v9667_v2 }
0x1134   :  { %v8589_v62 = vpop.eup %8588  ;;  %7875 = vmatprep.mubr.msk.f32.mxu0 %vm3591_vm8, %v3759_v39  ;;  %7879 = vmatpush3.msra.mxu1 %v9240_v16  ;;  %v4441_v39 = vcombine.high %v4439_v30, %v4439_v30 }
0x1135   :  { %v8591_v15 = vpop.eup %8590  ;;  %v3760_v29 = vmul.f32 %v8589_v62, %v9867_v46  ;;  %7888 = vmatprep.subr.mxu1 %v9255_v25  ;;  %v3730_v43 = vpop.xlane.xlu1 %3729  ;;  %v4502_v62 = vrot.slane %v4488_v10, %v8836_v40 }
0x1136   :  { %8600 = vrcp.f32 %v3730_v43  ;;  %v3733_v37 = vpop.xlane.xlu0 %3732  ;;  %v3761_v51 = vmul.f32 %v8591_v15, %v9869_v7  ;;  %v8487_v15 = vpack.c.bf16 %v5454_v48, %v5453_v58  ;;  %v5456_v43 = vld [vmem:[%s10519_s5 + $0x38] sm:$0xff]  ;;  %v4803_v58 = vcombine.high %v9661_v17, %v9661_v17 }
0x1137   :  { %8602 = vrcp.f32 %v3733_v37  ;;  %7876 = vmatmul.mubr.msk.f32.vlgmr.msra.gmra.mrb[32].mxu0 %vm3591_vm8, %v3760_v29  ;;  %v5455_v29 = vld [vmem:[%s10519_s5 + $0x30] sm:$0xff]  ;;  %v4462_v37 = vrot.slane %v4440_v8, %v8836_v40  ;;  %v4606_v48 = vrot.slane %v9744_v42, %v8836_v40  ;;  %v5462_v8 = vld [vmem:[%s10519_s5 + $0x68] sm:$0xff]  ;;  %v4740_v42 = vcombine.high %v9679_v20, %v9679_v20 }
0x1138   :  { %v8593_v3 = vpop.eup %8592  ;;  %7880 = vmatprep.mubr.msk.f32.mxu1 %vm3591_vm8, %v3761_v51  ;;  %7884 = vmatpush3.msra.mxu0 %v9251_v22  ;;  %v5465_v22 = vld [vmem:[%s10518_s6] sm:$0xff]  ;;  %v4503_v51 = vcombine.high %v4495_v36, %v4495_v36  ;;  %v5463_v20 = vld [vmem:[%s10519_s5 + $0x70] sm:$0xff] }
0x1139   :  { %v8595_v63 = vpop.eup %8594  ;;  %v3762_v16 = vmul.f32 %v8593_v3, %v9876_v52  ;;  %7893 = vmatprep.subr.mxu0 %v9261_v31  ;;  %v3736_v46 = vpop.xlane.xlu1 %3735  ;;  %v5466_v52 = vld [vmem:[%s10518_s6 + $0x8] sm:$0xff]  ;;  %v4448_v3 = vrot.slane %v4432_v14, %v8836_v40 }
0x113a   :  { %8604 = vrcp.f32 %v3736_v46  ;;  %v3763_v24 = vmul.f32 %v8595_v63, %v9878_v56  ;;  %v4469_v63 = vrot.slane %v4441_v39, %v8836_v40  ;;  %v8490_v46 = vpack.c.bf16 %v5456_v43, %v5455_v29 }
0x113b   :  { %7881 = vmatmul.mubr.msk.f32.vlgmr.msra.gmra.mrb[32].mxu1 %vm3591_vm8, %v3762_v16  ;;  %v4504_v16 = vcombine.high %v4502_v62, %v4502_v62 }
0x113c   :  { %v8597_v7 = vpop.eup %8596  ;;  %7885 = vmatprep.mubr.msk.f32.mxu0 %vm3591_vm8, %v3763_v24  ;;  %7889 = vmatpush3.msra.mxu1 %v9255_v25  ;;  %v8457_v25 = vpack.c.bf16 %v5466_v52, %v5465_v22  ;;  %v4455_v24 = vrot.slane %v4439_v30, %v8836_v40  ;;  %v6041_v22 = vcombine.low %v4448_v3, %v4462_v37 }
0x113d   :  { %v8599_v19 = vpop.eup %8598  ;;  %v3764_v38 = vmul.f32 %v8597_v7, %v9884_v47  ;;  %8456 = vmatprep.subr.bf16.mxu1 %v8642_v0  ;;  %v4480_v7 = vrot.slane %v9708_v57, %v8836_v40  ;;  %v4511_v52 = vrot.slane %v4495_v36, %v8836_v40  ;;  %v4518_v57 = vrot.slane %v4502_v62, %v8836_v40 }
0x113e   :  { %v3765_v56 = vmul.f32 %v8599_v19, %v9886_v21  ;;  %v5450_v21 = vld [vmem:[%s10519_s5 + $0x8] sm:$0xff]  ;;  %v5457_v19 = vld [vmem:[%s10519_s5 + $0x40] sm:$0xff]  ;;  %v6051_v26 = vrot.slane %v6041_v22, %v8836_v40 }
0x113f   :  { %7886 = vmatmul.mubr.msk.f32.vlgmr.msra.gmra.mrb[34].mxu0 %vm3591_vm8, %v3764_v38  ;;  %v8481_v41 = vpack.c.bf16 %v5450_v21, %v5449_v23  ;;  %v5458_v38 = vld [vmem:[%s10519_s5 + $0x48] sm:$0xff]  ;;  %v6043_v23 = vcombine.low %v4455_v24, %v4469_v63  ;;  %v6760_v21 = vcombine.high %v4455_v24, %v4469_v63  ;;  %v4613_v24 = vrot.slane %v4606_v48, %v8836_v40 }
0x1140   :  { %v8601_v54 = vpop.eup %8600  ;;  %7890 = vmatprep.mubr.msk.f32.mxu1 %vm3591_vm8, %v3765_v56  ;;  %7894 = vmatpush3.msra.mxu0 %v9261_v31  ;;  %v5467_v31 = vld [vmem:[%s10518_s6 + $0x10] sm:$0xff]  ;;  %v4558_v56 = vrot.slane %v9667_v2, %v8836_v40  ;;  %v4543_v2 = vrot.slane %v9720_v12, %v8836_v40 }
0x1141   :  { %v8603_v47 = vpop.eup %8602  ;;  %v3766_v49 = vmul.f32 %v8601_v54, %v9892_v1  ;;  %8480 = vmatprep.subr.bf16.mxu0 %v8642_v0  ;;  %v5468_v1 = vld [vmem:[%s10518_s6 + $0x18] sm:$0xff]  ;;  %v4565_v54 = vrot.slane %v4551_v9, %v8836_v40 }
0x1142   :  { %v3767_v27 = vmul.f32 %v8603_v47, %v9894_v11  ;;  %v8460_v44 = vpack.c.bf16 %v5468_v1, %v5467_v31  ;;  %v4525_v47 = vrot.slane %v4503_v51, %v8836_v40  ;;  %v8493_v31 = vpack.c.bf16 %v5458_v38, %v5457_v19 }
0x1143   :  { %7891 = vmatmul.mubr.msk.f32.vlgmr.msra.gmra.mrb[34].mxu1 %vm3591_vm8, %v3766_v49  ;;  %v4621_v49 = vrot.slane %v9675_v32, %v8836_v40  ;;  %v4487_v1 = vrot.slane %v4480_v7, %v8836_v40  ;;  %v5460_v32 = vld [vmem:[%s10519_s5 + $0x58] sm:$0xff]  ;;  %v4567_v53 = vcombine.high %v4565_v54, %v4565_v54  ;;  %v4550_v36 = vrot.slane %v4543_v2, %v8836_v40 }
0x1144   :  { %v8605_v6 = vpop.eup %8604  ;;  %7895 = vmatprep.mubr.msk.f32.mxu0 %vm3591_vm8, %v3767_v27  ;;  %8458 = vmatpush3.bf16.msra.mxu1 %v8457_v25  ;;  %v6759_v25 = vcombine.high %v4448_v3, %v4462_v37  ;;  %v4532_v27 = vrot.slane %v4504_v16, %v8836_v40  ;;  %v4535_v14 = vcombine.high %v4525_v47, %v4525_v47  ;;  %v5464_v7 = vld [vmem:[%s10519_s5 + $0x78] sm:$0xff] }
0x1145   :  { %v3768_v11 = vmul.f32 %v8605_v6, %v9900_v34  ;;  %8459 = vmatprep.subr.bf16.mxu1 %v8642_v0  ;;  %7930 = vmatprep.mubr.msk.f32.mxu1 %vm8643_vm0, %v8644_v4  ;;  %v5469_v34 = vld [vmem:[%s10518_s6 + $0x20] sm:$0xff]  ;;  %v5459_v6 = vld [vmem:[%s10519_s5 + $0x50] sm:$0xff]  ;;  %v4629_v12 = vcombine.high %v4621_v49, %v4621_v49  ;;  %v4574_v43 = vrot.slane %v4558_v56, %v8836_v40 }
0x1146   :  { %v8463_v13 = vpack.c.bf16 %v5470_v28, %v5469_v34  ;;  %v6058_v59 = vrot.slane %v6759_v25, %v8836_v40  ;;  %v6065_v34 = vrot.slane %v6043_v23, %v8836_v40  ;;  %v6072_v28 = vrot.slane %v6760_v21, %v8836_v40 }
0x1147   :  { %7896 = vmatmul.mubr.msk.f32.vlgmr.msra.gmra.mrb[36].mxu0 %vm3591_vm8, %v3768_v11  ;;  %v4566_v11 = vcombine.high %v4558_v56, %v4558_v56  ;;  %v4536_v30 = vcombine.high %v4532_v27, %v4532_v27  ;;  %v8496_v10 = vpack.c.bf16 %v5460_v32, %v5459_v6  ;;  %v6092_v29 = vcombine.low %v4535_v14, %v4518_v57 }
0x1148   :  { %8482 = vmatpush3.bf16.msra.mxu0 %v8481_v41  ;;  %7989 = vmatprep.mubr.msk.f32.mxu0 %vm8643_vm0, %v8644_v4  ;;  %v4533_v41 = vcombine.high %v4511_v52, %v4511_v52  ;;  %v4651_v37 = vrot.slane %v4629_v12, %v8836_v40  ;;  %v4581_v51 = vrot.slane %v4565_v54, %v8836_v40 }
0x1149   :  { %8483 = vmatprep.subr.bf16.mxu0 %v8642_v0  ;;  %8461 = vmatpush3.bf16.msra.mxu1 %v8460_v44  ;;  %v4534_v44 = vcombine.high %v4518_v57, %v4518_v57  ;;  %v4588_v62 = vrot.slane %v4566_v11, %v8836_v40  ;;  %v4637_v3 = vrot.slane %v4621_v49, %v8836_v40 }
0x114a   :  { %8462 = vmatprep.subr.bf16.mxu1 %v8642_v0  ;;  %v6091_v39 = vcombine.low %v4525_v47, %v4533_v41  ;;  %v6074_v16 = vcombine.low %v6065_v34, %v6072_v28  ;;  %v6139_v38 = vcombine.low %v4536_v30, %v4550_v36  ;;  %v6073_v56 = vcombine.low %v6051_v26, %v6058_v59 }
0x114b   :  { %v6093_v9 = vcombine.low %v4532_v27, %v4534_v44  ;;  %v6140_v22 = vcombine.low %v4574_v43, %v4588_v62  ;;  %v4661_v54 = vcombine.high %v4651_v37, %v4651_v37  ;;  %v6114_v57 = vrot.slane %v6092_v29, %v8836_v40 }
0x114c   :  { %8485 = vmatpush3.bf16.msra.mxu0 %v8484_v50  ;;  %v6090_v50 = vcombine.low %v4487_v1, %v4511_v52  ;;  %v6107_v25 = vrot.slane %v6091_v39, %v8836_v40  ;;  %v6761_v49 = vcombine.high %v4574_v43, %v4588_v62  ;;  %v4659_v23 = vcombine.high %v4637_v3, %v4637_v3 }
0x114d   :  { %8486 = vmatprep.subr.bf16.mxu0 %v8642_v0  ;;  %8464 = vmatpush3.bf16.msra.mxu1 %v8463_v13  ;;  %v5461_v13 = vld [vmem:[%s10519_s5 + $0x60] sm:$0xff]  ;;  %v6121_v47 = vrot.slane %v6093_v9, %v8836_v40  ;;  %v8502_v21 = vpack.c.bf16 %v5464_v7, %v5463_v20  ;;  %v6088_v27 = vrot.slane %v6074_v16, %v8836_v40 }
0x114e   :  { %8465 = vmatprep.subr.bf16.mxu1 %v8642_v0  ;;  %v8499_v63 = vpack.c.bf16 %v5462_v8, %v5461_v13  ;;  %v6100_v19 = vrot.slane %v6090_v50, %v8836_v40  ;;  %v6189_v1 = vcombine.low %v4613_v24, %v4637_v3  ;;  %v6149_v6 = vrot.slane %v6139_v38, %v8836_v40 }
0x114f   :  { %v4866_v41 = vcombine.high %v9688_v33, %v9688_v33  ;;  %v6081_v11 = vrot.slane %v6073_v56, %v8836_v40  ;;  %v6123_v59 = vcombine.low %v6114_v57, %v6121_v47  ;;  %v6156_v44 = vrot.slane %v6140_v22, %v8836_v40 }
0x1150   :  { %8488 = vmatpush3.bf16.msra.mxu0 %v8487_v15  ;;  %v4595_v15 = vrot.slane %v4567_v53, %v8836_v40  ;;  %v6122_v2 = vcombine.low %v6100_v19, %v6107_v25  ;;  %v6191_v53 = vcombine.low %v4661_v54, %v9704_v55  ;;  %v6190_v34 = vcombine.low %v4651_v37, %v4659_v23 }
0x1151   :  { %8489 = vmatprep.subr.bf16.mxu0 %v8642_v0  ;;  %v6089_v28 = vcombine.low %v6081_v11, %v6088_v27  ;;  %v6163_v30 = vrot.slane %v6761_v49, %v8836_v40  ;;  %v6205_v55 = vrot.slane %v6189_v1, %v8836_v40  ;;  %v4873_v8 = vrot.slane %v9688_v33, %v8836_v40 }
0x1152   :  { %v6142_v52 = vcombine.low %v4581_v51, %v4595_v15  ;;  %v6762_v32 = vcombine.high %v4581_v51, %v4595_v15  ;;  %v6130_v50 = vrot.slane %v6122_v2, %v8836_v40  ;;  %v4880_v36 = vrot.slane %v4866_v41, %v8836_v40 }
0x1153   :  { %v6137_v39 = vrot.slane %v6123_v59, %v8836_v40  ;;  %v6219_v15 = vrot.slane %v6191_v53, %v8836_v40  ;;  %v4858_v29 = vrot.slane %v9734_v60, %v8836_v40  ;;  %v6212_v33 = vrot.slane %v6190_v34, %v8836_v40 }
0x1154   :  { %8491 = vmatpush3.bf16.msra.mxu0 %v8490_v46  ;;  %v10069_v46 = vrot.slane %v9661_v17, %v8836_v40  ;;  %v4754_v17 = vrot.slane %v4740_v42, %v8836_v40  ;;  %v6170_v14 = vrot.slane %v6142_v52, %v8836_v40  ;;  %v4787_v16 = vcombine.high %v9723_v18, %v9723_v18 }
0x1155   :  { %8492 = vmatprep.subr.bf16.mxu0 %v8642_v0  ;;  %v6138_v43 = vcombine.low %v6130_v50, %v6137_v39  ;;  %v4881_v24 = vcombine.high %v4873_v8, %v4873_v8  ;;  %v4882_v60 = vcombine.high %v4880_v36, %v4880_v36  ;;  %v6221_v19 = vcombine.low %v6212_v33, %v6219_v15 }
0x1156   :  { %v4756_v26 = vcombine.high %v4754_v17, %v4754_v17  ;;  %v4818_v12 = vcombine.high %v10069_v46, %v10069_v46  ;;  %v4770_v48 = vrot.slane %v4754_v17, %v8836_v40  ;;  %v6172_v62 = vcombine.low %v6163_v30, %v6170_v14 }
0x1157   :  { %v4826_v38 = vrot.slane %v10069_v46, %v8836_v40  ;;  %v4865_v52 = vrot.slane %v4858_v29, %v8836_v40  ;;  %v4921_v18 = vrot.slane %v9783_v5, %v8836_v40  ;;  %v4896_v47 = vrot.slane %v4880_v36, %v8836_v40 }
0x1158   :  { %8494 = vmatpush3.bf16.msra.mxu0 %v8493_v31  ;;  %v10086_v31 = vrot.slane %v4803_v58, %v8836_v40  ;;  %v6171_v58 = vcombine.low %v6149_v6, %v6156_v44  ;;  %v4784_v13 = vrot.slane %v4756_v26, %v8836_v40  ;;  %v4840_v3 = vrot.slane %v4818_v12, %v8836_v40 }
0x1159   :  { %8495 = vmatprep.subr.bf16.mxu0 %v8642_v0  ;;  %v6186_v7 = vrot.slane %v6172_v62, %v8836_v40  ;;  %v6335_v57 = vcombine.low %v4787_v16, %v4770_v48  ;;  %v4903_v46 = vrot.slane %v4881_v24, %v8836_v40  ;;  %v4889_v49 = vrot.slane %v4873_v8, %v8836_v40 }
0x115a   :  { %v4819_v42 = vcombine.high %v10086_v31, %v10086_v31  ;;  %v6179_v37 = vrot.slane %v6171_v58, %v8836_v40  ;;  %v4788_v20 = vcombine.high %v4784_v13, %v4784_v13  ;;  %v6338_v25 = vcombine.low %v4826_v38, %v4840_v3 }
0x115b   :  { %v4910_v23 = vrot.slane %v4882_v60, %v8836_v40  ;;  %v4833_v5 = vrot.slane %v10086_v31, %v8836_v40  ;;  %v6387_v1 = vcombine.low %v4865_v52, %v4889_v49  ;;  %v4928_v2 = vrot.slane %v4921_v18, %v8836_v40  ;;  %v5472_v60 = vld [vmem:[%s10518_s6 + $0x38] sm:$0xff]  ;;  %v5475_v52 = vld [vmem:[%s10518_s6 + $0x50] sm:$0xff] }
0x115c   :  { %8497 = vmatpush3.bf16.msra.mxu0 %v8496_v10  ;;  %v4795_v10 = vrot.slane %v9767_v45, %v8836_v40  ;;  %v6198_v45 = vrot.slane %v6762_v32, %v8836_v40  ;;  %v4847_v22 = vrot.slane %v4819_v42, %v8836_v40  ;;  %v6187_v17 = vcombine.low %v6179_v37, %v6186_v7  ;;  %v5476_v18 = vld [vmem:[%s10518_s6 + $0x58] sm:$0xff] }
0x115d   :  { %8498 = vmatprep.subr.bf16.mxu0 %v8642_v0  ;;  %v4912_v11 = vcombine.high %v4896_v47, %v4896_v47  ;;  %v4913_v53 = vcombine.high %v4903_v46, %v4903_v46  ;;  %v4914_v59 = vcombine.high %v4910_v23, %v4910_v23  ;;  %v6345_v44 = vrot.slane %v6335_v57, %v8836_v40  ;;  %v5479_v57 = vld [vmem:[%s10518_s6 + $0x70] sm:$0xff] }
0x115e   :  { %v6220_v9 = vcombine.low %v6198_v45, %v6205_v55  ;;  %v4802_v51 = vrot.slane %v4795_v10, %v8836_v40  ;;  %v6385_v26 = vcombine.low %v4833_v5, %v4847_v22  ;;  %v6766_v41 = vcombine.high %v4833_v5, %v4847_v22 }
0x115f   :  { %v6366_v31 = vrot.slane %v6338_v25, %v8836_v40  ;;  %v4911_v12 = vcombine.high %v4889_v49, %v4889_v49  ;;  %v6765_v34 = vcombine.high %v4826_v38, %v4840_v3  ;;  %v6415_v30 = vrot.slane %v6387_v1, %v8836_v40  ;;  %v5474_v38 = vld [vmem:[%s10518_s6 + $0x48] sm:$0xff] }
0x1160   :  { %8500 = vmatpush3.bf16.msra.mxu0 %v8499_v63  ;;  %v4786_v63 = vcombine.high %v4770_v48, %v4770_v48  ;;  %v6228_v56 = vrot.slane %v6220_v9, %v8836_v40  ;;  %v6337_v54 = vcombine.low %v4788_v20, %v4802_v51  ;;  %v6436_v10 = vcombine.low %v4914_v59, %v4928_v2  ;;  %v5471_v20 = vld [vmem:[%s10518_s6 + $0x30] sm:$0xff] }
0x1161   :  { %8501 = vmatprep.subr.bf16.mxu0 %v8642_v0  ;;  %v6434_v50 = vcombine.low %v4913_v53, %v4896_v47  ;;  %v6401_v55 = vrot.slane %v6385_v26, %v8836_v40  ;;  %v6408_v48 = vrot.slane %v6766_v41, %v8836_v40  ;;  %v6433_v8 = vcombine.low %v4903_v46, %v4911_v12  ;;  %v5480_v47 = vld [vmem:[%s10518_s6 + $0x78] sm:$0xff] }
0x1162   :  { %v6336_v27 = vcombine.low %v4784_v13, %v4786_v63  ;;  %v6359_v32 = vrot.slane %v6337_v54, %v8836_v40  ;;  %v6435_v13 = vcombine.low %v4910_v23, %v4912_v11  ;;  %v6394_v39 = vrot.slane %v6765_v34, %v8836_v40  ;;  %v5478_v54 = vld [vmem:[%s10518_s6 + $0x68] sm:$0xff] }
0x1163   :  { %v6417_v62 = vcombine.low %v6408_v48, %v6415_v30  ;;  %v6464_v45 = vrot.slane %v6436_v10, %v8836_v40  ;;  %v6450_v42 = vrot.slane %v6434_v50, %v8836_v40  ;;  %v6443_v37 = vrot.slane %v6433_v8, %v8836_v40 }
0x1164   :  { %8503 = vmatpush3.bf16.msra.mxu0 %v8502_v21  ;;  %v6235_v21 = vrot.slane %v6221_v19, %v8836_v40  ;;  %v6352_v14 = vrot.slane %v6336_v27, %v8836_v40  ;;  %v6416_v15 = vcombine.low %v6394_v39, %v6401_v55  ;;  %v6457_v29 = vrot.slane %v6435_v13, %v8836_v40  ;;  %v5473_v19 = vld [vmem:[%s10518_s6 + $0x40] sm:$0xff] }
0x1165   :  { %v8466_v7 = vpack.c.bf16 %v5472_v60, %v5471_v20  ;;  %v8469_v22 = vpack.c.bf16 %v5474_v38, %v5473_v19  ;;  %v8478_v46 = vpack.c.bf16 %v5480_v47, %v5479_v57 }
0x1166   :  { %v6236_v6 = vcombine.low %v6228_v56, %v6235_v21  ;;  %v6367_v58 = vcombine.low %v6345_v44, %v6352_v14  ;;  %v6466_v9 = vcombine.low %v6457_v29, %v6464_v45  ;;  %v6424_v51 = vrot.slane %v6416_v15, %v8836_v40  ;;  %v5477_v56 = vld [vmem:[%s10518_s6 + $0x60] sm:$0xff] }
0x1167   :  { %7990 = vmatmul.mubr.f32.vlgmr.msra.gmra.mrb[38].mxu0 %v6089_v28  ;;  %v6368_v28 = vcombine.low %v6359_v32, %v6366_v31  ;;  %8467 = vmatpush3.bf16.msra.mxu1 %v8466_v7  ;;  %v8475_v25 = vpack.c.bf16 %v5478_v54, %v5477_v56 }
0x1168   :  { %7992 = vmatprep.mubr.msk.f32.mxu0 %vm8643_vm0, %v8644_v4  ;;  %v6480_v63 = vrot.slane %v6466_v9, %v8836_v40  ;;  %8468 = vmatprep.subr.bf16.mxu1 %v8642_v0 }
0x1169   :  { %v6382_v36 = vrot.slane %v6368_v28, %v8836_v40 }
0x116b   :  { %7993 = vmatmul.mubr.f32.gmra.mrb[40].mxu0 %v6138_v43  ;;  %v6431_v43 = vrot.slane %v6417_v62, %v8836_v40  ;;  %8470 = vmatpush3.bf16.msra.mxu1 %v8469_v22 }
0x116c   :  { %7995 = vmatprep.mubr.msk.f32.mxu0 %vm8643_vm0, %v8644_v4  ;;  %8471 = vmatprep.subr.bf16.mxu1 %v8642_v0 }
0x116d   :  { %v6432_v3 = vcombine.low %v6424_v51, %v6431_v43 }
0x116f   :  { %7996 = vmatmul.mubr.f32.gmra.mrb[42].mxu0 %v6187_v17  ;;  %v8472_v17 = vpack.c.bf16 %v5476_v18, %v5475_v52 }
0x1170   :  { %7998 = vmatprep.mubr.msk.f32.mxu0 %vm8643_vm0, %v8644_v4 }
0x1171   :  { %8473 = vmatpush3.bf16.msra.mxu1 %v8472_v17 }
0x1172   :  { %8474 = vmatprep.subr.bf16.mxu1 %v8642_v0 }
0x1173   :  { %7999 = vmatmul.mubr.f32.gmra.mrb[44].mxu0 %v6236_v6 }
0x1174   :  { %8001 = vmatprep.mubr.msk.f32.mxu0 %vm8643_vm0, %v8644_v4 }
0x1175   :  { %8476 = vmatpush3.bf16.msra.mxu1 %v8475_v25 }
0x1176   :  { %8477 = vmatprep.subr.bf16.mxu1 %v8642_v0 }
0x1177   :  { %8002 = vmatmul.mubr.f32.gmra.mrb[46].mxu0 %v9778_v35  ;;  %v6375_v35 = vrot.slane %v6367_v58, %v8836_v40 }
0x1178   :  { %8004 = vmatprep.mubr.msk.f32.mxu0 %vm8643_vm0, %v8644_v4 }
0x1179   :  { %v6383_v33 = vcombine.low %v6375_v35, %v6382_v36  ;;  %8479 = vmatpush3.bf16.msra.mxu1 %v8478_v46 }
0x117b   :  { %8005 = vmatmul.mubr.f32.gmra.mrb[48].mxu0 %v9774_v61  ;;  %v6465_v61 = vcombine.low %v6443_v37, %v6450_v42 }
0x117c   :  { %8007 = vmatprep.mubr.msk.f32.mxu0 %vm8643_vm0, %v8644_v4 }
0x117d   :  { %v6473_v16 = vrot.slane %v6465_v61, %v8836_v40 }
0x117f   :  { %8008 = vmatmul.mubr.f32.gmra.mrb[50].mxu0 %v6383_v33  ;;  %v6481_v24 = vcombine.low %v6473_v16, %v6480_v63 }
0x1180   :  { %8010 = vmatprep.mubr.msk.f32.mxu0 %vm8643_vm0, %v8644_v4 }
0x1183   :  { %8011 = vmatmul.mubr.f32.gmra.mrb[52].mxu0 %v6432_v3 }
0x1184   :  { %8013 = vmatprep.mubr.msk.f32.mxu0 %vm8643_vm0, %v8644_v4 }
0x1187   :  { %8014 = vmatmul.mubr.f32.gmra.mrb[54].mxu0 %v6481_v24 }
0x11fe   :  { %v7862_v49 = vpop.f32.mrb[28].mxu1 }
0x11ff   :  { %v3841_v23 = vpop.f32.mrb[29].mxu1  ;;  %v5000_v5 = vrot.slane %v7862_v49, %v8836_v40 }
0x1200   :  { %v4945_v21 = vcombine.high %v3841_v23, %v3841_v23  ;;  %v4952_v27 = vrot.slane %v3841_v23, %v8836_v40 }
0x1201   :  { %v5007_v59 = vrot.slane %v5000_v5, %v8836_v40 }
0x1202   :  { %v4959_v1 = vrot.slane %v4945_v21, %v8836_v40  ;;  %v4960_v0 = vcombine.high %v4952_v27, %v4952_v27  ;;  %v7867_v2 = vpop.f32.mrb[30].mxu0  ;;  %v4968_v41 = vrot.slane %v4952_v27, %v8836_v40 }
0x1203   :  { %v5063_v6 = vrot.slane %v7867_v2, %v8836_v40  ;;  %v3922_v32 = vpop.f32.mrb[31].mxu0 }
0x1204   :  { %v4961_v26 = vcombine.high %v4959_v1, %v4959_v1  ;;  %v4982_v11 = vrot.slane %v4960_v0, %v8836_v40  ;;  %v5008_v53 = vcombine.high %v3922_v32, %v3922_v32  ;;  %v4975_v44 = vrot.slane %v4959_v1, %v8836_v40 }
0x1205   :  { %v5015_v14 = vrot.slane %v3922_v32, %v8836_v40  ;;  %v5070_v10 = vrot.slane %v5063_v6, %v8836_v40 }
0x1206   :  { %v4989_v31 = vrot.slane %v4961_v26, %v8836_v40  ;;  %v5481_v12 = vcombine.low %v4968_v41, %v4982_v11  ;;  %v6751_v34 = vcombine.high %v4968_v41, %v4982_v11  ;;  %v5022_v28 = vrot.slane %v5008_v53, %v8836_v40  ;;  %v7872_v30 = vpop.f32.mrb[30].mxu1 }
0x1207   :  { %v5023_v50 = vcombine.high %v5015_v14, %v5015_v14  ;;  %v5031_v58 = vrot.slane %v5015_v14, %v8836_v40  ;;  %v5126_v55 = vrot.slane %v7872_v30, %v8836_v40  ;;  %v4003_v48 = vpop.f32.mrb[31].mxu1 }
0x1208   :  { %v5483_v13 = vcombine.low %v4975_v44, %v4989_v31  ;;  %v6752_v8 = vcombine.high %v4975_v44, %v4989_v31  ;;  %v10222_v36 = vrot.slane %v5481_v12, %v8836_v40  ;;  %v10225_v39 = vrot.slane %v6751_v34, %v8836_v40 }
0x1209   :  { %v5024_v62 = vcombine.high %v5022_v28, %v5022_v28  ;;  %v5038_v45 = vrot.slane %v5022_v28, %v8836_v40  ;;  %v5045_v35 = vrot.slane %v5023_v50, %v8836_v40  ;;  %v5053_v15 = vcombine.high %v5031_v58, %v5031_v58 }
0x120a   :  { %v10230_v42 = vrot.slane %v5483_v13, %v8836_v40  ;;  %v10233_v29 = vrot.slane %v6752_v8, %v8836_v40  ;;  %v5513_v33 = vcombine.low %v10222_v36, %v10225_v39  ;;  %v5530_v43 = vcombine.low %v5007_v59, %v5031_v58  ;;  %v7877_v37 = vpop.f32.mrb[32].mxu0 }
0x120b   :  { %v5052_v9 = vrot.slane %v5024_v62, %v8836_v40  ;;  %v5054_v51 = vcombine.high %v5038_v45, %v5038_v45  ;;  %v5055_v61 = vcombine.high %v5045_v35, %v5045_v35  ;;  %v10238_v3 = vcombine.low %v5045_v35, %v5053_v15  ;;  %v4084_v63 = vpop.f32.mrb[33].mxu0 }
0x120c   :  { %v10241_v16 = vrot.slane %v5530_v43, %v8836_v40  ;;  %v5133_v24 = vrot.slane %v5126_v55, %v8836_v40  ;;  %v5071_v20 = vcombine.high %v4003_v48, %v4003_v48  ;;  %v5078_v60 = vrot.slane %v4003_v48, %v8836_v40 }
0x120d   :  { %v5056_v7 = vcombine.high %v5052_v9, %v5052_v9  ;;  %v10245_v19 = vcombine.low %v5055_v61, %v5038_v45  ;;  %v10247_v38 = vcombine.low %v5052_v9, %v5054_v51  ;;  %v5547_v22 = vrot.slane %v10238_v3, %v8836_v40 }
0x120e   :  { %v5085_v52 = vrot.slane %v5071_v20, %v8836_v40  ;;  %v5086_v18 = vcombine.high %v5078_v60, %v5078_v60  ;;  %v5094_v17 = vrot.slane %v5078_v60, %v8836_v40  ;;  %v5189_v56 = vrot.slane %v7877_v37, %v8836_v40  ;;  %v7882_v54 = vpop.f32.mrb[32].mxu1 }
0x120f   :  { %v5554_v25 = vrot.slane %v10245_v19, %v8836_v40  ;;  %v10256_v57 = vcombine.low %v5056_v7, %v5070_v10  ;;  %v5134_v47 = vcombine.high %v4084_v63, %v4084_v63  ;;  %v5141_v46 = vrot.slane %v4084_v63, %v8836_v40  ;;  %v4165_v49 = vpop.f32.mrb[33].mxu1 }
0x1210   :  { %v5087_v23 = vcombine.high %v5085_v52, %v5085_v52  ;;  %v5101_v21 = vrot.slane %v5085_v52, %v8836_v40  ;;  %v5108_v27 = vrot.slane %v5086_v18, %v8836_v40  ;;  %v5196_v5 = vrot.slane %v5189_v56, %v8836_v40 }
0x1211   :  { %v5148_v1 = vrot.slane %v5134_v47, %v8836_v40  ;;  %v5149_v0 = vcombine.high %v5141_v46, %v5141_v46  ;;  %v5157_v2 = vrot.slane %v5141_v46, %v8836_v40  ;;  %v5252_v6 = vrot.slane %v7882_v54, %v8836_v40 }
0x1212   :  { %v5115_v32 = vrot.slane %v5087_v23, %v8836_v40  ;;  %v5580_v26 = vcombine.low %v5094_v17, %v5108_v27  ;;  %v6753_v41 = vcombine.high %v5094_v17, %v5108_v27  ;;  %v5197_v11 = vcombine.high %v4165_v49, %v4165_v49  ;;  %v7887_v53 = vpop.f32.mrb[34].mxu0 }
0x1213   :  { %v5150_v59 = vcombine.high %v5148_v1, %v5148_v1  ;;  %v5164_v44 = vrot.slane %v5148_v1, %v8836_v40  ;;  %v5171_v14 = vrot.slane %v5149_v0, %v8836_v40  ;;  %v5179_v31 = vcombine.high %v5157_v2, %v5157_v2  ;;  %v4246_v12 = vpop.f32.mrb[35].mxu0 }
0x1214   :  { %v5582_v34 = vcombine.low %v5101_v21, %v5115_v32  ;;  %v10269_v28 = vrot.slane %v5580_v26, %v8836_v40  ;;  %v10272_v30 = vrot.slane %v6753_v41, %v8836_v40  ;;  %v6754_v10 = vcombine.high %v5101_v21, %v5115_v32 }
0x1215   :  { %v5178_v50 = vrot.slane %v5150_v59, %v8836_v40  ;;  %v5180_v58 = vcombine.high %v5164_v44, %v5164_v44  ;;  %v5181_v55 = vcombine.high %v5171_v14, %v5171_v14  ;;  %v5629_v48 = vcombine.low %v5133_v24, %v5157_v2 }
0x1216   :  { %v10276_v13 = vrot.slane %v5582_v34, %v8836_v40  ;;  %v10279_v8 = vrot.slane %v6754_v10, %v8836_v40  ;;  %v10281_v62 = vcombine.low %v5171_v14, %v5179_v31  ;;  %v5259_v45 = vrot.slane %v5252_v6, %v8836_v40  ;;  %v7892_v35 = vpop.f32.mrb[34].mxu1 }
0x1217   :  { %v5182_v15 = vcombine.high %v5178_v50, %v5178_v50  ;;  %v10284_v43 = vcombine.low %v5181_v55, %v5164_v44  ;;  %v10287_v37 = vrot.slane %v5629_v48, %v8836_v40  ;;  %v10289_v9 = vcombine.low %v5178_v50, %v5180_v58  ;;  %v10291_v51 = vpop.f32.mrb[35].mxu1 }
0x1218   :  { %v5652_v61 = vrot.slane %v10281_v62, %v8836_v40  ;;  %v5204_v63 = vrot.slane %v4165_v49, %v8836_v40  ;;  %v5211_v24 = vrot.slane %v5197_v11, %v8836_v40  ;;  %v5315_v20 = vrot.slane %v7887_v53, %v8836_v40 }
0x1219   :  { %v5659_v60 = vrot.slane %v10284_v43, %v8836_v40  ;;  %v10300_v7 = vcombine.low %v5182_v15, %v5196_v5  ;;  %v5514_v52 = vcombine.low %v10230_v42, %v10233_v29  ;;  %v5521_v18 = vrot.slane %v5513_v33, %v8836_v40 }
0x121a   :  { %v5212_v17 = vcombine.high %v5204_v63, %v5204_v63  ;;  %v5213_v56 = vcombine.high %v5211_v24, %v5211_v24  ;;  %v5220_v54 = vrot.slane %v5204_v63, %v8836_v40  ;;  %v5227_v47 = vrot.slane %v5211_v24, %v8836_v40  ;;  %v7897_v46 = vpop.f32.mrb[36].mxu0 }
0x121b   :  { %v5322_v49 = vrot.slane %v5315_v20, %v8836_v40  ;;  %v5528_v23 = vrot.slane %v5514_v52, %v8836_v40  ;;  %v5260_v21 = vcombine.high %v4246_v12, %v4246_v12  ;;  %v5267_v27 = vrot.slane %v4246_v12, %v8836_v40  ;;  %v4408_v42 = vpop.f32.mrb[37].mxu0 }
0x121c   :  { %v5234_v29 = vrot.slane %v5212_v17, %v8836_v40  ;;  %v5241_v36 = vrot.slane %v5213_v56, %v8836_v40  ;;  %v5378_v39 = vrot.slane %v7892_v35, %v8836_v40  ;;  %v5561_v33 = vrot.slane %v10247_v38, %v8836_v40 }
0x121d   :  { %v5529_v5 = vcombine.low %v5521_v18, %v5528_v23  ;;  %v5274_v1 = vrot.slane %v5260_v21, %v8836_v40  ;;  %v5275_v0 = vcombine.high %v5267_v27, %v5267_v27  ;;  %v5283_v2 = vrot.slane %v5267_v27, %v8836_v40 }
0x121e   :  { %v5679_v6 = vcombine.low %v5220_v54, %v5234_v29  ;;  %v6755_v32 = vcombine.high %v5220_v54, %v5234_v29  ;;  %v5726_v26 = vcombine.low %v5227_v47, %v5241_v36  ;;  %v6756_v41 = vcombine.high %v5227_v47, %v5241_v36 }
0x121f   :  { %7931 = vmatmul.mubr.f32.vlgmr.msra.gmra.mrb[36].mxu1 %v5529_v5  ;;  %v5276_v11 = vcombine.high %v5274_v1, %v5274_v1  ;;  %v5290_v53 = vrot.slane %v5274_v1, %v8836_v40  ;;  %v5297_v59 = vrot.slane %v5275_v0, %v8836_v40  ;;  %v5305_v44 = vcombine.high %v5283_v2, %v5283_v2 }
0x1220   :  { %v10323_v14 = vrot.slane %v5679_v6, %v8836_v40  ;;  %v10326_v38 = vrot.slane %v6755_v32, %v8836_v40  ;;  %v10329_v31 = vrot.slane %v5726_v26, %v8836_v40  ;;  %v10332_v12 = vrot.slane %v6756_v41, %v8836_v40  ;;  %7933 = vmatprep.mubr.msk.f32.mxu1 %vm8643_vm0, %v8644_v4 }
0x1221   :  { %v5304_v34 = vrot.slane %v5276_v11, %v8836_v40  ;;  %v5306_v10 = vcombine.high %v5290_v53, %v5290_v53  ;;  %v5307_v50 = vcombine.high %v5297_v59, %v5297_v59  ;;  %v5728_v58 = vcombine.low %v5259_v45, %v5283_v2 }
0x1222   :  { %v10337_v55 = vcombine.low %v5297_v59, %v5305_v44  ;;  %v10340_v48 = vrot.slane %v5378_v39, %v8836_v40  ;;  %v5562_v35 = vcombine.low %v10241_v16, %v5547_v22  ;;  %v5563_v15 = vcombine.low %v5554_v25, %v5561_v33 }
0x1223   :  { %v5308_v63 = vcombine.high %v5304_v34, %v5304_v34  ;;  %v10350_v24 = vrot.slane %v5728_v58, %v8836_v40  ;;  %v10352_v20 = vcombine.low %v5307_v50, %v5290_v53  ;;  %v10354_v45 = vcombine.low %v5304_v34, %v5306_v10 }
0x1224   :  { %v5757_v52 = vrot.slane %v10337_v55, %v8836_v40  ;;  %v5570_v18 = vrot.slane %v5562_v35, %v8836_v40  ;;  %v5577_v3 = vrot.slane %v5563_v15, %v8836_v40  ;;  %v5323_v16 = vcombine.high %v10291_v51, %v10291_v51 }
0x1225   :  { %v10362_v19 = vcombine.low %v5308_v63, %v5322_v49  ;;  %v5785_v22 = vrot.slane %v10352_v20, %v8836_v40  ;;  %v5330_v25 = vrot.slane %v10291_v51, %v8836_v40  ;;  %v5441_v17 = vrot.slane %v7897_v46, %v8836_v40 }
0x1226   :  { %v5578_v56 = vcombine.low %v5570_v18, %v5577_v3  ;;  %v5337_v54 = vrot.slane %v5323_v16, %v8836_v40  ;;  %v5589_v47 = vrot.slane %v10256_v57, %v8836_v40  ;;  %v5612_v23 = vcombine.low %v10272_v30, %v10276_v13 }
0x1227   :  { %v5338_v21 = vcombine.high %v5330_v25, %v5330_v25  ;;  %v5346_v49 = vrot.slane %v5330_v25, %v8836_v40  ;;  %v5448_v27 = vrot.slane %v5441_v17, %v8836_v40  ;;  %v5386_v29 = vcombine.high %v4408_v42, %v4408_v42 }
0x1228   :  { %7934 = vmatmul.mubr.f32.gmra.mrb[38].mxu1 %v5578_v56  ;;  %v5339_v36 = vcombine.high %v5337_v54, %v5337_v54  ;;  %v5353_v51 = vrot.slane %v5337_v54, %v8836_v40  ;;  %v5611_v46 = vcombine.low %v5589_v47, %v10269_v28  ;;  %v5626_v39 = vrot.slane %v5612_v23, %v8836_v40 }
0x1229   :  { %v5360_v33 = vrot.slane %v5338_v21, %v8836_v40  ;;  %7936 = vmatprep.mubr.msk.f32.mxu1 %vm8643_vm0, %v8644_v4  ;;  %v5393_v57 = vrot.slane %v4408_v42, %v8836_v40  ;;  %v5400_v30 = vrot.slane %v5386_v29, %v8836_v40  ;;  %v5660_v13 = vcombine.low %v10279_v8, %v10287_v37 }
0x122a   :  { %v5367_v5 = vrot.slane %v5339_v36, %v8836_v40  ;;  %v5619_v1 = vrot.slane %v5611_v46, %v8836_v40  ;;  %v5661_v28 = vcombine.low %v5652_v61, %v5659_v60  ;;  %v5687_v0 = vrot.slane %v10289_v9, %v8836_v40 }
0x122b   :  { %v5778_v42 = vcombine.low %v5346_v49, %v5360_v33  ;;  %v6757_v2 = vcombine.high %v5346_v49, %v5360_v33  ;;  %v5401_v6 = vcombine.high %v5393_v57, %v5393_v57  ;;  %v5402_v32 = vcombine.high %v5400_v30, %v5400_v30 }
0x122c   :  { %v5825_v26 = vcombine.low %v5353_v51, %v5367_v5  ;;  %v6758_v8 = vcombine.high %v5353_v51, %v5367_v5  ;;  %v5627_v37 = vcombine.low %v5619_v1, %v5626_v39  ;;  %v5409_v41 = vrot.slane %v5393_v57, %v8836_v40 }
0x122d   :  { %v5806_v11 = vrot.slane %v5778_v42, %v8836_v40  ;;  %v5834_v43 = vrot.slane %v6757_v2, %v8836_v40  ;;  %v5416_v53 = vrot.slane %v5400_v30, %v8836_v40  ;;  %v5423_v62 = vrot.slane %v5401_v6, %v8836_v40 }
0x122e   :  { %v5841_v61 = vrot.slane %v5825_v26, %v8836_v40  ;;  %v5848_v9 = vrot.slane %v6758_v8, %v8836_v40  ;;  %7937 = vmatmul.mubr.f32.gmra.mrb[40].mxu1 %v5627_v37  ;;  %v5430_v60 = vrot.slane %v5402_v32, %v8836_v40  ;;  %v5431_v59 = vcombine.high %v5409_v41, %v5409_v41 }
0x122f   :  { %v5432_v44 = vcombine.high %v5416_v53, %v5416_v53  ;;  %v5433_v34 = vcombine.high %v5423_v62, %v5423_v62  ;;  %v5827_v10 = vcombine.low %v10340_v48, %v5409_v41  ;;  %7939 = vmatprep.mubr.msk.f32.mxu1 %vm8643_vm0, %v8644_v4  ;;  %v5668_v50 = vrot.slane %v5660_v13, %v8836_v40 }
0x1230   :  { %v5434_v58 = vcombine.high %v5430_v60, %v5430_v60  ;;  %v5873_v35 = vcombine.low %v5423_v62, %v5431_v59  ;;  %v5675_v15 = vrot.slane %v5661_v28, %v8836_v40  ;;  %v5694_v63 = vrot.slane %v10300_v7, %v8836_v40 }
0x1231   :  { %v5855_v18 = vrot.slane %v5827_v10, %v8836_v40  ;;  %v5874_v3 = vcombine.low %v5433_v34, %v5416_v53  ;;  %v5875_v16 = vcombine.low %v5430_v60, %v5432_v44  ;;  %v5710_v25 = vcombine.low %v10323_v14, %v10326_v38  ;;  %v6767_v44 = vld [vmem:[%s10520_s7] ss:$0 sm:$0xff] }
0x1232   :  { %v5876_v48 = vcombine.low %v5434_v58, %v5448_v27  ;;  %v5883_v17 = vrot.slane %v5873_v35, %v8836_v40  ;;  %v5676_v56 = vcombine.low %v5668_v50, %v5675_v15  ;;  %v5709_v54 = vcombine.low %v5687_v0, %v5694_v63 }
0x1233   :  { %v5890_v47 = vrot.slane %v5874_v3, %v8836_v40  ;;  %v5724_v23 = vrot.slane %v5710_v25, %v8836_v40  ;;  %v5758_v21 = vcombine.low %v10329_v31, %v10332_v12  ;;  %v5759_v7 = vcombine.low %v10350_v24, %v5757_v52 }
0x1234   :  { %7940 = vmatmul.mubr.f32.gmra.mrb[42].mxu1 %v5676_v56  ;;  %v5717_v14 = vrot.slane %v5709_v54, %v8836_v40  ;;  %v5792_v38 = vrot.slane %v10354_v45, %v8836_v40  ;;  %v5799_v49 = vrot.slane %v10362_v19, %v8836_v40  ;;  %v5856_v27 = vcombine.low %v5834_v43, %v5841_v61 }
0x1235   :  { %7942 = vmatprep.mubr.msk.f32.mxu1 %vm8643_vm0, %v8644_v4  ;;  %v5766_v31 = vrot.slane %v5758_v21, %v8836_v40  ;;  %v5773_v12 = vrot.slane %v5759_v7, %v8836_v40  ;;  %v5857_v55 = vcombine.low %v5848_v9, %v5855_v18  ;;  %v5897_v24 = vrot.slane %v5875_v16, %v8836_v40 }
0x1236   :  { %v5725_v52 = vcombine.low %v5717_v14, %v5724_v23  ;;  %v5807_v29 = vcombine.low %v5785_v22, %v5792_v38  ;;  %v5808_v45 = vcombine.low %v5799_v49, %v5806_v11  ;;  %v5864_v36 = vrot.slane %v5856_v27, %v8836_v40 }
0x1237   :  { %v5774_v19 = vcombine.low %v5766_v31, %v5773_v12  ;;  %v5871_v51 = vrot.slane %v5857_v55, %v8836_v40  ;;  %v5904_v46 = vrot.slane %v5876_v48, %v8836_v40  ;;  %v5905_v39 = vcombine.low %v5883_v17, %v5890_v47 }
0x1238   :  { %7943 = vmatmul.mubr.f32.gmra.mrb[44].mxu1 %v5725_v52  ;;  %v5815_v33 = vrot.slane %v5807_v29, %v8836_v40  ;;  %v5822_v57 = vrot.slane %v5808_v45, %v8836_v40 }
0x1239   :  { %7945 = vmatprep.mubr.msk.f32.mxu1 %vm8643_vm0, %v8644_v4  ;;  %v5872_v30 = vcombine.low %v5864_v36, %v5871_v51  ;;  %v5906_v20 = vcombine.low %v5897_v24, %v5904_v46  ;;  %v5913_v5 = vrot.slane %v5905_v39, %v8836_v40 }
0x123a   :  { %v5823_v22 = vcombine.low %v5815_v33, %v5822_v57  ;;  %v6557_v13 = vpop.f32.mrb[38].mxu0 }
0x123b   :  { %v5920_v1 = vrot.slane %v5906_v20, %v8836_v40  ;;  %v7991_v28 = vpop.f32.mrb[39].mxu0 }
0x123c   :  { %7946 = vmatmul.mubr.f32.gmra.mrb[46].mxu1 %v5774_v19 }
0x123d   :  { %7948 = vmatprep.mubr.msk.f32.mxu1 %vm8643_vm0, %v8644_v4  ;;  %v5921_v0 = vcombine.low %v5913_v5, %v5920_v1 }
0x123e   :  { %v6562_v42 = vpop.f32.mrb[40].mxu0 }
0x123f   :  { %v7994_v2 = vpop.f32.mrb[41].mxu0 }
0x1240   :  { %7949 = vmatmul.mubr.f32.gmra.mrb[48].mxu1 %v5823_v22 }
0x1241   :  { %7951 = vmatprep.mubr.msk.f32.mxu1 %vm8643_vm0, %v8644_v4 }
0x1242   :  { %v6567_v6 = vpop.f32.mrb[42].mxu0 }
0x1243   :  { %v7997_v32 = vpop.f32.mrb[43].mxu0 }
0x1244   :  { %7952 = vmatmul.mubr.f32.gmra.mrb[50].mxu1 %v5872_v30 }
0x1245   :  { %7954 = vmatprep.mubr.msk.f32.mxu1 %vm8643_vm0, %v8644_v4 }
0x1246   :  { %v6572_v26 = vpop.f32.mrb[44].mxu0 }
0x1247   :  { %v8000_v40 = vpop.f32.mrb[45].mxu0 }
0x1248   :  { %7955 = vmatmul.mubr.f32.gmra.mrb[52].mxu1 %v5921_v0 }
0x124a   :  { %v6577_v8 = vpop.f32.mrb[46].mxu0 }
0x124b   :  { %v8003_v37 = vpop.f32.mrb[47].mxu0 }
0x124e   :  { %v6582_v41 = vpop.f32.mrb[48].mxu0 }
0x124f   :  { %v8006_v11 = vpop.f32.mrb[49].mxu0 }
0x1252   :  { %v6587_v43 = vpop.f32.mrb[50].mxu0 }
0x1253   :  { %v8009_v53 = vpop.f32.mrb[51].mxu0 }
0x1256   :  { %v6592_v62 = vpop.f32.mrb[52].mxu0 }
0x1257   :  { %v8012_v61 = vpop.f32.mrb[53].mxu0 }
0x125a   :  { %v6597_v9 = vpop.f32.mrb[54].mxu0 }
0x125b   :  { %v8015_v60 = vpop.f32.mrb[55].mxu0 }
0x12f2   :  { %v5997_v59 = vpop.f32.mrb[36].mxu1 }
0x12f3   :  { %v6558_v34 = vadd.f32 %v6557_v13, %v5997_v59  ;;  %v7932_v4 = vpop.f32.mrb[37].mxu1 }
0x12f5   :  { %v6608_v10 = vadd.f32 %v6767_v44, %v6558_v34 }
0x12f7   :  { %6617 = vmax.xlane.f32.xlu0 %v6608_v10 }
0x12fb   :  { %v6002_v50 = vpop.f32.mrb[38].mxu1 }
0x12fc   :  { %v6563_v58 = vadd.f32 %v6562_v42, %v6002_v50  ;;  %v7935_v35 = vpop.f32.mrb[39].mxu1 }
0x12fe   :  { %v6609_v15 = vadd.f32 %v6767_v44, %v6563_v58 }
0x1300   :  { %6619 = vmax.xlane.f32.xlu1 %v6609_v15 }
0x1301   :  { %v6007_v63 = vpop.f32.mrb[40].mxu1 }
0x1302   :  { %v6568_v18 = vadd.f32 %v6567_v6, %v6007_v63  ;;  %v7938_v3 = vpop.f32.mrb[41].mxu1 }
0x1304   :  { %v6610_v16 = vadd.f32 %v6767_v44, %v6568_v18 }
0x1306   :  { %6621 = vmax.xlane.f32.xlu0 %v6610_v16 }
0x1307   :  { %v6012_v25 = vpop.f32.mrb[42].mxu1 }
0x1308   :  { %v6573_v48 = vadd.f32 %v6572_v26, %v6012_v25  ;;  %v7941_v17 = vpop.f32.mrb[43].mxu1 }
0x130a   :  { %v6611_v56 = vadd.f32 %v6767_v44, %v6573_v48 }
0x130b   :  { %v6017_v54 = vpop.f32.mrb[44].mxu1 }
0x130c   :  { %v6578_v47 = vadd.f32 %v6577_v8, %v6017_v54  ;;  %v7944_v23 = vpop.f32.mrb[45].mxu1  ;;  %6623 = vmax.xlane.f32.xlu1 %v6611_v56 }
0x130e   :  { %v6612_v21 = vadd.f32 %v6767_v44, %v6578_v47 }
0x130f   :  { %v6022_v7 = vpop.f32.mrb[46].mxu1 }
0x1310   :  { %v6583_v14 = vadd.f32 %v6582_v41, %v6022_v7  ;;  %v7947_v38 = vpop.f32.mrb[47].mxu1  ;;  %6625 = vmax.xlane.f32.xlu0 %v6612_v21 }
0x1312   :  { %v6613_v49 = vadd.f32 %v6767_v44, %v6583_v14 }
0x1313   :  { %v6027_v27 = vpop.f32.mrb[48].mxu1 }
0x1314   :  { %v6588_v31 = vadd.f32 %v6587_v43, %v6027_v27  ;;  %v7950_v12 = vpop.f32.mrb[49].mxu1  ;;  %6627 = vmax.xlane.f32.xlu1 %v6613_v49 }
0x1316   :  { %v6614_v55 = vadd.f32 %v6767_v44, %v6588_v31 }
0x1317   :  { %v6032_v24 = vpop.f32.mrb[50].mxu1 }
0x1318   :  { %v6593_v52 = vadd.f32 %v6592_v62, %v6032_v24  ;;  %6629 = vmax.xlane.f32.xlu0 %v6614_v55  ;;  %v7953_v29 = vpop.f32.mrb[51].mxu1 }
0x131a   :  { %v6615_v45 = vadd.f32 %v6767_v44, %v6593_v52 }
0x131b   :  { %v6037_v36 = vpop.f32.mrb[52].mxu1 }
0x131c   :  { %v6598_v19 = vadd.f32 %v6597_v9, %v6037_v36  ;;  %6631 = vmax.xlane.f32.xlu1 %v6615_v45  ;;  %v7956_v51 = vpop.f32.mrb[53].mxu1 }
0x131e   :  { %v6616_v46 = vadd.f32 %v6767_v44, %v6598_v19 }
0x1320   :  { %6633 = vmax.xlane.f32.xlu0 %v6616_v46 }
0x1384   :  { %v6618_v39 = vpop.xlane.xlu0 %6617 }
0x1385   :  { %v6635_v33 = vsub.f32 %v6608_v10, %v6618_v39 }
0x1387   :  { %v6644_v57 = vmul.f32 1.442695, %v6635_v33 }
0x1389   :  { %8606 = vpow2.f32 %v6644_v57 }
0x138d   :  { %v6620_v30 = vpop.xlane.xlu1 %6619 }
0x138e   :  { %v10454_v20 = vsub.f32 %v6609_v15, %v6620_v30 }
0x1390   :  { %v6646_v22 = vmul.f32 1.442695, %v10454_v20 }
0x1392   :  { %8608 = vpow2.f32 %v6646_v22 }
0x1393   :  { %v8607_v13 = vpop.eup %8606  ;;  %v6622_v5 = vpop.xlane.xlu0 %6621 }
0x1394   :  { %v10457_v1 = vsub.f32 %v6610_v16, %v6622_v5  ;;  %6662 = vadd.xlane.f32.xlu1 %v8607_v13 }
0x1396   :  { %v6648_v28 = vmul.f32 1.442695, %v10457_v1 }
0x1398   :  { %8610 = vpow2.f32 %v6648_v28 }
0x1399   :  { %v6624_v0 = vpop.xlane.xlu1 %6623 }
0x139a   :  { %v10460_v42 = vsub.f32 %v6611_v56, %v6624_v0 }
0x139c   :  { %v8609_v2 = vpop.eup %8608  ;;  %v6650_v6 = vmul.f32 1.442695, %v10460_v42 }
0x139d   :  { %v6626_v32 = vpop.xlane.xlu0 %6625  ;;  %6664 = vadd.xlane.f32.xlu0 %v8609_v2 }
0x139e   :  { %8612 = vpow2.f32 %v6650_v6  ;;  %v10463_v26 = vsub.f32 %v6612_v21, %v6626_v32 }
0x13a0   :  { %v6652_v40 = vmul.f32 1.442695, %v10463_v26 }
0x13a1   :  { %v6628_v8 = vpop.xlane.xlu1 %6627 }
0x13a2   :  { %v8611_v37 = vpop.eup %8610  ;;  %8614 = vpow2.f32 %v6652_v40  ;;  %v10466_v41 = vsub.f32 %v6613_v49, %v6628_v8 }
0x13a3   :  { %6666 = vadd.xlane.f32.xlu1 %v8611_v37 }
0x13a4   :  { %v6654_v11 = vmul.f32 1.442695, %v10466_v41 }
0x13a5   :  { %v6630_v43 = vpop.xlane.xlu0 %6629 }
0x13a6   :  { %8616 = vpow2.f32 %v6654_v11  ;;  %v10469_v53 = vsub.f32 %v6614_v55, %v6630_v43 }
0x13a8   :  { %v8613_v62 = vpop.eup %8612  ;;  %v6656_v61 = vmul.f32 1.442695, %v10469_v53 }
0x13a9   :  { %v6632_v9 = vpop.xlane.xlu1 %6631  ;;  %6668 = vadd.xlane.f32.xlu0 %v8613_v62 }
0x13aa   :  { %8618 = vpow2.f32 %v6656_v61  ;;  %v10472_v60 = vsub.f32 %v6615_v45, %v6632_v9 }
0x13ac   :  { %v8615_v59 = vpop.eup %8614  ;;  %v6658_v44 = vmul.f32 1.442695, %v10472_v60 }
0x13ad   :  { %6670 = vadd.xlane.f32.xlu1 %v8615_v59  ;;  %v6634_v34 = vpop.xlane.xlu0 %6633 }
0x13ae   :  { %8620 = vpow2.f32 %v6658_v44  ;;  %v10475_v4 = vsub.f32 %v6616_v46, %v6634_v34 }
0x13b0   :  { %v8617_v10 = vpop.eup %8616  ;;  %v6660_v50 = vmul.f32 1.442695, %v10475_v4 }
0x13b1   :  { %6672 = vadd.xlane.f32.xlu0 %v8617_v10 }
0x13b2   :  { %8622 = vpow2.f32 %v6660_v50 }
0x13b4   :  { %v8619_v58 = vpop.eup %8618 }
0x13b5   :  { %6674 = vadd.xlane.f32.xlu1 %v8619_v58 }
0x13b8   :  { %v8621_v35 = vpop.eup %8620 }
0x13b9   :  { %6676 = vadd.xlane.f32.xlu0 %v8621_v35 }
0x13bc   :  { %v8623_v15 = vpop.eup %8622 }
0x13bd   :  { %6678 = vadd.xlane.f32.xlu1 %v8623_v15 }
0x1421   :  { %v6663_v63 = vpop.xlane.xlu1 %6662 }
0x1422   :  { %8624 = vlog2.f32 %v6663_v63 }
0x142a   :  { %v6665_v18 = vpop.xlane.xlu0 %6664 }
0x142b   :  { %8626 = vlog2.f32 %v6665_v18 }
0x142c   :  { %v8625_v3 = vpop.eup %8624 }
0x142d   :  { %v6681_v16 = vmul.f32 0.6931472, %v8625_v3 }
0x142f   :  { %v6698_v25 = vsub.f32 %v6635_v33, %v6681_v16 }
0x1430   :  { %v6667_v48 = vpop.xlane.xlu1 %6666 }
0x1431   :  { %6707 = vst [vmem:[%s10521_s8] sm:$0xff] %v6698_v25  ;;  %8628 = vlog2.f32 %v6667_v48 }
0x1435   :  { %v8627_v17 = vpop.eup %8626 }
0x1436   :  { %v6683_v56 = vmul.f32 0.6931472, %v8627_v17  ;;  %v6669_v54 = vpop.xlane.xlu0 %6668 }
0x1437   :  { %8630 = vlog2.f32 %v6669_v54 }
0x1438   :  { %v6699_v47 = vsub.f32 %v10454_v20, %v6683_v56 }
0x143a   :  { %6708 = vst [vmem:[%s10521_s8 + $0x8] sm:$0xff] %v6699_v47  ;;  %v6671_v23 = vpop.xlane.xlu1 %6670 }
0x143b   :  { %v8629_v21 = vpop.eup %8628  ;;  %8632 = vlog2.f32 %v6671_v23 }
0x143c   :  { %v6685_v7 = vmul.f32 0.6931472, %v8629_v21 }
0x143e   :  { %v6700_v14 = vsub.f32 %v10457_v1, %v6685_v7  ;;  %v6673_v38 = vpop.xlane.xlu0 %6672 }
0x143f   :  { %8634 = vlog2.f32 %v6673_v38 }
0x1440   :  { %6709 = vst [vmem:[%s10521_s8 + $0x10] sm:$0xff] %v6700_v14 }
0x1441   :  { %v8631_v49 = vpop.eup %8630 }
0x1442   :  { %v6687_v27 = vmul.f32 0.6931472, %v8631_v49  ;;  %v6675_v31 = vpop.xlane.xlu1 %6674 }
0x1443   :  { %8636 = vlog2.f32 %v6675_v31 }
0x1444   :  { %v6701_v12 = vsub.f32 %v10460_v42, %v6687_v27 }
0x1445   :  { %v8633_v55 = vpop.eup %8632 }
0x1446   :  { %6710 = vst [vmem:[%s10521_s8 + $0x18] sm:$0xff] %v6701_v12  ;;  %v6689_v24 = vmul.f32 0.6931472, %v8633_v55  ;;  %v6677_v52 = vpop.xlane.xlu0 %6676 }
0x1447   :  { %8638 = vlog2.f32 %v6677_v52 }
0x1448   :  { %v6702_v29 = vsub.f32 %v10463_v26, %v6689_v24 }
0x1449   :  { %v8635_v45 = vpop.eup %8634 }
0x144a   :  { %6711 = vst [vmem:[%s10521_s8 + $0x20] sm:$0xff] %v6702_v29  ;;  %v6691_v36 = vmul.f32 0.6931472, %v8635_v45  ;;  %v6679_v19 = vpop.xlane.xlu1 %6678 }
0x144b   :  { %8640 = vlog2.f32 %v6679_v19 }
0x144c   :  { %v6703_v51 = vsub.f32 %v10466_v41, %v6691_v36 }
0x144d   :  { %v8637_v46 = vpop.eup %8636 }
0x144e   :  { %6712 = vst [vmem:[%s10521_s8 + $0x28] sm:$0xff] %v6703_v51  ;;  %v6693_v39 = vmul.f32 0.6931472, %v8637_v46 }
0x1450   :  { %v6704_v33 = vsub.f32 %v10469_v53, %v6693_v39 }
0x1451   :  { %v8639_v57 = vpop.eup %8638 }
0x1452   :  { %6713 = vst [vmem:[%s10521_s8 + $0x30] sm:$0xff] %v6704_v33  ;;  %v6695_v30 = vmul.f32 0.6931472, %v8639_v57 }
0x1454   :  { %v6705_v20 = vsub.f32 %v10472_v60, %v6695_v30 }
0x1455   :  { %v8641_v22 = vpop.eup %8640 }
0x1456   :  { %6714 = vst [vmem:[%s10521_s8 + $0x38] sm:$0xff] %v6705_v20  ;;  %v6697_v13 = vmul.f32 0.6931472, %v8641_v22 }
0x1458   :  { %v6706_v5 = vsub.f32 %v10475_v4, %v6697_v13 }
0x145a   :  { %6715 = vst [vmem:[%s10521_s8 + $0x40] sm:$0xff] %v6706_v5 }

</bundles_post_ra>
